<compile_context>
chip_gen: v6e
topology: v6e:2x2x1
jax: 0.10.0
libtpu: 0.0.40
codegen_flags: <defaults>
</compile_context>

<pallas_src>
import functools
from typing import List

import jax
import jax.numpy as jnp
from jax.experimental import pallas as pl
from jax.experimental.pallas import tpu as pltpu


# ----------------------------- Pallas kernels ------------------------------

def _fastflow_layer_kernel(clamp, x_ref, cond_ref, wenc_ref, benc_ref,
                           w1_ref, b1_ref, w2_ref, b2_ref, stats_ref):
    """Fused per-layer pipeline on a (channels, fibers) tile.

    x_ref     : (cin, tm)         pooled image fibers
    cond_ref  : (cd,  tm)         positional condition per fiber (batch-periodic, 16 rows)
    wenc_ref  : (c,   cin)        encoder 1x1-conv weight (transposed)
    benc_ref  : (c,   1)
    w1_ref    : (nb, hd, ch+cd)   subnet layer-1 weight, [x1-half | cond-half]   (bf16)
    b1_ref    : (nb, hd, 1)
    w2_ref    : (nb, c,  hd)      fused [Ws ; Wt] second-layer weight            (bf16)
    b2_ref    : (nb, c,  1)       fused [bs ; bt]
    stats_ref : (3, tm)  rows = [mean_c p_u, 0.5*sum_c p_u^2, sum_c s (log|det J|)]
    """
    cin, tm = x_ref.shape
    c = wenc_ref.shape[0]
    nblocks = w1_ref.shape[0]
    ch = c // 2

    # ---- encoder 1x1 conv + relu: cin(=3) broadcast VPU FMAs (MXU K=3 is wasteful)
    feat = wenc_ref[:, 0:1] * x_ref[0:1, :]
    for k in range(1, cin):
        feat = feat + wenc_ref[:, k:k + 1] * x_ref[k:k + 1, :]
    feat = jnp.maximum(feat + benc_ref[...], 0.0)                        # (c, tm) f32

    cond = cond_ref[...]                                                 # (cd, tm) f32

    # ---- coupling blocks; alternating halves (permutation folded into structure)
    xa = feat[:ch, :]
    xb = feat[ch:, :]
    s_acc = jnp.zeros((ch, tm), jnp.float32)
    for blk in range(nblocks):
        x1, x2 = (xa, xb) if blk % 2 == 0 else (xb, xa)
        # subnet layer 1: cat([x1, cond]) @ W1  (sublane concat, single MXU push)
        inp = jnp.concatenate([x1, cond], axis=0).astype(w1_ref.dtype)   # (ch+cd, tm)
        h = jnp.dot(w1_ref[blk], inp,
                    preferred_element_type=jnp.float32) + b1_ref[blk]    # (hd, tm)
        h = jnp.maximum(h, 0.0).astype(w2_ref.dtype)                     # (hd, tm) bf16
        # subnet layer 2: single fused matmul producing [s_raw ; t]
        st = jnp.dot(w2_ref[blk], h,
                     preferred_element_type=jnp.float32) + b2_ref[blk]   # (c, tm)
        s = clamp * jnp.tanh(st[:ch, :])
        t = st[ch:, :]
        y2 = x2 * jnp.exp(s) + t                                         # (ch, tm)
        s_acc = s_acc + s
        if blk % 2 == 0:
            xb = y2
        else:
            xa = y2

    # ---- per-fiber channel reductions on the XLU; ONE lane-dense (3, tm) store
    psum = jnp.sum(xa, axis=0, keepdims=True) + jnp.sum(xb, axis=0, keepdims=True)
    pss = (jnp.sum(xa * xa, axis=0, keepdims=True)
           + jnp.sum(xb * xb, axis=0, keepdims=True))
    ssum = jnp.sum(s_acc, axis=0, keepdims=True)
    stats_ref[...] = jnp.concatenate(
        [psum * (1.0 / c),      # torch.mean(p_u, 1)   -> distribution
         0.5 * pss,             # 0.5 * sum_c p_u^2    -> get_logp term
         ssum], axis=0)         # sum_c s              -> log_jac_det


def _anomaly_map_kernel(n_layers, *refs):
    """Fused AnomalyMapGenerator: exp + bilinear upsample (as matmul) + layer sum.

    refs = (d_0, k_0, d_1, k_1, ..., score_out)
      d_l : (B, hw_l)          max-shifted log-density of layer l
      k_l : (hw_l, Hout*Wout)  precomputed kron(Wh, Ww) bilinear matrix (align_corners=True)
      out : (B, Hout*Wout)     lane-dense accumulated score map
    """
    out_ref = refs[-1]
    acc = None
    for layer in range(n_layers):
        d_ref, k_ref = refs[2 * layer], refs[2 * layer + 1]
        m = jnp.exp(d_ref[...])                                          # (B, hw_l)
        hw_l = m.shape[1]
        if hw_l <= 16:
            # tiny-K interpolation: broadcast VPU FMAs instead of a drain-bound MXU dot
            r = m[:, 0:1] * k_ref[0:1, :]
            for q in range(1, hw_l):
                r = r + m[:, q:q + 1] * k_ref[q:q + 1, :]
        else:
            r = jnp.dot(m, k_ref[...], preferred_element_type=jnp.float32)
        acc = r if acc is None else acc + r
    out_ref[...] = acc


# ----------------------------- kernel wrappers ------------------------------

def _fiber_tile(n: int) -> int:
    """Lane-axis tile: full extent when small, else 256/512 so grid >= 2 (v7x megacore)."""
    if n % 128 != 0 or n <= 256:
        return n
    for tm in (512, 256, 128):
        if n % tm == 0 and n // tm >= 2:
            return tm
    return n


_COMPILER_PARAMS = pltpu.CompilerParams(
    dimension_semantics=("parallel",),
    vmem_limit_bytes=48 * 1024 * 1024,   # headroom above default scoped limit, < v7x 64 MiB
)


def fastflow_layer(x_t, cond_f, enc_w, enc_b, w1, b1, w2, b2, clamp):
    cin, n = x_t.shape
    cd = cond_f.shape[0]
    c = enc_w.shape[0]
    nb, hd, kin = w1.shape
    tm = _fiber_tile(n)
    kern = functools.partial(_fastflow_layer_kernel, clamp)
    return pl.pallas_call(
        kern,
        out_shape=jax.ShapeDtypeStruct((3, n), jnp.float32),
        grid=(n // tm,),
        in_specs=[
            pl.BlockSpec((cin, tm), lambda i: (0, i)),
            pl.BlockSpec((cd, tm), lambda i: (0, i)),
            pl.BlockSpec((c, cin), lambda i: (0, 0)),
            pl.BlockSpec((c, 1), lambda i: (0, 0)),
            pl.BlockSpec((nb, hd, kin), lambda i: (0, 0, 0)),
            pl.BlockSpec((nb, hd, 1), lambda i: (0, 0, 0)),
            pl.BlockSpec((nb, c, hd), lambda i: (0, 0, 0)),
            pl.BlockSpec((nb, c, 1), lambda i: (0, 0, 0)),
        ],
        out_specs=pl.BlockSpec((3, tm), lambda i: (0, i)),
        compiler_params=_COMPILER_PARAMS,
    )(x_t, cond_f, enc_w, enc_b, w1, b1, w2, b2)


def anomaly_score_map(shifted, interps, image_size):
    b = shifted[0].shape[0]
    hw_out = image_size[0] * image_size[1]
    n_layers = len(shifted)
    inputs, in_specs = [], []
    for d, k in zip(shifted, interps):
        hw_l = d.shape[1]
        inputs += [d, k]
        in_specs += [pl.BlockSpec((b, hw_l), lambda i: (0, 0)),
                     pl.BlockSpec((hw_l, hw_out), lambda i: (0, 0))]
    kern = functools.partial(_anomaly_map_kernel, n_layers)
    return pl.pallas_call(
        kern,
        out_shape=jax.ShapeDtypeStruct((b, hw_out), jnp.float32),
        grid=(1,),
        in_specs=in_specs,
        out_specs=pl.BlockSpec((b, hw_out), lambda i: (0, 0)),
        compiler_params=pltpu.CompilerParams(dimension_semantics=("arbitrary",)),
    )(*inputs)


# --------------------------------- glue -------------------------------------

def bilinear_matrix(out_size: int, in_size: int) -> jnp.ndarray:
    """(out_size, in_size) bilinear interpolation weights, align_corners=True (as in module)."""
    if in_size == 1:
        return jnp.ones((out_size, 1), jnp.float32)
    pos = jnp.arange(out_size, dtype=jnp.float32) * (in_size - 1) / max(out_size - 1, 1)
    lo = jnp.floor(pos).astype(jnp.int32)
    hi = jnp.minimum(lo + 1, in_size - 1)
    frac = (pos - lo.astype(jnp.float32))[:, None]
    return ((1.0 - frac) * jax.nn.one_hot(lo, in_size, dtype=jnp.float32)
            + frac * jax.nn.one_hot(hi, in_size, dtype=jnp.float32))


def positional_condition(cond_dim: int, h: int, w: int) -> jnp.ndarray:
    """Deterministic sinusoidal 2D positional condition, shape (h*w, cond_dim)."""
    assert cond_dim % 4 == 0
    ys = jnp.arange(h, dtype=jnp.float32) / max(h - 1, 1)
    xs = jnp.arange(w, dtype=jnp.float32) / max(w - 1, 1)
    yy, xx = jnp.meshgrid(ys, xs, indexing="ij")
    grid = jnp.stack([yy, xx], axis=-1).reshape(h * w, 2)            # (hw, 2)
    freqs = 2.0 ** jnp.arange(cond_dim // 4, dtype=jnp.float32)      # (cd/4,)
    ang = grid[:, :, None] * freqs[None, None, :] * jnp.pi           # (hw, 2, cd/4)
    return jnp.concatenate([jnp.sin(ang), jnp.cos(ang)], axis=-1).reshape(h * w, cond_dim)


def avg_pool_nchw(x, factor):
    b, c, h, w = x.shape
    return x.reshape(b, c, h // factor, factor, w // factor, factor).mean(axis=(3, 5))


# hyperparameters mirroring the module's __init__
POOL_LAYERS: List[str] = ["layer1", "layer2", "layer3"]
POOL_DIMS = [16, 32, 64]          # encoder out_dims per pool layer
DOWN_FACTORS = [4, 8, 16]         # backbone spatial strides per pool layer
CONDITION_VECTOR = 16             # hparams.model.condition_vector
COUPLING_BLOCKS = 2               # hparams.model.coupling_blocks
CLAMP_ALPHA = 1.9                 # hparams.model.clamp_alpha
IMAGE_SIZE = (32, 32)             # hparams.model.input_size
FIBER_BATCH_SIZE = 64             # hparams.dataset.fiber_batch_size (unused at inference)


def init_params(key):
    """Parameters + static-shape constants, already in the fused-kernel layout."""
    hout, wout = IMAGE_SIZE
    layers = []
    for c, factor in zip(POOL_DIMS, DOWN_FACTORS):
        ch, hd = c // 2, 2 * c
        hk, wk = hout // factor, wout // factor
        hw = hk * wk
        key, k1, k2 = jax.random.split(key, 3)
        enc_w = jax.random.normal(k1, (c, 3), jnp.float32) * 0.5
        enc_b = jax.random.normal(k2, (c, 1), jnp.float32) * 0.1
        w1s, b1s, w2s, b2s = [], [], [], []
        for _ in range(COUPLING_BLOCKS):
            key, kw1, kb1, kw2, kb2 = jax.random.split(key, 5)
            w1 = jax.random.normal(kw1, (ch + CONDITION_VECTOR, hd), jnp.float32) * 0.1
            b1 = jax.random.normal(kb1, (hd, 1), jnp.float32) * 0.01
            w2 = jax.random.normal(kw2, (hd, c), jnp.float32) * 0.1
            b2 = jax.random.normal(kb2, (c, 1), jnp.float32) * 0.01
            w1s.append(w1.T)        # (hd, ch+cd)  rows of input: [x1-half | cond-half]
            b1s.append(b1)          # (hd, 1)
            w2s.append(w2.T)        # (c, hd)      rows [:ch] -> s, [ch:] -> t (fused Ws/Wt)
            b2s.append(b2)          # (c, 1)
        # static-shape constants hoisted out of the forward pass
        cond_hw = positional_condition(CONDITION_VECTOR, hk, wk)     # (hw, cd)
        wh = bilinear_matrix(hout, hk)                               # (Hout, hk)
        ww_t = bilinear_matrix(wout, wk).T                           # (wk, Wout)
        interp = jnp.einsum("ip,qj->pqij", wh, ww_t).reshape(hw, hout * wout)
        layers.append({
            "enc_w": enc_w,                                          # (c, 3)
            "enc_b": enc_b,                                          # (c, 1)
            "w1": jnp.stack(w1s).astype(jnp.bfloat16),               # (nb, hd, ch+cd)
            "b1": jnp.stack(b1s),                                    # (nb, hd, 1)
            "w2": jnp.stack(w2s).astype(jnp.bfloat16),               # (nb, c, hd)
            "b2": jnp.stack(b2s),                                    # (nb, c, 1)
            "cond": cond_hw.T,                                       # (cd, hw)
            "interp": interp,                                        # (hw, Hout*Wout)
        })
    return {"layers": layers}


def fastflow_forward(images, params):
    """images: NCHW float32 (B, 3, H, W) -> anomaly map (B, H_img, W_img)."""
    b = images.shape[0]
    hout, wout = IMAGE_SIZE
    distribution = []

    for layer_idx in range(len(POOL_LAYERS)):
        p = params["layers"][layer_idx]

        # --- synthetic encoder activation input (detached / frozen in torch) ---
        pooled = avg_pool_nchw(images, DOWN_FACTORS[layer_idx])      # (B, 3, hk, wk)
        _, _, hk, wk = pooled.shape
        hw = hk * wk
        n = b * hw
        x_t = pooled.transpose(1, 0, 2, 3).reshape(3, n)             # (3, n) fibers on lanes

        # positional condition per fiber (16 rows; negligible batch duplication)
        cond_f = jnp.tile(p["cond"], (1, b))                         # (cd, n)

        # --- fused encoder + coupling blocks + per-fiber reductions ---
        stats = fastflow_layer(x_t, cond_f, p["enc_w"], p["enc_b"],
                               p["w1"], p["b1"], p["w2"], p["b2"], CLAMP_ALPHA)

        # distribution.append(torch.mean(p_u, 1)) -> (B, hw)
        distribution.append(stats[0].reshape(b, hw))
        # stats rows 1/2 hold the get_logp terms (0.5*sum p_u^2, log_jac_det); the
        # module's forward computes get_logp but does not return it, so it is dropped here.

    # --- AnomalyMapGenerator.compute_anomaly_map (fused over layers) ---
    # Global max over the whole batch matches the reference; torch does it in float64.
    shifted = [d - jnp.max(d) for d in distribution]
    interps = [params["layers"][i]["interp"] for i in range(len(POOL_LAYERS))]
    score_map = anomaly_score_map(shifted, interps, IMAGE_SIZE)      # (B, Hout*Wout)
    score_map = score_map.reshape(b, hout, wout)
    anomaly_map = jnp.max(score_map) - score_map
    return anomaly_map


if __name__ == "__main__":
    key = jax.random.PRNGKey(0)
    k_img, k_par = jax.random.split(key)
    images = jax.random.normal(k_img, (8, 3, IMAGE_SIZE[0], IMAGE_SIZE[1]), jnp.float32)
    params = init_params(k_par)

    fwd = jax.jit(fastflow_forward)
    out = jax.block_until_ready(fwd(images, params))
    assert out.shape == (8, IMAGE_SIZE[0], IMAGE_SIZE[1])
    assert bool(jnp.all(jnp.isfinite(out)))
    print("KERNEL_OK")
</pallas_src>

<mosaic_0001>
module attributes {stable_mosaic.version = 11 : i64} {
  func.func @_fastflow_layer_kernel(%arg0: i32, %arg1: memref<3x256xf32, #tpu.memory_space<vmem>>, %arg2: memref<16x256xf32, #tpu.memory_space<vmem>>, %arg3: memref<16x3xf32, #tpu.memory_space<vmem>>, %arg4: memref<16x1xf32, #tpu.memory_space<vmem>>, %arg5: memref<2x32x24xbf16, #tpu.memory_space<vmem>>, %arg6: memref<2x32x1xf32, #tpu.memory_space<vmem>>, %arg7: memref<2x16x32xbf16, #tpu.memory_space<vmem>>, %arg8: memref<2x16x1xf32, #tpu.memory_space<vmem>>, %arg9: memref<3x256xf32, #tpu.memory_space<vmem>>) attributes {dimension_semantics = [#tpu.dimension_semantics<parallel>], iteration_bounds = array<i64: 2>, scalar_prefetch = 0 : i64, scratch_operands = 0 : i64, tpu.core_type = #tpu.core_type<tc>, window_params = [{transform_indices = @transform_0, window_bounds = array<i64: 3, 256>}, {transform_indices = @transform_1, window_bounds = array<i64: 16, 256>}, {pipeline_mode = #tpu.pipeline_mode<synchronous>, transform_indices = @transform_2, window_bounds = array<i64: 16, 3>}, {pipeline_mode = #tpu.pipeline_mode<synchronous>, transform_indices = @transform_3, window_bounds = array<i64: 16, 1>}, {pipeline_mode = #tpu.pipeline_mode<synchronous>, transform_indices = @transform_4, window_bounds = array<i64: 2, 32, 24>}, {pipeline_mode = #tpu.pipeline_mode<synchronous>, transform_indices = @transform_5, window_bounds = array<i64: 2, 32, 1>}, {pipeline_mode = #tpu.pipeline_mode<synchronous>, transform_indices = @transform_6, window_bounds = array<i64: 2, 16, 32>}, {pipeline_mode = #tpu.pipeline_mode<synchronous>, transform_indices = @transform_7, window_bounds = array<i64: 2, 16, 1>}, {transform_indices = @transform_8, window_bounds = array<i64: 3, 256>}]} {
    %c0 = arith.constant 0 : index
    %c0_0 = arith.constant 0 : index
    %0 = vector.load %arg3[%c0, %c0_0] : memref<16x3xf32, #tpu.memory_space<vmem>>, vector<16x1xf32>
    %c0_1 = arith.constant 0 : index
    %c0_2 = arith.constant 0 : index
    %1 = vector.load %arg1[%c0_1, %c0_2] : memref<3x256xf32, #tpu.memory_space<vmem>>, vector<1x256xf32>
    %2 = vector.broadcast %0 : vector<16x1xf32> to vector<16x256xf32>
    %3 = vector.broadcast %1 : vector<1x256xf32> to vector<16x256xf32>
    %4 = arith.mulf %2, %3 : vector<16x256xf32>
    %c0_3 = arith.constant 0 : index
    %c1 = arith.constant 1 : index
    %5 = vector.load %arg3[%c0_3, %c1] : memref<16x3xf32, #tpu.memory_space<vmem>>, vector<16x1xf32>
    %c1_4 = arith.constant 1 : index
    %c0_5 = arith.constant 0 : index
    %6 = vector.load %arg1[%c1_4, %c0_5] : memref<3x256xf32, #tpu.memory_space<vmem>>, vector<1x256xf32>
    %7 = vector.broadcast %5 : vector<16x1xf32> to vector<16x256xf32>
    %8 = vector.broadcast %6 : vector<1x256xf32> to vector<16x256xf32>
    %9 = arith.mulf %7, %8 : vector<16x256xf32>
    %10 = arith.addf %4, %9 : vector<16x256xf32>
    %c0_6 = arith.constant 0 : index
    %c2 = arith.constant 2 : index
    %11 = vector.load %arg3[%c0_6, %c2] : memref<16x3xf32, #tpu.memory_space<vmem>>, vector<16x1xf32>
    %c2_7 = arith.constant 2 : index
    %c0_8 = arith.constant 0 : index
    %12 = vector.load %arg1[%c2_7, %c0_8] : memref<3x256xf32, #tpu.memory_space<vmem>>, vector<1x256xf32>
    %13 = vector.broadcast %11 : vector<16x1xf32> to vector<16x256xf32>
    %14 = vector.broadcast %12 : vector<1x256xf32> to vector<16x256xf32>
    %15 = arith.mulf %13, %14 : vector<16x256xf32>
    %16 = arith.addf %10, %15 : vector<16x256xf32>
    %c0_9 = arith.constant 0 : index
    %c0_10 = arith.constant 0 : index
    %17 = vector.load %arg4[%c0_9, %c0_10] : memref<16x1xf32, #tpu.memory_space<vmem>>, vector<16x1xf32>
    %18 = vector.broadcast %17 : vector<16x1xf32> to vector<16x256xf32>
    %19 = arith.addf %16, %18 : vector<16x256xf32>
    %cst = arith.constant 0.000000e+00 : f32
    %20 = vector.broadcast %cst : f32 to vector<16x256xf32>
    %21 = arith.maximumf %19, %20 : vector<16x256xf32>
    %c0_11 = arith.constant 0 : index
    %c0_12 = arith.constant 0 : index
    %22 = vector.load %arg2[%c0_11, %c0_12] : memref<16x256xf32, #tpu.memory_space<vmem>>, vector<16x256xf32>
    %23 = vector.extract_strided_slice %21 {offsets = [0, 0], sizes = [8, 256], strides = [1, 1]} : vector<16x256xf32> to vector<8x256xf32>
    %24 = vector.extract_strided_slice %21 {offsets = [8, 0], sizes = [8, 256], strides = [1, 1]} : vector<16x256xf32> to vector<8x256xf32>
    %cst_13 = arith.constant 0.000000e+00 : f32
    %25 = vector.broadcast %cst_13 : f32 to vector<8x256xf32>
    %26 = tpu.concatenate %23, %22 in 0 : vector<8x256xf32>, vector<16x256xf32> -> vector<24x256xf32>
    %27 = arith.truncf %26 : vector<24x256xf32> to vector<24x256xbf16>
    %c0_14 = arith.constant 0 : index
    %c0_15 = arith.constant 0 : index
    %c0_16 = arith.constant 0 : index
    %28 = vector.load %arg5[%c0_14, %c0_15, %c0_16] : memref<2x32x24xbf16, #tpu.memory_space<vmem>>, vector<1x32x24xbf16>
    %29 = vector.shape_cast %28 : vector<1x32x24xbf16> to vector<32x24xbf16>
    %cst_17 = arith.constant dense<0.000000e+00> : vector<32x256xf32>
    %30 = tpu.matmul %29, %27, %cst_17 {dimension_numbers = #tpu.dot_dimension_numbers<[1], [0], [0], [1], [0, 0, 1, 1], [], []>} : vector<32x24xbf16>, vector<24x256xbf16>, vector<32x256xf32> -> vector<32x256xf32>
    %c0_18 = arith.constant 0 : index
    %c0_19 = arith.constant 0 : index
    %c0_20 = arith.constant 0 : index
    %31 = vector.load %arg6[%c0_18, %c0_19, %c0_20] : memref<2x32x1xf32, #tpu.memory_space<vmem>>, vector<1x32x1xf32>
    %32 = vector.shape_cast %31 : vector<1x32x1xf32> to vector<32x1xf32>
    %33 = vector.broadcast %32 : vector<32x1xf32> to vector<32x256xf32>
    %34 = arith.addf %30, %33 : vector<32x256xf32>
    %cst_21 = arith.constant 0.000000e+00 : f32
    %35 = vector.broadcast %cst_21 : f32 to vector<32x256xf32>
    %36 = arith.maximumf %34, %35 : vector<32x256xf32>
    %37 = arith.truncf %36 : vector<32x256xf32> to vector<32x256xbf16>
    %c0_22 = arith.constant 0 : index
    %c0_23 = arith.constant 0 : index
    %c0_24 = arith.constant 0 : index
    %38 = vector.load %arg7[%c0_22, %c0_23, %c0_24] : memref<2x16x32xbf16, #tpu.memory_space<vmem>>, vector<1x16x32xbf16>
    %39 = vector.shape_cast %38 : vector<1x16x32xbf16> to vector<16x32xbf16>
    %cst_25 = arith.constant dense<0.000000e+00> : vector<16x256xf32>
    %40 = tpu.matmul %39, %37, %cst_25 {dimension_numbers = #tpu.dot_dimension_numbers<[1], [0], [0], [1], [0, 0, 1, 1], [], []>} : vector<16x32xbf16>, vector<32x256xbf16>, vector<16x256xf32> -> vector<16x256xf32>
    %c0_26 = arith.constant 0 : index
    %c0_27 = arith.constant 0 : index
    %c0_28 = arith.constant 0 : index
    %41 = vector.load %arg8[%c0_26, %c0_27, %c0_28] : memref<2x16x1xf32, #tpu.memory_space<vmem>>, vector<1x16x1xf32>
    %42 = vector.shape_cast %41 : vector<1x16x1xf32> to vector<16x1xf32>
    %43 = vector.broadcast %42 : vector<16x1xf32> to vector<16x256xf32>
    %44 = arith.addf %40, %43 : vector<16x256xf32>
    %45 = vector.extract_strided_slice %44 {offsets = [0, 0], sizes = [8, 256], strides = [1, 1]} : vector<16x256xf32> to vector<8x256xf32>
    %46 = math.tanh %45 : vector<8x256xf32>
    %cst_29 = arith.constant 1.900000e+00 : f32
    %47 = vector.broadcast %cst_29 : f32 to vector<8x256xf32>
    %48 = arith.mulf %47, %46 : vector<8x256xf32>
    %49 = vector.extract_strided_slice %44 {offsets = [8, 0], sizes = [8, 256], strides = [1, 1]} : vector<16x256xf32> to vector<8x256xf32>
    %50 = math.exp %48 : vector<8x256xf32>
    %51 = arith.mulf %24, %50 : vector<8x256xf32>
    %52 = arith.addf %51, %49 : vector<8x256xf32>
    %53 = arith.addf %25, %48 : vector<8x256xf32>
    %54 = tpu.concatenate %52, %22 in 0 : vector<8x256xf32>, vector<16x256xf32> -> vector<24x256xf32>
    %55 = arith.truncf %54 : vector<24x256xf32> to vector<24x256xbf16>
    %c1_30 = arith.constant 1 : index
    %c0_31 = arith.constant 0 : index
    %c0_32 = arith.constant 0 : index
    %56 = vector.load %arg5[%c1_30, %c0_31, %c0_32] : memref<2x32x24xbf16, #tpu.memory_space<vmem>>, vector<1x32x24xbf16>
    %57 = vector.shape_cast %56 : vector<1x32x24xbf16> to vector<32x24xbf16>
    %cst_33 = arith.constant dense<0.000000e+00> : vector<32x256xf32>
    %58 = tpu.matmul %57, %55, %cst_33 {dimension_numbers = #tpu.dot_dimension_numbers<[1], [0], [0], [1], [0, 0, 1, 1], [], []>} : vector<32x24xbf16>, vector<24x256xbf16>, vector<32x256xf32> -> vector<32x256xf32>
    %c1_34 = arith.constant 1 : index
    %c0_35 = arith.constant 0 : index
    %c0_36 = arith.constant 0 : index
    %59 = vector.load %arg6[%c1_34, %c0_35, %c0_36] : memref<2x32x1xf32, #tpu.memory_space<vmem>>, vector<1x32x1xf32>
    %60 = vector.shape_cast %59 : vector<1x32x1xf32> to vector<32x1xf32>
    %61 = vector.broadcast %60 : vector<32x1xf32> to vector<32x256xf32>
    %62 = arith.addf %58, %61 : vector<32x256xf32>
    %cst_37 = arith.constant 0.000000e+00 : f32
    %63 = vector.broadcast %cst_37 : f32 to vector<32x256xf32>
    %64 = arith.maximumf %62, %63 : vector<32x256xf32>
    %65 = arith.truncf %64 : vector<32x256xf32> to vector<32x256xbf16>
    %c1_38 = arith.constant 1 : index
    %c0_39 = arith.constant 0 : index
    %c0_40 = arith.constant 0 : index
    %66 = vector.load %arg7[%c1_38, %c0_39, %c0_40] : memref<2x16x32xbf16, #tpu.memory_space<vmem>>, vector<1x16x32xbf16>
    %67 = vector.shape_cast %66 : vector<1x16x32xbf16> to vector<16x32xbf16>
    %cst_41 = arith.constant dense<0.000000e+00> : vector<16x256xf32>
    %68 = tpu.matmul %67, %65, %cst_41 {dimension_numbers = #tpu.dot_dimension_numbers<[1], [0], [0], [1], [0, 0, 1, 1], [], []>} : vector<16x32xbf16>, vector<32x256xbf16>, vector<16x256xf32> -> vector<16x256xf32>
    %c1_42 = arith.constant 1 : index
    %c0_43 = arith.constant 0 : index
    %c0_44 = arith.constant 0 : index
    %69 = vector.load %arg8[%c1_42, %c0_43, %c0_44] : memref<2x16x1xf32, #tpu.memory_space<vmem>>, vector<1x16x1xf32>
    %70 = vector.shape_cast %69 : vector<1x16x1xf32> to vector<16x1xf32>
    %71 = vector.broadcast %70 : vector<16x1xf32> to vector<16x256xf32>
    %72 = arith.addf %68, %71 : vector<16x256xf32>
    %73 = vector.extract_strided_slice %72 {offsets = [0, 0], sizes = [8, 256], strides = [1, 1]} : vector<16x256xf32> to vector<8x256xf32>
    %74 = math.tanh %73 : vector<8x256xf32>
    %cst_45 = arith.constant 1.900000e+00 : f32
    %75 = vector.broadcast %cst_45 : f32 to vector<8x256xf32>
    %76 = arith.mulf %75, %74 : vector<8x256xf32>
    %77 = vector.extract_strided_slice %72 {offsets = [8, 0], sizes = [8, 256], strides = [1, 1]} : vector<16x256xf32> to vector<8x256xf32>
    %78 = math.exp %76 : vector<8x256xf32>
    %79 = arith.mulf %23, %78 : vector<8x256xf32>
    %80 = arith.addf %79, %77 : vector<8x256xf32>
    %81 = arith.addf %53, %76 : vector<8x256xf32>
    %cst_46 = arith.constant dense<0.000000e+00> : vector<256xf32>
    %82 = vector.multi_reduction <add>, %80, %cst_46 [0] : vector<8x256xf32> to vector<256xf32>
    %83 = vector.shape_cast %82 : vector<256xf32> to vector<1x256xf32>
    %cst_47 = arith.constant dense<0.000000e+00> : vector<256xf32>
    %84 = vector.multi_reduction <add>, %52, %cst_47 [0] : vector<8x256xf32> to vector<256xf32>
    %85 = vector.shape_cast %84 : vector<256xf32> to vector<1x256xf32>
    %86 = arith.addf %83, %85 : vector<1x256xf32>
    %87 = arith.mulf %80, %80 : vector<8x256xf32>
    %cst_48 = arith.constant dense<0.000000e+00> : vector<256xf32>
    %88 = vector.multi_reduction <add>, %87, %cst_48 [0] : vector<8x256xf32> to vector<256xf32>
    %89 = vector.shape_cast %88 : vector<256xf32> to vector<1x256xf32>
    %90 = arith.mulf %52, %52 : vector<8x256xf32>
    %cst_49 = arith.constant dense<0.000000e+00> : vector<256xf32>
    %91 = vector.multi_reduction <add>, %90, %cst_49 [0] : vector<8x256xf32> to vector<256xf32>
    %92 = vector.shape_cast %91 : vector<256xf32> to vector<1x256xf32>
    %93 = arith.addf %89, %92 : vector<1x256xf32>
    %cst_50 = arith.constant dense<0.000000e+00> : vector<256xf32>
    %94 = vector.multi_reduction <add>, %81, %cst_50 [0] : vector<8x256xf32> to vector<256xf32>
    %95 = vector.shape_cast %94 : vector<256xf32> to vector<1x256xf32>
    %cst_51 = arith.constant 6.250000e-02 : f32
    %96 = vector.broadcast %cst_51 : f32 to vector<1x256xf32>
    %97 = arith.mulf %86, %96 : vector<1x256xf32>
    %cst_52 = arith.constant 5.000000e-01 : f32
    %98 = vector.broadcast %cst_52 : f32 to vector<1x256xf32>
    %99 = arith.mulf %98, %93 : vector<1x256xf32>
    %100 = tpu.concatenate %97, %99, %95 in 0 : vector<1x256xf32>, vector<1x256xf32>, vector<1x256xf32> -> vector<3x256xf32>
    %c0_53 = arith.constant 0 : index
    %c0_54 = arith.constant 0 : index
    %101 = vector.load %arg9[%c0_53, %c0_54] : memref<3x256xf32, #tpu.memory_space<vmem>>, vector<3x256xf32>
    tpu.vector_store %arg9[%c0_53, %c0_54], %100 {strides = array<i32>} : memref<3x256xf32, #tpu.memory_space<vmem>>, vector<3x256xf32>,
    return
  }
  func.func @transform_0(%arg0: i32) -> (i32, i32) {
    %c0_i32 = arith.constant 0 : i32
    %c0_i32_0 = arith.constant 0 : i32
    return %c0_i32, %arg0 : i32, i32
  }
  func.func @transform_1(%arg0: i32) -> (i32, i32) {
    %c0_i32 = arith.constant 0 : i32
    %c0_i32_0 = arith.constant 0 : i32
    return %c0_i32, %arg0 : i32, i32
  }
  func.func @transform_2(%arg0: i32) -> (i32, i32) {
    %c0_i32 = arith.constant 0 : i32
    %c0_i32_0 = arith.constant 0 : i32
    %c0_i32_1 = arith.constant 0 : i32
    return %c0_i32, %c0_i32_0 : i32, i32
  }
  func.func @transform_3(%arg0: i32) -> (i32, i32) {
    %c0_i32 = arith.constant 0 : i32
    %c0_i32_0 = arith.constant 0 : i32
    %c0_i32_1 = arith.constant 0 : i32
    return %c0_i32, %c0_i32_0 : i32, i32
  }
  func.func @transform_4(%arg0: i32) -> (i32, i32, i32) {
    %c0_i32 = arith.constant 0 : i32
    %c0_i32_0 = arith.constant 0 : i32
    %c0_i32_1 = arith.constant 0 : i32
    %c0_i32_2 = arith.constant 0 : i32
    return %c0_i32, %c0_i32_0, %c0_i32_1 : i32, i32, i32
  }
  func.func @transform_5(%arg0: i32) -> (i32, i32, i32) {
    %c0_i32 = arith.constant 0 : i32
    %c0_i32_0 = arith.constant 0 : i32
    %c0_i32_1 = arith.constant 0 : i32
    %c0_i32_2 = arith.constant 0 : i32
    return %c0_i32, %c0_i32_0, %c0_i32_1 : i32, i32, i32
  }
  func.func @transform_6(%arg0: i32) -> (i32, i32, i32) {
    %c0_i32 = arith.constant 0 : i32
    %c0_i32_0 = arith.constant 0 : i32
    %c0_i32_1 = arith.constant 0 : i32
    %c0_i32_2 = arith.constant 0 : i32
    return %c0_i32, %c0_i32_0, %c0_i32_1 : i32, i32, i32
  }
  func.func @transform_7(%arg0: i32) -> (i32, i32, i32) {
    %c0_i32 = arith.constant 0 : i32
    %c0_i32_0 = arith.constant 0 : i32
    %c0_i32_1 = arith.constant 0 : i32
    %c0_i32_2 = arith.constant 0 : i32
    return %c0_i32, %c0_i32_0, %c0_i32_1 : i32, i32, i32
  }
  func.func @transform_8(%arg0: i32) -> (i32, i32) {
    %c0_i32 = arith.constant 0 : i32
    %c0_i32_0 = arith.constant 0 : i32
    return %c0_i32, %arg0 : i32, i32
  }
}

module attributes {stable_mosaic.version = 11 : i64} {
  func.func @_fastflow_layer_kernel(%arg0: i32, %arg1: memref<3x128xf32, #tpu.memory_space<vmem>>, %arg2: memref<16x128xf32, #tpu.memory_space<vmem>>, %arg3: memref<32x3xf32, #tpu.memory_space<vmem>>, %arg4: memref<32x1xf32, #tpu.memory_space<vmem>>, %arg5: memref<2x64x32xbf16, #tpu.memory_space<vmem>>, %arg6: memref<2x64x1xf32, #tpu.memory_space<vmem>>, %arg7: memref<2x32x64xbf16, #tpu.memory_space<vmem>>, %arg8: memref<2x32x1xf32, #tpu.memory_space<vmem>>, %arg9: memref<3x128xf32, #tpu.memory_space<vmem>>) attributes {dimension_semantics = [#tpu.dimension_semantics<parallel>], iteration_bounds = array<i64: 1>, scalar_prefetch = 0 : i64, scratch_operands = 0 : i64, tpu.core_type = #tpu.core_type<tc>, window_params = [{transform_indices = @transform_0, window_bounds = array<i64: 3, 128>}, {transform_indices = @transform_1, window_bounds = array<i64: 16, 128>}, {pipeline_mode = #tpu.pipeline_mode<synchronous>, transform_indices = @transform_2, window_bounds = array<i64: 32, 3>}, {pipeline_mode = #tpu.pipeline_mode<synchronous>, transform_indices = @transform_3, window_bounds = array<i64: 32, 1>}, {pipeline_mode = #tpu.pipeline_mode<synchronous>, transform_indices = @transform_4, window_bounds = array<i64: 2, 64, 32>}, {pipeline_mode = #tpu.pipeline_mode<synchronous>, transform_indices = @transform_5, window_bounds = array<i64: 2, 64, 1>}, {pipeline_mode = #tpu.pipeline_mode<synchronous>, transform_indices = @transform_6, window_bounds = array<i64: 2, 32, 64>}, {pipeline_mode = #tpu.pipeline_mode<synchronous>, transform_indices = @transform_7, window_bounds = array<i64: 2, 32, 1>}, {transform_indices = @transform_8, window_bounds = array<i64: 3, 128>}]} {
    %c0 = arith.constant 0 : index
    %c0_0 = arith.constant 0 : index
    %0 = vector.load %arg3[%c0, %c0_0] : memref<32x3xf32, #tpu.memory_space<vmem>>, vector<32x1xf32>
    %c0_1 = arith.constant 0 : index
    %c0_2 = arith.constant 0 : index
    %1 = vector.load %arg1[%c0_1, %c0_2] : memref<3x128xf32, #tpu.memory_space<vmem>>, vector<1x128xf32>
    %2 = vector.broadcast %0 : vector<32x1xf32> to vector<32x128xf32>
    %3 = vector.broadcast %1 : vector<1x128xf32> to vector<32x128xf32>
    %4 = arith.mulf %2, %3 : vector<32x128xf32>
    %c0_3 = arith.constant 0 : index
    %c1 = arith.constant 1 : index
    %5 = vector.load %arg3[%c0_3, %c1] : memref<32x3xf32, #tpu.memory_space<vmem>>, vector<32x1xf32>
    %c1_4 = arith.constant 1 : index
    %c0_5 = arith.constant 0 : index
    %6 = vector.load %arg1[%c1_4, %c0_5] : memref<3x128xf32, #tpu.memory_space<vmem>>, vector<1x128xf32>
    %7 = vector.broadcast %5 : vector<32x1xf32> to vector<32x128xf32>
    %8 = vector.broadcast %6 : vector<1x128xf32> to vector<32x128xf32>
    %9 = arith.mulf %7, %8 : vector<32x128xf32>
    %10 = arith.addf %4, %9 : vector<32x128xf32>
    %c0_6 = arith.constant 0 : index
    %c2 = arith.constant 2 : index
    %11 = vector.load %arg3[%c0_6, %c2] : memref<32x3xf32, #tpu.memory_space<vmem>>, vector<32x1xf32>
    %c2_7 = arith.constant 2 : index
    %c0_8 = arith.constant 0 : index
    %12 = vector.load %arg1[%c2_7, %c0_8] : memref<3x128xf32, #tpu.memory_space<vmem>>, vector<1x128xf32>
    %13 = vector.broadcast %11 : vector<32x1xf32> to vector<32x128xf32>
    %14 = vector.broadcast %12 : vector<1x128xf32> to vector<32x128xf32>
    %15 = arith.mulf %13, %14 : vector<32x128xf32>
    %16 = arith.addf %10, %15 : vector<32x128xf32>
    %c0_9 = arith.constant 0 : index
    %c0_10 = arith.constant 0 : index
    %17 = vector.load %arg4[%c0_9, %c0_10] : memref<32x1xf32, #tpu.memory_space<vmem>>, vector<32x1xf32>
    %18 = vector.broadcast %17 : vector<32x1xf32> to vector<32x128xf32>
    %19 = arith.addf %16, %18 : vector<32x128xf32>
    %cst = arith.constant 0.000000e+00 : f32
    %20 = vector.broadcast %cst : f32 to vector<32x128xf32>
    %21 = arith.maximumf %19, %20 : vector<32x128xf32>
    %c0_11 = arith.constant 0 : index
    %c0_12 = arith.constant 0 : index
    %22 = vector.load %arg2[%c0_11, %c0_12] : memref<16x128xf32, #tpu.memory_space<vmem>>, vector<16x128xf32>
    %23 = vector.extract_strided_slice %21 {offsets = [0, 0], sizes = [16, 128], strides = [1, 1]} : vector<32x128xf32> to vector<16x128xf32>
    %24 = vector.extract_strided_slice %21 {offsets = [16, 0], sizes = [16, 128], strides = [1, 1]} : vector<32x128xf32> to vector<16x128xf32>
    %cst_13 = arith.constant 0.000000e+00 : f32
    %25 = vector.broadcast %cst_13 : f32 to vector<16x128xf32>
    %26 = tpu.concatenate %23, %22 in 0 : vector<16x128xf32>, vector<16x128xf32> -> vector<32x128xf32>
    %27 = arith.truncf %26 : vector<32x128xf32> to vector<32x128xbf16>
    %c0_14 = arith.constant 0 : index
    %c0_15 = arith.constant 0 : index
    %c0_16 = arith.constant 0 : index
    %28 = vector.load %arg5[%c0_14, %c0_15, %c0_16] : memref<2x64x32xbf16, #tpu.memory_space<vmem>>, vector<1x64x32xbf16>
    %29 = vector.shape_cast %28 : vector<1x64x32xbf16> to vector<64x32xbf16>
    %cst_17 = arith.constant dense<0.000000e+00> : vector<64x128xf32>
    %30 = tpu.matmul %29, %27, %cst_17 {dimension_numbers = #tpu.dot_dimension_numbers<[1], [0], [0], [1], [0, 0, 1, 1], [], []>} : vector<64x32xbf16>, vector<32x128xbf16>, vector<64x128xf32> -> vector<64x128xf32>
    %c0_18 = arith.constant 0 : index
    %c0_19 = arith.constant 0 : index
    %c0_20 = arith.constant 0 : index
    %31 = vector.load %arg6[%c0_18, %c0_19, %c0_20] : memref<2x64x1xf32, #tpu.memory_space<vmem>>, vector<1x64x1xf32>
    %32 = vector.shape_cast %31 : vector<1x64x1xf32> to vector<64x1xf32>
    %33 = vector.broadcast %32 : vector<64x1xf32> to vector<64x128xf32>
    %34 = arith.addf %30, %33 : vector<64x128xf32>
    %cst_21 = arith.constant 0.000000e+00 : f32
    %35 = vector.broadcast %cst_21 : f32 to vector<64x128xf32>
    %36 = arith.maximumf %34, %35 : vector<64x128xf32>
    %37 = arith.truncf %36 : vector<64x128xf32> to vector<64x128xbf16>
    %c0_22 = arith.constant 0 : index
    %c0_23 = arith.constant 0 : index
    %c0_24 = arith.constant 0 : index
    %38 = vector.load %arg7[%c0_22, %c0_23, %c0_24] : memref<2x32x64xbf16, #tpu.memory_space<vmem>>, vector<1x32x64xbf16>
    %39 = vector.shape_cast %38 : vector<1x32x64xbf16> to vector<32x64xbf16>
    %cst_25 = arith.constant dense<0.000000e+00> : vector<32x128xf32>
    %40 = tpu.matmul %39, %37, %cst_25 {dimension_numbers = #tpu.dot_dimension_numbers<[1], [0], [0], [1], [0, 0, 1, 1], [], []>} : vector<32x64xbf16>, vector<64x128xbf16>, vector<32x128xf32> -> vector<32x128xf32>
    %c0_26 = arith.constant 0 : index
    %c0_27 = arith.constant 0 : index
    %c0_28 = arith.constant 0 : index
    %41 = vector.load %arg8[%c0_26, %c0_27, %c0_28] : memref<2x32x1xf32, #tpu.memory_space<vmem>>, vector<1x32x1xf32>
    %42 = vector.shape_cast %41 : vector<1x32x1xf32> to vector<32x1xf32>
    %43 = vector.broadcast %42 : vector<32x1xf32> to vector<32x128xf32>
    %44 = arith.addf %40, %43 : vector<32x128xf32>
    %45 = vector.extract_strided_slice %44 {offsets = [0, 0], sizes = [16, 128], strides = [1, 1]} : vector<32x128xf32> to vector<16x128xf32>
    %46 = math.tanh %45 : vector<16x128xf32>
    %cst_29 = arith.constant 1.900000e+00 : f32
    %47 = vector.broadcast %cst_29 : f32 to vector<16x128xf32>
    %48 = arith.mulf %47, %46 : vector<16x128xf32>
    %49 = vector.extract_strided_slice %44 {offsets = [16, 0], sizes = [16, 128], strides = [1, 1]} : vector<32x128xf32> to vector<16x128xf32>
    %50 = math.exp %48 : vector<16x128xf32>
    %51 = arith.mulf %24, %50 : vector<16x128xf32>
    %52 = arith.addf %51, %49 : vector<16x128xf32>
    %53 = arith.addf %25, %48 : vector<16x128xf32>
    %54 = tpu.concatenate %52, %22 in 0 : vector<16x128xf32>, vector<16x128xf32> -> vector<32x128xf32>
    %55 = arith.truncf %54 : vector<32x128xf32> to vector<32x128xbf16>
    %c1_30 = arith.constant 1 : index
    %c0_31 = arith.constant 0 : index
    %c0_32 = arith.constant 0 : index
    %56 = vector.load %arg5[%c1_30, %c0_31, %c0_32] : memref<2x64x32xbf16, #tpu.memory_space<vmem>>, vector<1x64x32xbf16>
    %57 = vector.shape_cast %56 : vector<1x64x32xbf16> to vector<64x32xbf16>
    %cst_33 = arith.constant dense<0.000000e+00> : vector<64x128xf32>
    %58 = tpu.matmul %57, %55, %cst_33 {dimension_numbers = #tpu.dot_dimension_numbers<[1], [0], [0], [1], [0, 0, 1, 1], [], []>} : vector<64x32xbf16>, vector<32x128xbf16>, vector<64x128xf32> -> vector<64x128xf32>
    %c1_34 = arith.constant 1 : index
    %c0_35 = arith.constant 0 : index
    %c0_36 = arith.constant 0 : index
    %59 = vector.load %arg6[%c1_34, %c0_35, %c0_36] : memref<2x64x1xf32, #tpu.memory_space<vmem>>, vector<1x64x1xf32>
    %60 = vector.shape_cast %59 : vector<1x64x1xf32> to vector<64x1xf32>
    %61 = vector.broadcast %60 : vector<64x1xf32> to vector<64x128xf32>
    %62 = arith.addf %58, %61 : vector<64x128xf32>
    %cst_37 = arith.constant 0.000000e+00 : f32
    %63 = vector.broadcast %cst_37 : f32 to vector<64x128xf32>
    %64 = arith.maximumf %62, %63 : vector<64x128xf32>
    %65 = arith.truncf %64 : vector<64x128xf32> to vector<64x128xbf16>
    %c1_38 = arith.constant 1 : index
    %c0_39 = arith.constant 0 : index
    %c0_40 = arith.constant 0 : index
    %66 = vector.load %arg7[%c1_38, %c0_39, %c0_40] : memref<2x32x64xbf16, #tpu.memory_space<vmem>>, vector<1x32x64xbf16>
    %67 = vector.shape_cast %66 : vector<1x32x64xbf16> to vector<32x64xbf16>
    %cst_41 = arith.constant dense<0.000000e+00> : vector<32x128xf32>
    %68 = tpu.matmul %67, %65, %cst_41 {dimension_numbers = #tpu.dot_dimension_numbers<[1], [0], [0], [1], [0, 0, 1, 1], [], []>} : vector<32x64xbf16>, vector<64x128xbf16>, vector<32x128xf32> -> vector<32x128xf32>
    %c1_42 = arith.constant 1 : index
    %c0_43 = arith.constant 0 : index
    %c0_44 = arith.constant 0 : index
    %69 = vector.load %arg8[%c1_42, %c0_43, %c0_44] : memref<2x32x1xf32, #tpu.memory_space<vmem>>, vector<1x32x1xf32>
    %70 = vector.shape_cast %69 : vector<1x32x1xf32> to vector<32x1xf32>
    %71 = vector.broadcast %70 : vector<32x1xf32> to vector<32x128xf32>
    %72 = arith.addf %68, %71 : vector<32x128xf32>
    %73 = vector.extract_strided_slice %72 {offsets = [0, 0], sizes = [16, 128], strides = [1, 1]} : vector<32x128xf32> to vector<16x128xf32>
    %74 = math.tanh %73 : vector<16x128xf32>
    %cst_45 = arith.constant 1.900000e+00 : f32
    %75 = vector.broadcast %cst_45 : f32 to vector<16x128xf32>
    %76 = arith.mulf %75, %74 : vector<16x128xf32>
    %77 = vector.extract_strided_slice %72 {offsets = [16, 0], sizes = [16, 128], strides = [1, 1]} : vector<32x128xf32> to vector<16x128xf32>
    %78 = math.exp %76 : vector<16x128xf32>
    %79 = arith.mulf %23, %78 : vector<16x128xf32>
    %80 = arith.addf %79, %77 : vector<16x128xf32>
    %81 = arith.addf %53, %76 : vector<16x128xf32>
    %cst_46 = arith.constant dense<0.000000e+00> : vector<128xf32>
    %82 = vector.multi_reduction <add>, %80, %cst_46 [0] : vector<16x128xf32> to vector<128xf32>
    %83 = vector.shape_cast %82 : vector<128xf32> to vector<1x128xf32>
    %cst_47 = arith.constant dense<0.000000e+00> : vector<128xf32>
    %84 = vector.multi_reduction <add>, %52, %cst_47 [0] : vector<16x128xf32> to vector<128xf32>
    %85 = vector.shape_cast %84 : vector<128xf32> to vector<1x128xf32>
    %86 = arith.addf %83, %85 : vector<1x128xf32>
    %87 = arith.mulf %80, %80 : vector<16x128xf32>
    %cst_48 = arith.constant dense<0.000000e+00> : vector<128xf32>
    %88 = vector.multi_reduction <add>, %87, %cst_48 [0] : vector<16x128xf32> to vector<128xf32>
    %89 = vector.shape_cast %88 : vector<128xf32> to vector<1x128xf32>
    %90 = arith.mulf %52, %52 : vector<16x128xf32>
    %cst_49 = arith.constant dense<0.000000e+00> : vector<128xf32>
    %91 = vector.multi_reduction <add>, %90, %cst_49 [0] : vector<16x128xf32> to vector<128xf32>
    %92 = vector.shape_cast %91 : vector<128xf32> to vector<1x128xf32>
    %93 = arith.addf %89, %92 : vector<1x128xf32>
    %cst_50 = arith.constant dense<0.000000e+00> : vector<128xf32>
    %94 = vector.multi_reduction <add>, %81, %cst_50 [0] : vector<16x128xf32> to vector<128xf32>
    %95 = vector.shape_cast %94 : vector<128xf32> to vector<1x128xf32>
    %cst_51 = arith.constant 3.125000e-02 : f32
    %96 = vector.broadcast %cst_51 : f32 to vector<1x128xf32>
    %97 = arith.mulf %86, %96 : vector<1x128xf32>
    %cst_52 = arith.constant 5.000000e-01 : f32
    %98 = vector.broadcast %cst_52 : f32 to vector<1x128xf32>
    %99 = arith.mulf %98, %93 : vector<1x128xf32>
    %100 = tpu.concatenate %97, %99, %95 in 0 : vector<1x128xf32>, vector<1x128xf32>, vector<1x128xf32> -> vector<3x128xf32>
    %c0_53 = arith.constant 0 : index
    %c0_54 = arith.constant 0 : index
    %101 = vector.load %arg9[%c0_53, %c0_54] : memref<3x128xf32, #tpu.memory_space<vmem>>, vector<3x128xf32>
    tpu.vector_store %arg9[%c0_53, %c0_54], %100 {strides = array<i32>} : memref<3x128xf32, #tpu.memory_space<vmem>>, vector<3x128xf32>,
    return
  }
  func.func @transform_0(%arg0: i32) -> (i32, i32) {
    %c0_i32 = arith.constant 0 : i32
    %c0_i32_0 = arith.constant 0 : i32
    return %c0_i32, %arg0 : i32, i32
  }
  func.func @transform_1(%arg0: i32) -> (i32, i32) {
    %c0_i32 = arith.constant 0 : i32
    %c0_i32_0 = arith.constant 0 : i32
    return %c0_i32, %arg0 : i32, i32
  }
  func.func @transform_2(%arg0: i32) -> (i32, i32) {
    %c0_i32 = arith.constant 0 : i32
    %c0_i32_0 = arith.constant 0 : i32
    %c0_i32_1 = arith.constant 0 : i32
    return %c0_i32, %c0_i32_0 : i32, i32
  }
  func.func @transform_3(%arg0: i32) -> (i32, i32) {
    %c0_i32 = arith.constant 0 : i32
    %c0_i32_0 = arith.constant 0 : i32
    %c0_i32_1 = arith.constant 0 : i32
    return %c0_i32, %c0_i32_0 : i32, i32
  }
  func.func @transform_4(%arg0: i32) -> (i32, i32, i32) {
    %c0_i32 = arith.constant 0 : i32
    %c0_i32_0 = arith.constant 0 : i32
    %c0_i32_1 = arith.constant 0 : i32
    %c0_i32_2 = arith.constant 0 : i32
    return %c0_i32, %c0_i32_0, %c0_i32_1 : i32, i32, i32
  }
  func.func @transform_5(%arg0: i32) -> (i32, i32, i32) {
    %c0_i32 = arith.constant 0 : i32
    %c0_i32_0 = arith.constant 0 : i32
    %c0_i32_1 = arith.constant 0 : i32
    %c0_i32_2 = arith.constant 0 : i32
    return %c0_i32, %c0_i32_0, %c0_i32_1 : i32, i32, i32
  }
  func.func @transform_6(%arg0: i32) -> (i32, i32, i32) {
    %c0_i32 = arith.constant 0 : i32
    %c0_i32_0 = arith.constant 0 : i32
    %c0_i32_1 = arith.constant 0 : i32
    %c0_i32_2 = arith.constant 0 : i32
    return %c0_i32, %c0_i32_0, %c0_i32_1 : i32, i32, i32
  }
  func.func @transform_7(%arg0: i32) -> (i32, i32, i32) {
    %c0_i32 = arith.constant 0 : i32
    %c0_i32_0 = arith.constant 0 : i32
    %c0_i32_1 = arith.constant 0 : i32
    %c0_i32_2 = arith.constant 0 : i32
    return %c0_i32, %c0_i32_0, %c0_i32_1 : i32, i32, i32
  }
  func.func @transform_8(%arg0: i32) -> (i32, i32) {
    %c0_i32 = arith.constant 0 : i32
    %c0_i32_0 = arith.constant 0 : i32
    return %c0_i32, %arg0 : i32, i32
  }
}

module attributes {stable_mosaic.version = 11 : i64} {
  func.func @_fastflow_layer_kernel(%arg0: i32, %arg1: memref<3x32xf32, #tpu.memory_space<vmem>>, %arg2: memref<16x32xf32, #tpu.memory_space<vmem>>, %arg3: memref<64x3xf32, #tpu.memory_space<vmem>>, %arg4: memref<64x1xf32, #tpu.memory_space<vmem>>, %arg5: memref<2x128x48xbf16, #tpu.memory_space<vmem>>, %arg6: memref<2x128x1xf32, #tpu.memory_space<vmem>>, %arg7: memref<2x64x128xbf16, #tpu.memory_space<vmem>>, %arg8: memref<2x64x1xf32, #tpu.memory_space<vmem>>, %arg9: memref<3x32xf32, #tpu.memory_space<vmem>>) attributes {dimension_semantics = [#tpu.dimension_semantics<parallel>], iteration_bounds = array<i64: 1>, scalar_prefetch = 0 : i64, scratch_operands = 0 : i64, tpu.core_type = #tpu.core_type<tc>, window_params = [{transform_indices = @transform_0, window_bounds = array<i64: 3, 32>}, {transform_indices = @transform_1, window_bounds = array<i64: 16, 32>}, {pipeline_mode = #tpu.pipeline_mode<synchronous>, transform_indices = @transform_2, window_bounds = array<i64: 64, 3>}, {pipeline_mode = #tpu.pipeline_mode<synchronous>, transform_indices = @transform_3, window_bounds = array<i64: 64, 1>}, {pipeline_mode = #tpu.pipeline_mode<synchronous>, transform_indices = @transform_4, window_bounds = array<i64: 2, 128, 48>}, {pipeline_mode = #tpu.pipeline_mode<synchronous>, transform_indices = @transform_5, window_bounds = array<i64: 2, 128, 1>}, {pipeline_mode = #tpu.pipeline_mode<synchronous>, transform_indices = @transform_6, window_bounds = array<i64: 2, 64, 128>}, {pipeline_mode = #tpu.pipeline_mode<synchronous>, transform_indices = @transform_7, window_bounds = array<i64: 2, 64, 1>}, {transform_indices = @transform_8, window_bounds = array<i64: 3, 32>}]} {
    %c0 = arith.constant 0 : index
    %c0_0 = arith.constant 0 : index
    %0 = vector.load %arg3[%c0, %c0_0] : memref<64x3xf32, #tpu.memory_space<vmem>>, vector<64x1xf32>
    %c0_1 = arith.constant 0 : index
    %c0_2 = arith.constant 0 : index
    %1 = vector.load %arg1[%c0_1, %c0_2] : memref<3x32xf32, #tpu.memory_space<vmem>>, vector<1x32xf32>
    %2 = vector.broadcast %0 : vector<64x1xf32> to vector<64x32xf32>
    %3 = vector.broadcast %1 : vector<1x32xf32> to vector<64x32xf32>
    %4 = arith.mulf %2, %3 : vector<64x32xf32>
    %c0_3 = arith.constant 0 : index
    %c1 = arith.constant 1 : index
    %5 = vector.load %arg3[%c0_3, %c1] : memref<64x3xf32, #tpu.memory_space<vmem>>, vector<64x1xf32>
    %c1_4 = arith.constant 1 : index
    %c0_5 = arith.constant 0 : index
    %6 = vector.load %arg1[%c1_4, %c0_5] : memref<3x32xf32, #tpu.memory_space<vmem>>, vector<1x32xf32>
    %7 = vector.broadcast %5 : vector<64x1xf32> to vector<64x32xf32>
    %8 = vector.broadcast %6 : vector<1x32xf32> to vector<64x32xf32>
    %9 = arith.mulf %7, %8 : vector<64x32xf32>
    %10 = arith.addf %4, %9 : vector<64x32xf32>
    %c0_6 = arith.constant 0 : index
    %c2 = arith.constant 2 : index
    %11 = vector.load %arg3[%c0_6, %c2] : memref<64x3xf32, #tpu.memory_space<vmem>>, vector<64x1xf32>
    %c2_7 = arith.constant 2 : index
    %c0_8 = arith.constant 0 : index
    %12 = vector.load %arg1[%c2_7, %c0_8] : memref<3x32xf32, #tpu.memory_space<vmem>>, vector<1x32xf32>
    %13 = vector.broadcast %11 : vector<64x1xf32> to vector<64x32xf32>
    %14 = vector.broadcast %12 : vector<1x32xf32> to vector<64x32xf32>
    %15 = arith.mulf %13, %14 : vector<64x32xf32>
    %16 = arith.addf %10, %15 : vector<64x32xf32>
    %c0_9 = arith.constant 0 : index
    %c0_10 = arith.constant 0 : index
    %17 = vector.load %arg4[%c0_9, %c0_10] : memref<64x1xf32, #tpu.memory_space<vmem>>, vector<64x1xf32>
    %18 = vector.broadcast %17 : vector<64x1xf32> to vector<64x32xf32>
    %19 = arith.addf %16, %18 : vector<64x32xf32>
    %cst = arith.constant 0.000000e+00 : f32
    %20 = vector.broadcast %cst : f32 to vector<64x32xf32>
    %21 = arith.maximumf %19, %20 : vector<64x32xf32>
    %c0_11 = arith.constant 0 : index
    %c0_12 = arith.constant 0 : index
    %22 = vector.load %arg2[%c0_11, %c0_12] : memref<16x32xf32, #tpu.memory_space<vmem>>, vector<16x32xf32>
    %23 = vector.extract_strided_slice %21 {offsets = [0, 0], sizes = [32, 32], strides = [1, 1]} : vector<64x32xf32> to vector<32x32xf32>
    %24 = vector.extract_strided_slice %21 {offsets = [32, 0], sizes = [32, 32], strides = [1, 1]} : vector<64x32xf32> to vector<32x32xf32>
    %cst_13 = arith.constant 0.000000e+00 : f32
    %25 = vector.broadcast %cst_13 : f32 to vector<32x32xf32>
    %26 = tpu.concatenate %23, %22 in 0 : vector<32x32xf32>, vector<16x32xf32> -> vector<48x32xf32>
    %27 = arith.truncf %26 : vector<48x32xf32> to vector<48x32xbf16>
    %c0_14 = arith.constant 0 : index
    %c0_15 = arith.constant 0 : index
    %c0_16 = arith.constant 0 : index
    %28 = vector.load %arg5[%c0_14, %c0_15, %c0_16] : memref<2x128x48xbf16, #tpu.memory_space<vmem>>, vector<1x128x48xbf16>
    %29 = vector.shape_cast %28 : vector<1x128x48xbf16> to vector<128x48xbf16>
    %cst_17 = arith.constant dense<0.000000e+00> : vector<128x32xf32>
    %30 = tpu.matmul %29, %27, %cst_17 {dimension_numbers = #tpu.dot_dimension_numbers<[1], [0], [0], [1], [0, 0, 1, 1], [], []>} : vector<128x48xbf16>, vector<48x32xbf16>, vector<128x32xf32> -> vector<128x32xf32>
    %c0_18 = arith.constant 0 : index
    %c0_19 = arith.constant 0 : index
    %c0_20 = arith.constant 0 : index
    %31 = vector.load %arg6[%c0_18, %c0_19, %c0_20] : memref<2x128x1xf32, #tpu.memory_space<vmem>>, vector<1x128x1xf32>
    %32 = vector.shape_cast %31 : vector<1x128x1xf32> to vector<128x1xf32>
    %33 = vector.broadcast %32 : vector<128x1xf32> to vector<128x32xf32>
    %34 = arith.addf %30, %33 : vector<128x32xf32>
    %cst_21 = arith.constant 0.000000e+00 : f32
    %35 = vector.broadcast %cst_21 : f32 to vector<128x32xf32>
    %36 = arith.maximumf %34, %35 : vector<128x32xf32>
    %37 = arith.truncf %36 : vector<128x32xf32> to vector<128x32xbf16>
    %c0_22 = arith.constant 0 : index
    %c0_23 = arith.constant 0 : index
    %c0_24 = arith.constant 0 : index
    %38 = vector.load %arg7[%c0_22, %c0_23, %c0_24] : memref<2x64x128xbf16, #tpu.memory_space<vmem>>, vector<1x64x128xbf16>
    %39 = vector.shape_cast %38 : vector<1x64x128xbf16> to vector<64x128xbf16>
    %cst_25 = arith.constant dense<0.000000e+00> : vector<64x32xf32>
    %40 = tpu.matmul %39, %37, %cst_25 {dimension_numbers = #tpu.dot_dimension_numbers<[1], [0], [0], [1], [0, 0, 1, 1], [], []>} : vector<64x128xbf16>, vector<128x32xbf16>, vector<64x32xf32> -> vector<64x32xf32>
    %c0_26 = arith.constant 0 : index
    %c0_27 = arith.constant 0 : index
    %c0_28 = arith.constant 0 : index
    %41 = vector.load %arg8[%c0_26, %c0_27, %c0_28] : memref<2x64x1xf32, #tpu.memory_space<vmem>>, vector<1x64x1xf32>
    %42 = vector.shape_cast %41 : vector<1x64x1xf32> to vector<64x1xf32>
    %43 = vector.broadcast %42 : vector<64x1xf32> to vector<64x32xf32>
    %44 = arith.addf %40, %43 : vector<64x32xf32>
    %45 = vector.extract_strided_slice %44 {offsets = [0, 0], sizes = [32, 32], strides = [1, 1]} : vector<64x32xf32> to vector<32x32xf32>
    %46 = math.tanh %45 : vector<32x32xf32>
    %cst_29 = arith.constant 1.900000e+00 : f32
    %47 = vector.broadcast %cst_29 : f32 to vector<32x32xf32>
    %48 = arith.mulf %47, %46 : vector<32x32xf32>
    %49 = vector.extract_strided_slice %44 {offsets = [32, 0], sizes = [32, 32], strides = [1, 1]} : vector<64x32xf32> to vector<32x32xf32>
    %50 = math.exp %48 : vector<32x32xf32>
    %51 = arith.mulf %24, %50 : vector<32x32xf32>
    %52 = arith.addf %51, %49 : vector<32x32xf32>
    %53 = arith.addf %25, %48 : vector<32x32xf32>
    %54 = tpu.concatenate %52, %22 in 0 : vector<32x32xf32>, vector<16x32xf32> -> vector<48x32xf32>
    %55 = arith.truncf %54 : vector<48x32xf32> to vector<48x32xbf16>
    %c1_30 = arith.constant 1 : index
    %c0_31 = arith.constant 0 : index
    %c0_32 = arith.constant 0 : index
    %56 = vector.load %arg5[%c1_30, %c0_31, %c0_32] : memref<2x128x48xbf16, #tpu.memory_space<vmem>>, vector<1x128x48xbf16>
    %57 = vector.shape_cast %56 : vector<1x128x48xbf16> to vector<128x48xbf16>
    %cst_33 = arith.constant dense<0.000000e+00> : vector<128x32xf32>
    %58 = tpu.matmul %57, %55, %cst_33 {dimension_numbers = #tpu.dot_dimension_numbers<[1], [0], [0], [1], [0, 0, 1, 1], [], []>} : vector<128x48xbf16>, vector<48x32xbf16>, vector<128x32xf32> -> vector<128x32xf32>
    %c1_34 = arith.constant 1 : index
    %c0_35 = arith.constant 0 : index
    %c0_36 = arith.constant 0 : index
    %59 = vector.load %arg6[%c1_34, %c0_35, %c0_36] : memref<2x128x1xf32, #tpu.memory_space<vmem>>, vector<1x128x1xf32>
    %60 = vector.shape_cast %59 : vector<1x128x1xf32> to vector<128x1xf32>
    %61 = vector.broadcast %60 : vector<128x1xf32> to vector<128x32xf32>
    %62 = arith.addf %58, %61 : vector<128x32xf32>
    %cst_37 = arith.constant 0.000000e+00 : f32
    %63 = vector.broadcast %cst_37 : f32 to vector<128x32xf32>
    %64 = arith.maximumf %62, %63 : vector<128x32xf32>
    %65 = arith.truncf %64 : vector<128x32xf32> to vector<128x32xbf16>
    %c1_38 = arith.constant 1 : index
    %c0_39 = arith.constant 0 : index
    %c0_40 = arith.constant 0 : index
    %66 = vector.load %arg7[%c1_38, %c0_39, %c0_40] : memref<2x64x128xbf16, #tpu.memory_space<vmem>>, vector<1x64x128xbf16>
    %67 = vector.shape_cast %66 : vector<1x64x128xbf16> to vector<64x128xbf16>
    %cst_41 = arith.constant dense<0.000000e+00> : vector<64x32xf32>
    %68 = tpu.matmul %67, %65, %cst_41 {dimension_numbers = #tpu.dot_dimension_numbers<[1], [0], [0], [1], [0, 0, 1, 1], [], []>} : vector<64x128xbf16>, vector<128x32xbf16>, vector<64x32xf32> -> vector<64x32xf32>
    %c1_42 = arith.constant 1 : index
    %c0_43 = arith.constant 0 : index
    %c0_44 = arith.constant 0 : index
    %69 = vector.load %arg8[%c1_42, %c0_43, %c0_44] : memref<2x64x1xf32, #tpu.memory_space<vmem>>, vector<1x64x1xf32>
    %70 = vector.shape_cast %69 : vector<1x64x1xf32> to vector<64x1xf32>
    %71 = vector.broadcast %70 : vector<64x1xf32> to vector<64x32xf32>
    %72 = arith.addf %68, %71 : vector<64x32xf32>
    %73 = vector.extract_strided_slice %72 {offsets = [0, 0], sizes = [32, 32], strides = [1, 1]} : vector<64x32xf32> to vector<32x32xf32>
    %74 = math.tanh %73 : vector<32x32xf32>
    %cst_45 = arith.constant 1.900000e+00 : f32
    %75 = vector.broadcast %cst_45 : f32 to vector<32x32xf32>
    %76 = arith.mulf %75, %74 : vector<32x32xf32>
    %77 = vector.extract_strided_slice %72 {offsets = [32, 0], sizes = [32, 32], strides = [1, 1]} : vector<64x32xf32> to vector<32x32xf32>
    %78 = math.exp %76 : vector<32x32xf32>
    %79 = arith.mulf %23, %78 : vector<32x32xf32>
    %80 = arith.addf %79, %77 : vector<32x32xf32>
    %81 = arith.addf %53, %76 : vector<32x32xf32>
    %cst_46 = arith.constant dense<0.000000e+00> : vector<32xf32>
    %82 = vector.multi_reduction <add>, %80, %cst_46 [0] : vector<32x32xf32> to vector<32xf32>
    %83 = vector.shape_cast %82 : vector<32xf32> to vector<1x32xf32>
    %cst_47 = arith.constant dense<0.000000e+00> : vector<32xf32>
    %84 = vector.multi_reduction <add>, %52, %cst_47 [0] : vector<32x32xf32> to vector<32xf32>
    %85 = vector.shape_cast %84 : vector<32xf32> to vector<1x32xf32>
    %86 = arith.addf %83, %85 : vector<1x32xf32>
    %87 = arith.mulf %80, %80 : vector<32x32xf32>
    %cst_48 = arith.constant dense<0.000000e+00> : vector<32xf32>
    %88 = vector.multi_reduction <add>, %87, %cst_48 [0] : vector<32x32xf32> to vector<32xf32>
    %89 = vector.shape_cast %88 : vector<32xf32> to vector<1x32xf32>
    %90 = arith.mulf %52, %52 : vector<32x32xf32>
    %cst_49 = arith.constant dense<0.000000e+00> : vector<32xf32>
    %91 = vector.multi_reduction <add>, %90, %cst_49 [0] : vector<32x32xf32> to vector<32xf32>
    %92 = vector.shape_cast %91 : vector<32xf32> to vector<1x32xf32>
    %93 = arith.addf %89, %92 : vector<1x32xf32>
    %cst_50 = arith.constant dense<0.000000e+00> : vector<32xf32>
    %94 = vector.multi_reduction <add>, %81, %cst_50 [0] : vector<32x32xf32> to vector<32xf32>
    %95 = vector.shape_cast %94 : vector<32xf32> to vector<1x32xf32>
    %cst_51 = arith.constant 1.562500e-02 : f32
    %96 = vector.broadcast %cst_51 : f32 to vector<1x32xf32>
    %97 = arith.mulf %86, %96 : vector<1x32xf32>
    %cst_52 = arith.constant 5.000000e-01 : f32
    %98 = vector.broadcast %cst_52 : f32 to vector<1x32xf32>
    %99 = arith.mulf %98, %93 : vector<1x32xf32>
    %100 = tpu.concatenate %97, %99, %95 in 0 : vector<1x32xf32>, vector<1x32xf32>, vector<1x32xf32> -> vector<3x32xf32>
    %c0_53 = arith.constant 0 : index
    %c0_54 = arith.constant 0 : index
    %101 = vector.load %arg9[%c0_53, %c0_54] : memref<3x32xf32, #tpu.memory_space<vmem>>, vector<3x32xf32>
    tpu.vector_store %arg9[%c0_53, %c0_54], %100 {strides = array<i32>} : memref<3x32xf32, #tpu.memory_space<vmem>>, vector<3x32xf32>,
    return
  }
  func.func @transform_0(%arg0: i32) -> (i32, i32) {
    %c0_i32 = arith.constant 0 : i32
    %c0_i32_0 = arith.constant 0 : i32
    return %c0_i32, %arg0 : i32, i32
  }
  func.func @transform_1(%arg0: i32) -> (i32, i32) {
    %c0_i32 = arith.constant 0 : i32
    %c0_i32_0 = arith.constant 0 : i32
    return %c0_i32, %arg0 : i32, i32
  }
  func.func @transform_2(%arg0: i32) -> (i32, i32) {
    %c0_i32 = arith.constant 0 : i32
    %c0_i32_0 = arith.constant 0 : i32
    %c0_i32_1 = arith.constant 0 : i32
    return %c0_i32, %c0_i32_0 : i32, i32
  }
  func.func @transform_3(%arg0: i32) -> (i32, i32) {
    %c0_i32 = arith.constant 0 : i32
    %c0_i32_0 = arith.constant 0 : i32
    %c0_i32_1 = arith.constant 0 : i32
    return %c0_i32, %c0_i32_0 : i32, i32
  }
  func.func @transform_4(%arg0: i32) -> (i32, i32, i32) {
    %c0_i32 = arith.constant 0 : i32
    %c0_i32_0 = arith.constant 0 : i32
    %c0_i32_1 = arith.constant 0 : i32
    %c0_i32_2 = arith.constant 0 : i32
    return %c0_i32, %c0_i32_0, %c0_i32_1 : i32, i32, i32
  }
  func.func @transform_5(%arg0: i32) -> (i32, i32, i32) {
    %c0_i32 = arith.constant 0 : i32
    %c0_i32_0 = arith.constant 0 : i32
    %c0_i32_1 = arith.constant 0 : i32
    %c0_i32_2 = arith.constant 0 : i32
    return %c0_i32, %c0_i32_0, %c0_i32_1 : i32, i32, i32
  }
  func.func @transform_6(%arg0: i32) -> (i32, i32, i32) {
    %c0_i32 = arith.constant 0 : i32
    %c0_i32_0 = arith.constant 0 : i32
    %c0_i32_1 = arith.constant 0 : i32
    %c0_i32_2 = arith.constant 0 : i32
    return %c0_i32, %c0_i32_0, %c0_i32_1 : i32, i32, i32
  }
  func.func @transform_7(%arg0: i32) -> (i32, i32, i32) {
    %c0_i32 = arith.constant 0 : i32
    %c0_i32_0 = arith.constant 0 : i32
    %c0_i32_1 = arith.constant 0 : i32
    %c0_i32_2 = arith.constant 0 : i32
    return %c0_i32, %c0_i32_0, %c0_i32_1 : i32, i32, i32
  }
  func.func @transform_8(%arg0: i32) -> (i32, i32) {
    %c0_i32 = arith.constant 0 : i32
    %c0_i32_0 = arith.constant 0 : i32
    return %c0_i32, %arg0 : i32, i32
  }
}

module attributes {stable_mosaic.version = 11 : i64} {
  func.func @_anomaly_map_kernel(%arg0: i32, %arg1: memref<8x64xf32, #tpu.memory_space<vmem>>, %arg2: memref<64x1024xf32, #tpu.memory_space<vmem>>, %arg3: memref<8x16xf32, #tpu.memory_space<vmem>>, %arg4: memref<16x1024xf32, #tpu.memory_space<vmem>>, %arg5: memref<8x4xf32, #tpu.memory_space<vmem>>, %arg6: memref<4x1024xf32, #tpu.memory_space<vmem>>, %arg7: memref<8x1024xf32, #tpu.memory_space<vmem>>) attributes {dimension_semantics = [#tpu.dimension_semantics<arbitrary>], iteration_bounds = array<i64: 1>, scalar_prefetch = 0 : i64, scratch_operands = 0 : i64, tpu.core_type = #tpu.core_type<tc>, window_params = [{pipeline_mode = #tpu.pipeline_mode<synchronous>, transform_indices = @transform_0, window_bounds = array<i64: 8, 64>}, {pipeline_mode = #tpu.pipeline_mode<synchronous>, transform_indices = @transform_1, window_bounds = array<i64: 64, 1024>}, {pipeline_mode = #tpu.pipeline_mode<synchronous>, transform_indices = @transform_2, window_bounds = array<i64: 8, 16>}, {pipeline_mode = #tpu.pipeline_mode<synchronous>, transform_indices = @transform_3, window_bounds = array<i64: 16, 1024>}, {pipeline_mode = #tpu.pipeline_mode<synchronous>, transform_indices = @transform_4, window_bounds = array<i64: 8, 4>}, {pipeline_mode = #tpu.pipeline_mode<synchronous>, transform_indices = @transform_5, window_bounds = array<i64: 4, 1024>}, {pipeline_mode = #tpu.pipeline_mode<synchronous>, transform_indices = @transform_6, window_bounds = array<i64: 8, 1024>}]} {
    %c0 = arith.constant 0 : index
    %c0_0 = arith.constant 0 : index
    %0 = vector.load %arg1[%c0, %c0_0] : memref<8x64xf32, #tpu.memory_space<vmem>>, vector<8x64xf32>
    %1 = math.exp %0 : vector<8x64xf32>
    %c0_1 = arith.constant 0 : index
    %c0_2 = arith.constant 0 : index
    %2 = vector.load %arg2[%c0_1, %c0_2] : memref<64x1024xf32, #tpu.memory_space<vmem>>, vector<64x1024xf32>
    %cst = arith.constant dense<0.000000e+00> : vector<8x1024xf32>
    %3 = tpu.matmul %1, %2, %cst {dimension_numbers = #tpu.dot_dimension_numbers<[1], [0], [0], [1], [0, 0, 1, 1], [], []>} : vector<8x64xf32>, vector<64x1024xf32>, vector<8x1024xf32> -> vector<8x1024xf32>
    %c0_3 = arith.constant 0 : index
    %c0_4 = arith.constant 0 : index
    %4 = vector.load %arg3[%c0_3, %c0_4] : memref<8x16xf32, #tpu.memory_space<vmem>>, vector<8x16xf32>
    %5 = math.exp %4 : vector<8x16xf32>
    %6 = vector.extract_strided_slice %5 {offsets = [0, 0], sizes = [8, 1], strides = [1, 1]} : vector<8x16xf32> to vector<8x1xf32>
    %c0_5 = arith.constant 0 : index
    %c0_6 = arith.constant 0 : index
    %7 = vector.load %arg4[%c0_5, %c0_6] : memref<16x1024xf32, #tpu.memory_space<vmem>>, vector<1x1024xf32>
    %8 = vector.broadcast %6 : vector<8x1xf32> to vector<8x1024xf32>
    %9 = vector.broadcast %7 : vector<1x1024xf32> to vector<8x1024xf32>
    %10 = arith.mulf %8, %9 : vector<8x1024xf32>
    %11 = vector.extract_strided_slice %5 {offsets = [0, 1], sizes = [8, 1], strides = [1, 1]} : vector<8x16xf32> to vector<8x1xf32>
    %c1 = arith.constant 1 : index
    %c0_7 = arith.constant 0 : index
    %12 = vector.load %arg4[%c1, %c0_7] : memref<16x1024xf32, #tpu.memory_space<vmem>>, vector<1x1024xf32>
    %13 = vector.broadcast %11 : vector<8x1xf32> to vector<8x1024xf32>
    %14 = vector.broadcast %12 : vector<1x1024xf32> to vector<8x1024xf32>
    %15 = arith.mulf %13, %14 : vector<8x1024xf32>
    %16 = arith.addf %10, %15 : vector<8x1024xf32>
    %17 = vector.extract_strided_slice %5 {offsets = [0, 2], sizes = [8, 1], strides = [1, 1]} : vector<8x16xf32> to vector<8x1xf32>
    %c2 = arith.constant 2 : index
    %c0_8 = arith.constant 0 : index
    %18 = vector.load %arg4[%c2, %c0_8] : memref<16x1024xf32, #tpu.memory_space<vmem>>, vector<1x1024xf32>
    %19 = vector.broadcast %17 : vector<8x1xf32> to vector<8x1024xf32>
    %20 = vector.broadcast %18 : vector<1x1024xf32> to vector<8x1024xf32>
    %21 = arith.mulf %19, %20 : vector<8x1024xf32>
    %22 = arith.addf %16, %21 : vector<8x1024xf32>
    %23 = vector.extract_strided_slice %5 {offsets = [0, 3], sizes = [8, 1], strides = [1, 1]} : vector<8x16xf32> to vector<8x1xf32>
    %c3 = arith.constant 3 : index
    %c0_9 = arith.constant 0 : index
    %24 = vector.load %arg4[%c3, %c0_9] : memref<16x1024xf32, #tpu.memory_space<vmem>>, vector<1x1024xf32>
    %25 = vector.broadcast %23 : vector<8x1xf32> to vector<8x1024xf32>
    %26 = vector.broadcast %24 : vector<1x1024xf32> to vector<8x1024xf32>
    %27 = arith.mulf %25, %26 : vector<8x1024xf32>
    %28 = arith.addf %22, %27 : vector<8x1024xf32>
    %29 = vector.extract_strided_slice %5 {offsets = [0, 4], sizes = [8, 1], strides = [1, 1]} : vector<8x16xf32> to vector<8x1xf32>
    %c4 = arith.constant 4 : index
    %c0_10 = arith.constant 0 : index
    %30 = vector.load %arg4[%c4, %c0_10] : memref<16x1024xf32, #tpu.memory_space<vmem>>, vector<1x1024xf32>
    %31 = vector.broadcast %29 : vector<8x1xf32> to vector<8x1024xf32>
    %32 = vector.broadcast %30 : vector<1x1024xf32> to vector<8x1024xf32>
    %33 = arith.mulf %31, %32 : vector<8x1024xf32>
    %34 = arith.addf %28, %33 : vector<8x1024xf32>
    %35 = vector.extract_strided_slice %5 {offsets = [0, 5], sizes = [8, 1], strides = [1, 1]} : vector<8x16xf32> to vector<8x1xf32>
    %c5 = arith.constant 5 : index
    %c0_11 = arith.constant 0 : index
    %36 = vector.load %arg4[%c5, %c0_11] : memref<16x1024xf32, #tpu.memory_space<vmem>>, vector<1x1024xf32>
    %37 = vector.broadcast %35 : vector<8x1xf32> to vector<8x1024xf32>
    %38 = vector.broadcast %36 : vector<1x1024xf32> to vector<8x1024xf32>
    %39 = arith.mulf %37, %38 : vector<8x1024xf32>
    %40 = arith.addf %34, %39 : vector<8x1024xf32>
    %41 = vector.extract_strided_slice %5 {offsets = [0, 6], sizes = [8, 1], strides = [1, 1]} : vector<8x16xf32> to vector<8x1xf32>
    %c6 = arith.constant 6 : index
    %c0_12 = arith.constant 0 : index
    %42 = vector.load %arg4[%c6, %c0_12] : memref<16x1024xf32, #tpu.memory_space<vmem>>, vector<1x1024xf32>
    %43 = vector.broadcast %41 : vector<8x1xf32> to vector<8x1024xf32>
    %44 = vector.broadcast %42 : vector<1x1024xf32> to vector<8x1024xf32>
    %45 = arith.mulf %43, %44 : vector<8x1024xf32>
    %46 = arith.addf %40, %45 : vector<8x1024xf32>
    %47 = vector.extract_strided_slice %5 {offsets = [0, 7], sizes = [8, 1], strides = [1, 1]} : vector<8x16xf32> to vector<8x1xf32>
    %c7 = arith.constant 7 : index
    %c0_13 = arith.constant 0 : index
    %48 = vector.load %arg4[%c7, %c0_13] : memref<16x1024xf32, #tpu.memory_space<vmem>>, vector<1x1024xf32>
    %49 = vector.broadcast %47 : vector<8x1xf32> to vector<8x1024xf32>
    %50 = vector.broadcast %48 : vector<1x1024xf32> to vector<8x1024xf32>
    %51 = arith.mulf %49, %50 : vector<8x1024xf32>
    %52 = arith.addf %46, %51 : vector<8x1024xf32>
    %53 = vector.extract_strided_slice %5 {offsets = [0, 8], sizes = [8, 1], strides = [1, 1]} : vector<8x16xf32> to vector<8x1xf32>
    %c8 = arith.constant 8 : index
    %c0_14 = arith.constant 0 : index
    %54 = vector.load %arg4[%c8, %c0_14] : memref<16x1024xf32, #tpu.memory_space<vmem>>, vector<1x1024xf32>
    %55 = vector.broadcast %53 : vector<8x1xf32> to vector<8x1024xf32>
    %56 = vector.broadcast %54 : vector<1x1024xf32> to vector<8x1024xf32>
    %57 = arith.mulf %55, %56 : vector<8x1024xf32>
    %58 = arith.addf %52, %57 : vector<8x1024xf32>
    %59 = vector.extract_strided_slice %5 {offsets = [0, 9], sizes = [8, 1], strides = [1, 1]} : vector<8x16xf32> to vector<8x1xf32>
    %c9 = arith.constant 9 : index
    %c0_15 = arith.constant 0 : index
    %60 = vector.load %arg4[%c9, %c0_15] : memref<16x1024xf32, #tpu.memory_space<vmem>>, vector<1x1024xf32>
    %61 = vector.broadcast %59 : vector<8x1xf32> to vector<8x1024xf32>
    %62 = vector.broadcast %60 : vector<1x1024xf32> to vector<8x1024xf32>
    %63 = arith.mulf %61, %62 : vector<8x1024xf32>
    %64 = arith.addf %58, %63 : vector<8x1024xf32>
    %65 = vector.extract_strided_slice %5 {offsets = [0, 10], sizes = [8, 1], strides = [1, 1]} : vector<8x16xf32> to vector<8x1xf32>
    %c10 = arith.constant 10 : index
    %c0_16 = arith.constant 0 : index
    %66 = vector.load %arg4[%c10, %c0_16] : memref<16x1024xf32, #tpu.memory_space<vmem>>, vector<1x1024xf32>
    %67 = vector.broadcast %65 : vector<8x1xf32> to vector<8x1024xf32>
    %68 = vector.broadcast %66 : vector<1x1024xf32> to vector<8x1024xf32>
    %69 = arith.mulf %67, %68 : vector<8x1024xf32>
    %70 = arith.addf %64, %69 : vector<8x1024xf32>
    %71 = vector.extract_strided_slice %5 {offsets = [0, 11], sizes = [8, 1], strides = [1, 1]} : vector<8x16xf32> to vector<8x1xf32>
    %c11 = arith.constant 11 : index
    %c0_17 = arith.constant 0 : index
    %72 = vector.load %arg4[%c11, %c0_17] : memref<16x1024xf32, #tpu.memory_space<vmem>>, vector<1x1024xf32>
    %73 = vector.broadcast %71 : vector<8x1xf32> to vector<8x1024xf32>
    %74 = vector.broadcast %72 : vector<1x1024xf32> to vector<8x1024xf32>
    %75 = arith.mulf %73, %74 : vector<8x1024xf32>
    %76 = arith.addf %70, %75 : vector<8x1024xf32>
    %77 = vector.extract_strided_slice %5 {offsets = [0, 12], sizes = [8, 1], strides = [1, 1]} : vector<8x16xf32> to vector<8x1xf32>
    %c12 = arith.constant 12 : index
    %c0_18 = arith.constant 0 : index
    %78 = vector.load %arg4[%c12, %c0_18] : memref<16x1024xf32, #tpu.memory_space<vmem>>, vector<1x1024xf32>
    %79 = vector.broadcast %77 : vector<8x1xf32> to vector<8x1024xf32>
    %80 = vector.broadcast %78 : vector<1x1024xf32> to vector<8x1024xf32>
    %81 = arith.mulf %79, %80 : vector<8x1024xf32>
    %82 = arith.addf %76, %81 : vector<8x1024xf32>
    %83 = vector.extract_strided_slice %5 {offsets = [0, 13], sizes = [8, 1], strides = [1, 1]} : vector<8x16xf32> to vector<8x1xf32>
    %c13 = arith.constant 13 : index
    %c0_19 = arith.constant 0 : index
    %84 = vector.load %arg4[%c13, %c0_19] : memref<16x1024xf32, #tpu.memory_space<vmem>>, vector<1x1024xf32>
    %85 = vector.broadcast %83 : vector<8x1xf32> to vector<8x1024xf32>
    %86 = vector.broadcast %84 : vector<1x1024xf32> to vector<8x1024xf32>
    %87 = arith.mulf %85, %86 : vector<8x1024xf32>
    %88 = arith.addf %82, %87 : vector<8x1024xf32>
    %89 = vector.extract_strided_slice %5 {offsets = [0, 14], sizes = [8, 1], strides = [1, 1]} : vector<8x16xf32> to vector<8x1xf32>
    %c14 = arith.constant 14 : index
    %c0_20 = arith.constant 0 : index
    %90 = vector.load %arg4[%c14, %c0_20] : memref<16x1024xf32, #tpu.memory_space<vmem>>, vector<1x1024xf32>
    %91 = vector.broadcast %89 : vector<8x1xf32> to vector<8x1024xf32>
    %92 = vector.broadcast %90 : vector<1x1024xf32> to vector<8x1024xf32>
    %93 = arith.mulf %91, %92 : vector<8x1024xf32>
    %94 = arith.addf %88, %93 : vector<8x1024xf32>
    %95 = vector.extract_strided_slice %5 {offsets = [0, 15], sizes = [8, 1], strides = [1, 1]} : vector<8x16xf32> to vector<8x1xf32>
    %c15 = arith.constant 15 : index
    %c0_21 = arith.constant 0 : index
    %96 = vector.load %arg4[%c15, %c0_21] : memref<16x1024xf32, #tpu.memory_space<vmem>>, vector<1x1024xf32>
    %97 = vector.broadcast %95 : vector<8x1xf32> to vector<8x1024xf32>
    %98 = vector.broadcast %96 : vector<1x1024xf32> to vector<8x1024xf32>
    %99 = arith.mulf %97, %98 : vector<8x1024xf32>
    %100 = arith.addf %94, %99 : vector<8x1024xf32>
    %101 = arith.addf %3, %100 : vector<8x1024xf32>
    %c0_22 = arith.constant 0 : index
    %c0_23 = arith.constant 0 : index
    %102 = vector.load %arg5[%c0_22, %c0_23] : memref<8x4xf32, #tpu.memory_space<vmem>>, vector<8x4xf32>
    %103 = math.exp %102 : vector<8x4xf32>
    %104 = vector.extract_strided_slice %103 {offsets = [0, 0], sizes = [8, 1], strides = [1, 1]} : vector<8x4xf32> to vector<8x1xf32>
    %c0_24 = arith.constant 0 : index
    %c0_25 = arith.constant 0 : index
    %105 = vector.load %arg6[%c0_24, %c0_25] : memref<4x1024xf32, #tpu.memory_space<vmem>>, vector<1x1024xf32>
    %106 = vector.broadcast %104 : vector<8x1xf32> to vector<8x1024xf32>
    %107 = vector.broadcast %105 : vector<1x1024xf32> to vector<8x1024xf32>
    %108 = arith.mulf %106, %107 : vector<8x1024xf32>
    %109 = vector.extract_strided_slice %103 {offsets = [0, 1], sizes = [8, 1], strides = [1, 1]} : vector<8x4xf32> to vector<8x1xf32>
    %c1_26 = arith.constant 1 : index
    %c0_27 = arith.constant 0 : index
    %110 = vector.load %arg6[%c1_26, %c0_27] : memref<4x1024xf32, #tpu.memory_space<vmem>>, vector<1x1024xf32>
    %111 = vector.broadcast %109 : vector<8x1xf32> to vector<8x1024xf32>
    %112 = vector.broadcast %110 : vector<1x1024xf32> to vector<8x1024xf32>
    %113 = arith.mulf %111, %112 : vector<8x1024xf32>
    %114 = arith.addf %108, %113 : vector<8x1024xf32>
    %115 = vector.extract_strided_slice %103 {offsets = [0, 2], sizes = [8, 1], strides = [1, 1]} : vector<8x4xf32> to vector<8x1xf32>
    %c2_28 = arith.constant 2 : index
    %c0_29 = arith.constant 0 : index
    %116 = vector.load %arg6[%c2_28, %c0_29] : memref<4x1024xf32, #tpu.memory_space<vmem>>, vector<1x1024xf32>
    %117 = vector.broadcast %115 : vector<8x1xf32> to vector<8x1024xf32>
    %118 = vector.broadcast %116 : vector<1x1024xf32> to vector<8x1024xf32>
    %119 = arith.mulf %117, %118 : vector<8x1024xf32>
    %120 = arith.addf %114, %119 : vector<8x1024xf32>
    %121 = vector.extract_strided_slice %103 {offsets = [0, 3], sizes = [8, 1], strides = [1, 1]} : vector<8x4xf32> to vector<8x1xf32>
    %c3_30 = arith.constant 3 : index
    %c0_31 = arith.constant 0 : index
    %122 = vector.load %arg6[%c3_30, %c0_31] : memref<4x1024xf32, #tpu.memory_space<vmem>>, vector<1x1024xf32>
    %123 = vector.broadcast %121 : vector<8x1xf32> to vector<8x1024xf32>
    %124 = vector.broadcast %122 : vector<1x1024xf32> to vector<8x1024xf32>
    %125 = arith.mulf %123, %124 : vector<8x1024xf32>
    %126 = arith.addf %120, %125 : vector<8x1024xf32>
    %127 = arith.addf %101, %126 : vector<8x1024xf32>
    %c0_32 = arith.constant 0 : index
    %c0_33 = arith.constant 0 : index
    %128 = vector.load %arg7[%c0_32, %c0_33] : memref<8x1024xf32, #tpu.memory_space<vmem>>, vector<8x1024xf32>
    tpu.vector_store %arg7[%c0_32, %c0_33], %127 {strides = array<i32>} : memref<8x1024xf32, #tpu.memory_space<vmem>>, vector<8x1024xf32>,
    return
  }
  func.func @transform_0(%arg0: i32) -> (i32, i32) {
    %c0_i32 = arith.constant 0 : i32
    %c0_i32_0 = arith.constant 0 : i32
    %c0_i32_1 = arith.constant 0 : i32
    return %c0_i32, %c0_i32_0 : i32, i32
  }
  func.func @transform_1(%arg0: i32) -> (i32, i32) {
    %c0_i32 = arith.constant 0 : i32
    %c0_i32_0 = arith.constant 0 : i32
    %c0_i32_1 = arith.constant 0 : i32
    return %c0_i32, %c0_i32_0 : i32, i32
  }
  func.func @transform_2(%arg0: i32) -> (i32, i32) {
    %c0_i32 = arith.constant 0 : i32
    %c0_i32_0 = arith.constant 0 : i32
    %c0_i32_1 = arith.constant 0 : i32
    return %c0_i32, %c0_i32_0 : i32, i32
  }
  func.func @transform_3(%arg0: i32) -> (i32, i32) {
    %c0_i32 = arith.constant 0 : i32
    %c0_i32_0 = arith.constant 0 : i32
    %c0_i32_1 = arith.constant 0 : i32
    return %c0_i32, %c0_i32_0 : i32, i32
  }
  func.func @transform_4(%arg0: i32) -> (i32, i32) {
    %c0_i32 = arith.constant 0 : i32
    %c0_i32_0 = arith.constant 0 : i32
    %c0_i32_1 = arith.constant 0 : i32
    return %c0_i32, %c0_i32_0 : i32, i32
  }
  func.func @transform_5(%arg0: i32) -> (i32, i32) {
    %c0_i32 = arith.constant 0 : i32
    %c0_i32_0 = arith.constant 0 : i32
    %c0_i32_1 = arith.constant 0 : i32
    return %c0_i32, %c0_i32_0 : i32, i32
  }
  func.func @transform_6(%arg0: i32) -> (i32, i32) {
    %c0_i32 = arith.constant 0 : i32
    %c0_i32_0 = arith.constant 0 : i32
    %c0_i32_1 = arith.constant 0 : i32
    return %c0_i32, %c0_i32_0 : i32, i32
  }
}

</mosaic_0001>

<bundles_post_ra>
// kernel: tile.19
= control target key start
LH: loop header
LB: loop body
LE: loop exit
PB: predicated region body
PF: predicated region fallthrough
CT: control target
= control target key end

     0   :  { %vm60_vm0 = vcmask 1047556   ;;  %vm3_vm1 = vcmask 523264   ;;  %s189_s14 = smov 64   ;;  %vm64_vm2 = vcmask 1048064   ;;  %s384_s0 = inlined_call_operand.vmem [shape: f32[16,8,64], index: 0, kind: input, shape index: {}]   ;;  %s385_s1 = inlined_call_operand.vmem [shape: f32[16,512], index: 1, kind: output, shape index: {}]  }
   0x1   :  { %v170_v0 = vld [vmem:[%s384_s0 + $0x3] ss:$8 sm:$0xf]   ;;  %v165_v3 = vld [vmem:[%s384_s0 + $0x1] ss:$8 sm:$0xf]  }
   0x2   :  { %v171_v1 = vld [vmem:[%s384_s0 + $0x3] ss:$8 sm:$0xf0]   ;;  %v166_v4 = vld [vmem:[%s384_s0 + $0x1] ss:$8 sm:$0xf0]  }
   0x3   :  { %v82_v2 = vsel %vm60_vm0, %v171_v1, %v170_v0  ;;  %v61_v5 = vsel %vm60_vm0, %v166_v4, %v165_v3  ;;  %v173_v6 = vld [vmem:[%s384_s0 + $0x43] ss:$8 sm:$0xf]   ;;  %v167_v9 = vld [vmem:[%s384_s0 + $0x41] ss:$8 sm:$0xf]  }
   0x4   :  { %83 = vrot.lane.b32.xlu1 %v82_v2, %s189_s14  ;;  %v174_v7 = vld [vmem:[%s384_s0 + $0x43] ss:$8 sm:$0xf0]   ;;  %62 = vrot.lane.b32.xlu0 %v61_v5, %s189_s14  ;;  %v168_v10 = vld [vmem:[%s384_s0 + $0x41] ss:$8 sm:$0xf0]  }
   0x5   :  { %v93_v8 = vsel %vm60_vm0, %v174_v7, %v173_v6  ;;  %v71_v11 = vsel %vm60_vm0, %v168_v10, %v167_v9  ;;  %v179_v12 = vld [vmem:[%s384_s0 + $0x45] ss:$8 sm:$0xf]   ;;  %v185_v16 = vld [vmem:[%s384_s0 + $0x47] ss:$8 sm:$0xf]  }
   0x6   :  { %v180_v13 = vld [vmem:[%s384_s0 + $0x45] ss:$8 sm:$0xf0]   ;;  %v186_v17 = vld [vmem:[%s384_s0 + $0x47] ss:$8 sm:$0xf0]  }
   0x7   :  { %v176_v14 = vld [vmem:[%s384_s0 + $0x5] ss:$8 sm:$0xf]   ;;  %v115_v18 = vsel %vm60_vm0, %v180_v13, %v179_v12  ;;  %v182_v19 = vld [vmem:[%s384_s0 + $0x7] ss:$8 sm:$0xf]   ;;  %v137_v30 = vsel %vm60_vm0, %v186_v17, %v185_v16 }
   0x8   :  { %v177_v15 = vld [vmem:[%s384_s0 + $0x5] ss:$8 sm:$0xf0]   ;;  %94 = vrot.lane.b32.xlu1 %v93_v8, %s189_s14  ;;  %72 = vrot.lane.b32.xlu0 %v71_v11, %s189_s14  ;;  %v183_v20 = vld [vmem:[%s384_s0 + $0x7] ss:$8 sm:$0xf0]  }
   0x9   :  { %v104_v21 = vsel %vm60_vm0, %v177_v15, %v176_v14  ;;  %v2_v22 = vld [vmem:[%s384_s0] ss:$2 sm:$0xff]   ;;  %v144_v23 = vld [vmem:[%s384_s0 + $0x10] ss:$2 sm:$0xff]   ;;  %v126_v31 = vsel %vm60_vm0, %v183_v20, %v182_v19 }
   0xa   :  { %v147_v24 = vld [vmem:[%s384_s0 + $0x20] ss:$2 sm:$0xff]   ;;  %4 = vst.msk [vmem:[%s385_s1] ss:$8 sm:$0xf] %vm3_vm1, %v2_v22  }
   0xb   :  { %143 = vst.msk [vmem:[%s385_s1 - $0x1f] ss:$8 sm:$0xf0] %vm3_vm1, %v2_v22   ;;  %145 = vst.msk [vmem:[%s385_s1 + $0x2] ss:$8 sm:$0xf] %vm3_vm1, %v144_v23  }
   0xc   :  { %146 = vst.msk [vmem:[%s385_s1 - $0x1d] ss:$8 sm:$0xf0] %vm3_vm1, %v144_v23   ;;  %148 = vst.msk [vmem:[%s385_s1 + $0x4] ss:$8 sm:$0xf] %vm3_vm1, %v147_v24   ;;  %116 = vrot.lane.b32.xlu1 %v115_v18, %s189_s14  ;;  %105 = vrot.lane.b32.xlu0 %v104_v21, %s189_s14 }
   0xd   :  { %149 = vst.msk [vmem:[%s385_s1 - $0x1b] ss:$8 sm:$0xf0] %vm3_vm1, %v147_v24   ;;  %v150_v25 = vld [vmem:[%s384_s0 + $0x30] ss:$2 sm:$0xff]  }
   0xe   :  { %v153_v26 = vld [vmem:[%s384_s0 + $0x40] ss:$2 sm:$0xff]   ;;  %v156_v27 = vld [vmem:[%s384_s0 + $0x50] ss:$2 sm:$0xff]  }
   0xf   :  { %151 = vst.msk [vmem:[%s385_s1 + $0x6] ss:$8 sm:$0xf] %vm3_vm1, %v150_v25   ;;  %152 = vst.msk [vmem:[%s385_s1 - $0x19] ss:$8 sm:$0xf0] %vm3_vm1, %v150_v25  }
  0x10   :  { %154 = vst.msk [vmem:[%s385_s1 + $0x20] ss:$8 sm:$0xf] %vm3_vm1, %v153_v26   ;;  %155 = vst.msk [vmem:[%s385_s1 + $0x1] ss:$8 sm:$0xf0] %vm3_vm1, %v153_v26   ;;  %138 = vrot.lane.b32.xlu1 %v137_v30, %s189_s14  ;;  %127 = vrot.lane.b32.xlu0 %v126_v31, %s189_s14 }
  0x11   :  { %157 = vst.msk [vmem:[%s385_s1 + $0x22] ss:$8 sm:$0xf] %vm3_vm1, %v156_v27   ;;  %158 = vst.msk [vmem:[%s385_s1 + $0x3] ss:$8 sm:$0xf0] %vm3_vm1, %v156_v27  }
  0x12   :  { %v159_v28 = vld [vmem:[%s384_s0 + $0x60] ss:$2 sm:$0xff]   ;;  %v162_v29 = vld [vmem:[%s384_s0 + $0x70] ss:$2 sm:$0xff]  }
  0x13   :  { %160 = vst.msk [vmem:[%s385_s1 + $0x24] ss:$8 sm:$0xf] %vm3_vm1, %v159_v28   ;;  %161 = vst.msk [vmem:[%s385_s1 + $0x5] ss:$8 sm:$0xf0] %vm3_vm1, %v159_v28  }
  0x14   :  { %163 = vst.msk [vmem:[%s385_s1 + $0x26] ss:$8 sm:$0xf] %vm3_vm1, %v162_v29   ;;  %164 = vst.msk [vmem:[%s385_s1 + $0x7] ss:$8 sm:$0xf0] %vm3_vm1, %v162_v29  }
  0x76   :  { %v84_v32 = vpop.permute.xlu1 %83   ;;  %v63_v33 = vpop.permute.xlu0 %62  }
  0x77   :  { %172 = vst.msk [vmem:[%s385_s1 + $0x8] sm:$0xff] %vm64_vm2, %v84_v32   ;;  %65 = vst.msk [vmem:[%s385_s1] sm:$0xff] %vm64_vm2, %v63_v33  }
  0x7a   :  { %v95_v34 = vpop.permute.xlu1 %94   ;;  %v73_v35 = vpop.permute.xlu0 %72  }
  0x7b   :  { %175 = vst.msk [vmem:[%s385_s1 + $0x28] sm:$0xff] %vm64_vm2, %v95_v34   ;;  %169 = vst.msk [vmem:[%s385_s1 + $0x20] sm:$0xff] %vm64_vm2, %v73_v35  }
  0x7e   :  { %v117_v36 = vpop.permute.xlu1 %116   ;;  %v106_v37 = vpop.permute.xlu0 %105  }
  0x7f   :  { %181 = vst.msk [vmem:[%s385_s1 + $0x30] sm:$0xff] %vm64_vm2, %v117_v36   ;;  %178 = vst.msk [vmem:[%s385_s1 + $0x10] sm:$0xff] %vm64_vm2, %v106_v37  }
  0x82   :  { %v139_v38 = vpop.permute.xlu1 %138   ;;  %v128_v39 = vpop.permute.xlu0 %127  }
  0x83   :  { %187 = vst.msk [vmem:[%s385_s1 + $0x38] sm:$0xff] %vm64_vm2, %v139_v38   ;;  %184 = vst.msk [vmem:[%s385_s1 + $0x18] sm:$0xff] %vm64_vm2, %v128_v39  }

// kernel: fastflow_forward.4
= control target key start
LH: loop header
LB: loop body
LE: loop exit
PB: predicated region body
PF: predicated region fallthrough
CT: control target
= control target key end

     0   :  { %s1193_s27 = smov 0   ;;  %s1195_s28 = smov 0   ;;  %s1413_s0 = inlined_call_operand.vmem [shape: f32[3,512], index: 0, kind: input, shape index: {}]   ;;  %s1414_s1 = inlined_call_operand.vmem [shape: f32[16,512], index: 1, kind: input, shape index: {}]   ;;  %s1415_s2 = inlined_call_operand.vmem [shape: f32[16,3], index: 2, kind: input, shape index: {}]   ;;  %s1416_s3 = inlined_call_operand.vmem [shape: f32[16,1], index: 3, kind: input, shape index: {}]   ;;  %s1417_s4 = inlined_call_operand.vmem [shape: bf16[2,32,24], index: 4, kind: input, shape index: {}]   ;;  %s1418_s5 = inlined_call_operand.vmem [shape: f32[2,32,1], index: 5, kind: input, shape index: {}]   ;;  %s1419_s6 = inlined_call_operand.vmem [shape: bf16[2,16,32], index: 6, kind: input, shape index: {}]   ;;  %s1420_s7 = inlined_call_operand.vmem [shape: f32[2,16,1], index: 7, kind: input, shape index: {}]   ;;  %s1421_s8 = inlined_call_operand.vmem [shape: f32[3,512], index: 8, kind: output, shape index: {}]  }
   0x1   :  { %s1197_s29 = smov 0  }
   0x2 LB: > { %s1019_s30 = sadd.s32 4294967295, %s1143_s29   ;;  %s1210_s9 = sadd.s32 1, %s1143_s29   ;;  %s1143_s29 = sphi %s1197_s29, %s1424_s29   ;;  %s1139_s28 = sphi %s1195_s28, %s1423_s28   ;;  %s1135_s27 = sphi %s1193_s27, %s1422_s27  }
   0x3   : > { %s48_s10 = ssub.s32 %s1143_s29, %s1210_s9  ;;  %s51_s11 = sadd.s32 1, %s1139_s28 }
   0x4   : > { %p49_p0 = scmp.eq.s32.totalorder %s48_s10, 0  ;;  %p58_p1 = scmp.ne.s32.totalorder %s1139_s28, %s1135_s27 }
   0x5   : > { %p59_p2 = scmp.eq.s32.totalorder %s1143_s29, 0  ;;  %p1022_p4 = scmp.ge.s32.totalorder %s1143_s29, 2 }
   0x6   : > { %s1219_s12 = scalar_select %p49_p0, %s1139_s28, %s51_s11  }
   0x7   : > { %p60_p3 = por %p59_p2, %p58_p1  ;;  %254 = sbr.rel (%p1022_p4) target bundleno = 18 (0x12), region = 40 }
   0xc   : > { %266 = sbr.rel (!%p60_p3) target bundleno = 18 (0x12), region = 48  ;;  %s268_s13 = sand.u32 (%p60_p3), 1, %s1139_s28  }
   0xd   : > { %s1062_s14 = sshll.u32 (%p60_p3), %s1143_s29, 4  ;;  %s1023_s15 = sshll.u32 (%p60_p3), %s268_s13, 5 }
   0xe   : > { %s273_s18 = scalar_lea.vmem (%p60_p3), %s1414_s1, %s1062_s14  ;;  %s270_s19 = scalar_lea.vmem (%p60_p3), [#allocation2], %s1023_s15 }
   0xf   : > { %v286_v0 = vld [vmem:[%s273_s18] sm:$0xff] (%p60_p3)  ;;  %v288_v1 = vld [vmem:[%s273_s18 + $0x8] sm:$0xff] (%p60_p3) }
  0x10   : > { %v290_v2 = vld [vmem:[%s273_s18 + $0x20] sm:$0xff] (%p60_p3)  ;;  %287 = vst [vmem:[%s270_s19] sm:$0xff] (%p60_p3), %v286_v0  ;;  %289 = vst [vmem:[%s270_s19 + $0x8] sm:$0xff] (%p60_p3), %v288_v1  ;;  %v292_v3 = vld [vmem:[%s273_s18 + $0x28] sm:$0xff] (%p60_p3) }
  0x11   : > { %291 = vst [vmem:[%s270_s19 + $0x10] sm:$0xff] %v290_v2  ;;  %293 = vst [vmem:[%s270_s19 + $0x18] sm:$0xff] %v292_v3 }
  0x12 PF: > { %p1026_p5 = scmp.ge.s32.totalorder %s1143_s29, 1  ;;  %p298_p6 = scmp.lt.s32.totalorder %s1143_s29, 3 }
  0x14   : > { %p299_p7 = pnand %p1026_p5, %p298_p6 }
  0x15   : > { %s305_s24 = sand.u32 (!%p299_p7), 1, %s1135_s27  }
  0x16   : > { %302 = sbr.rel (%p299_p7) target bundleno = 1111 (0x457), region = 71  ;;  %s1027_s25 = sshll.u32 (!%p299_p7), %s305_s24, 5 }
  0x17   : > { %s1246_s14 = scalar_lea.vmem (!%p299_p7), [#allocation2], %s1027_s25  ;;  %s1028_s24 = sshll.u32 (!%p299_p7), %s1019_s30, 1 }
  0x18   : > { %p344_p8 = scmp.lt.s32.totalorder (!%p299_p7), %s1028_s24, 3 }
  0x1b   : > { %v357_v4 = vld [vmem:[%s1415_s2] sm:$0xff]  ;;  %v1145_v5 = vmov 2   ;;  %v1146_v6 = vmov 0   ;;  %v1147_v8 = vmov 1   ;;  %v477_v9 = vld [vmem:[%s1418_s5 + $0x10] sm:$0xff]  ;;  %v478_v10 = vld [vmem:[%s1418_s5 + $0x18] sm:$0xff]  ;;  %v371_v21 = vlaneseq }
  0x1c   : > { %1092 = vset.pattern.permute.xlu1 %v1145_v5  ;;  %1090 = vset.pattern.permute.xlu0 %v1146_v6  ;;  %v443_v7 = vld [vmem:[%s1416_s3] sm:$0xff]  ;;  %v466_v11 = vld [vmem:[%s1246_s14 + $0x18] sm:$0xff]  ;;  %vm516_vm0 = vcmask 1043456   ;;  %v465_v12 = vld [vmem:[%s1246_s14 + $0x10] sm:$0xff]  ;;  %s1426_s24 = smov (!%p344_p8, %s1028_s24), 3  ;;  %vm509_vm1 = vcmask 195584  }
  0x1d   : > { %417 = vperm.xlu1 %1092, %v357_v4   ;;  %362 = vperm.xlu0 %1090, %v357_v4   ;;  %v1251_v13 = vpack.c.bf16 %v466_v11, %v466_v11  ;;  %v469_v14 = vpack.c.bf16 %v465_v12, %v465_v12  ;;  %v475_v15 = vld [vmem:[%s1418_s5] sm:$0xff]  ;;  %v476_v18 = vld [vmem:[%s1418_s5 + $0x8] sm:$0xff]  ;;  %s1029_s25 = sshll.u32 %s1426_s24, 2  ;;  %v372_v22 = vshrl.u32 %v371_v21, 7  ;;  %v1057_v21 = vld [vmem:[%s1420_s7 + $0x18] sm:$0xff]  ;;  %vm607_vm2 = vcmask 261120  }
  0x1e   : > { %555 = vmatprep.mubr.bf16.mxu0 %v1146_v6  ;;  %643 = vmatprep.mubr.bf16.mxu1 %v1146_v6  ;;  %v590_v16 = vld [vmem:[%s1420_s7] sm:$0xff]  ;;  %v358_v19 = vld [vmem:[%s1415_s2 + $0x8] sm:$0xff]  ;;  %s347_s11 = scalar_lea.vmem %s1413_s0, %s1029_s25  ;;  %vm934_vm3 = vcmask 1040384   ;;  %vm937_vm4 = vcmask 1041408   ;;  %s354_s21 = scalar_lea.vmem %s1421_s8, %s1029_s25 }
  0x1f   : > { %1036 = vmatprep.subr.msk.bf16.mxu0 %vm516_vm0, %v1251_v13  ;;  %v1262_v17 = vsel %vm516_vm0, %v469_v14, 0  ;;  %v444_v20 = vld [vmem:[%s1416_s3 + $0x8] sm:$0xff]  ;;  %v373_v23 = vsub.s32 0, %v372_v22  ;;  %v377_v24 = vsub.s32 1, %v372_v22  ;;  %v1296_v54 = vld [vmem:[%s1246_s14] sm:$0xff] }
  0x20   : > { %536 = vmatpush1.bf16.msra.mxu0 %v1262_v17  ;;  %v359_v25 = vld [vmem:[%s347_s11] ss:$4 sm:$0x3]  ;;  %v1033_v26 = vld [vmem:[%s347_s11 + $0x2] ss:$4 sm:$0x3] }
  0x21   : > { %1093 = vset.pattern.permute.xlu1 %v1146_v6  ;;  %1091 = vset.pattern.permute.xlu0 %v1147_v8  ;;  %v1032_v27 = vld [vmem:[%s347_s11 + $0x1] ss:$4 sm:$0x3]  ;;  %v374_v30 = vrot.slane %v359_v25, %v373_v23  ;;  %v378_v31 = vrot.slane %v359_v25, %v377_v24  ;;  %v428_v32 = vrot.slane %v1033_v26, %v373_v23  ;;  %v1293_v53 = vld [vmem:[%s1246_s14 + $0x8] sm:$0xff] }
  0x22   : > { %447 = vperm.xlu1 %1093, %v443_v7   ;;  %388 = vperm.xlu0 %1091, %v357_v4   ;;  %v432_v33 = vrot.slane %v1033_v26, %v377_v24  ;;  %v399_v34 = vrot.slane %v1032_v27, %v373_v23  ;;  %v403_v35 = vrot.slane %v1032_v27, %v377_v24  ;;  %v1099_v61 = vld [vmem:[%s1417_s4] sm:$0xff]   ;;  %v591_v14 = vld [vmem:[%s1420_s7 + $0x8] sm:$0xff] }
  0x26   : > { %491 = vperm.xlu1 %1093, %v477_v9   ;;  %1094 = vset.pattern.permute.xlu0 %v1146_v6 }
  0x27   : > { %496 = vperm.xlu0 %1094, %v478_v10  }
  0x2a   : > { %481 = vperm.xlu1 %1093, %v475_v15   ;;  %v1047_v15 = vld [vmem:[%s1418_s5 + $0x30] sm:$0xff] }
  0x2b   : > { %594 = vperm.xlu0 %1094, %v590_v16   ;;  %v1048_v16 = vld [vmem:[%s1418_s5 + $0x38] sm:$0xff] }
  0x2e   : > { %486 = vperm.xlu1 %1093, %v476_v18   ;;  %v1045_v18 = vld [vmem:[%s1418_s5 + $0x20] sm:$0xff] }
  0x2f   : > { %1095 = vset.pattern.permute.xlu0 %v1147_v8  ;;  %v1100_v8 = vld [vmem:[%s1417_s4 + $0x8] sm:$0xff]  }
  0x30   : > { %392 = vperm.xlu0 %1095, %v358_v19  }
  0x32   : > { %367 = vperm.xlu1 %1093, %v358_v19  }
  0x34   : > { %1098 = vset.pattern.permute.xlu0 %v1146_v6 }
  0x35   : > { %599 = vperm.xlu0 %1098, %v591_v14  }
  0x36   : > { %1096 = vset.pattern.permute.xlu1 %v1145_v5 }
  0x37   : > { %421 = vperm.xlu1 %1096, %v358_v19   ;;  %v1046_v19 = vld [vmem:[%s1418_s5 + $0x28] sm:$0xff] }
  0x39   : > { %682 = vperm.xlu0 %1098, %v1045_v18  }
  0x3b   : > { %1097 = vset.pattern.permute.xlu1 %v1146_v6 }
  0x3c   : > { %452 = vperm.xlu1 %1097, %v444_v20   ;;  %v1056_v20 = vld [vmem:[%s1420_s7 + $0x10] sm:$0xff] }
  0x3d   : > { %789 = vperm.xlu0 %1098, %v1056_v20  }
  0x40   : > { %692 = vperm.xlu1 %1097, %v1047_v15  }
  0x44   : > { %697 = vperm.xlu1 %1097, %v1048_v16  }
  0x48   : > { %687 = vperm.xlu1 %1097, %v1046_v19  }
  0x4c   : > { %794 = vperm.xlu1 %1097, %v1057_v21  }
  0x98   : > { %v363_v28 = vpop.permute.xlu0 %362  ;;  %v418_v29 = vpop.permute.xlu1 %417 }
  0x99   : > { %v381_v36 = vmul.f32 %v374_v30, %v363_v28  ;;  %v382_v37 = vmul.f32 %v378_v31, %v363_v28  ;;  %v435_v40 = vmul.f32 %v428_v32, %v418_v29  ;;  %v436_v41 = vmul.f32 %v432_v33, %v418_v29 }
  0x9d   : > { %v448_v38 = vpop.permute.xlu1 %447  ;;  %v389_v39 = vpop.permute.xlu0 %388 }
  0x9e   : > { %v406_v42 = vmul.f32 %v399_v34, %v389_v39  ;;  %v407_v43 = vmul.f32 %v403_v35, %v389_v39 }
  0xa0   : > { %v410_v44 = vadd.f32 %v406_v42, %v381_v36  ;;  %v411_v45 = vadd.f32 %v407_v43, %v382_v37 }
  0xa1   : > { %v492_v46 = vpop.permute.xlu1 %491 }
  0xa2   : > { %v439_v47 = vadd.f32 %v435_v40, %v410_v44  ;;  %v440_v48 = vadd.f32 %v436_v41, %v411_v45  ;;  %v497_v49 = vpop.permute.xlu0 %496 }
  0xa4   : > { %v1286_v50 = vadd.f32 %v448_v38, %v440_v48  ;;  %v1288_v51 = vadd.f32 %v448_v38, %v439_v47 }
  0xa5   : > { %v1290_v52 = vpop.permute.xlu1 %481 }
  0xa6   : > { %v1298_v55 = vpop.permute.xlu0 %594  ;;  %v460_v56 = vmax.f32 %v1286_v50, 0.0  ;;  %v459_v57 = vmax.f32 %v1288_v51, 0.0 }
  0xa8   : > { %v468_v58 = vpack.c.bf16 %v1293_v53, %v460_v56  ;;  %v467_v59 = vpack.c.bf16 %v1296_v54, %v459_v57 }
  0xa9   : > { %v487_v60 = vpop.permute.xlu1 %486 }
  0xaa   : > { %537 = vmatprep.subr.bf16.mxu0 %v468_v58 }
  0xab   : > { %538 = vmatpush1.bf16.msra.mxu0 %v467_v59  ;;  %v393_v62 = vpop.permute.xlu0 %392 }
  0xac   : > { %v408_v63 = vmul.f32 %v399_v34, %v393_v62  ;;  %v409_v0 = vmul.f32 %v403_v35, %v393_v62 }
  0xad   : > { %v368_v1 = vpop.permute.xlu1 %367 }
  0xae   : > { %v383_v2 = vmul.f32 %v374_v30, %v368_v1  ;;  %v384_v3 = vmul.f32 %v378_v31, %v368_v1  ;;  %1037 = vmatmul.mubr.msk.bf16.vlgmr.msra.gmra.mxu0 %vm509_vm1, %v1099_v61 }
  0xaf   : > { %565 = vmatprep.mubr.bf16.mxu0 %v1146_v6 }
  0xb0   : > { %v412_v4 = vadd.f32 %v408_v63, %v383_v2  ;;  %v413_v5 = vadd.f32 %v409_v0, %v384_v3 }
  0xb2   : > { %v422_v7 = vpop.permute.xlu1 %421 }
  0xb3   : > { %v437_v9 = vmul.f32 %v428_v32, %v422_v7  ;;  %v438_v10 = vmul.f32 %v432_v33, %v422_v7 }
  0xb5   : > { %v1316_v11 = vadd.f32 %v437_v9, %v412_v4  ;;  %v1318_v12 = vadd.f32 %v438_v10, %v413_v5 }
  0xb6   : > { %1038 = vmatmul.mubr.msk.bf16.gmra.mxu0 %vm509_vm1, %v1100_v8  ;;  %v600_v8 = vpop.permute.xlu0 %599 }
  0xb7   : > { %837 = vmatprep.mubr.bf16.mxu0 %v1146_v6  ;;  %v453_v2 = vpop.permute.xlu1 %452 }
  0xb8   : > { %v457_v3 = vadd.f32 %v453_v2, %v1316_v11  ;;  %v458_v5 = vadd.f32 %v453_v2, %v1318_v12 }
  0xba   : > { %v462_v10 = vmax.f32 %v458_v5, 0.0 }
 0x16e   : > { %v557_v22 = vpop.f32.mrf.mxu0 }
 0x16f   : > { %v558_v41 = vadd.f32 %v557_v22, %v1290_v52  ;;  %v1102_v22 = vld [vmem:[%s1417_s4 + $0x10] sm:$0xff]  }
 0x170   : > { %v559_v23 = vpop.f32.mrf.mxu0 }
 0x171   : > { %v560_v34 = vadd.f32 %v559_v23, %v1290_v52  ;;  %v576_v58 = vmax.f32 %v558_v41, 0.0  ;;  %v1103_v23 = vld [vmem:[%s1417_s4 + $0x18] sm:$0xff]  }
 0x172   : > { %v561_v24 = vpop.f32.mrf.mxu0 }
 0x173   : > { %v562_v36 = vadd.f32 %v561_v24, %v487_v60  ;;  %v577_v43 = vmax.f32 %v560_v34, 0.0 }
 0x174   : > { %v563_v25 = vpop.f32.mrf.mxu0 }
 0x175   : > { %v564_v29 = vadd.f32 %v563_v25, %v487_v60  ;;  %v578_v45 = vmax.f32 %v562_v36, 0.0 }
 0x176   : > { %v567_v26 = vpop.f32.mrf.mxu0 }
 0x177   : > { %v568_v32 = vadd.f32 %v567_v26, %v492_v46  ;;  %v579_v38 = vmax.f32 %v564_v29, 0.0 }
 0x178   : > { %v569_v27 = vpop.f32.mrf.mxu0 }
 0x179   : > { %v570_v30 = vadd.f32 %v569_v27, %v492_v46  ;;  %v580_v42 = vmax.f32 %v568_v32, 0.0  ;;  %v585_v48 = vpack.c.bf16 %v579_v38, %v577_v43  ;;  %v584_v46 = vpack.c.bf16 %v578_v45, %v576_v58 }
 0x17a   : > { %v571_v28 = vpop.f32.mrf.mxu0 }
 0x17b   : > { %v572_v31 = vadd.f32 %v571_v28, %v497_v49  ;;  %v581_v39 = vmax.f32 %v570_v30, 0.0 }
 0x17c   : > { %v573_v33 = vpop.f32.mrf.mxu0 }
 0x17d   : > { %v574_v35 = vadd.f32 %v573_v33, %v497_v49  ;;  %v582_v37 = vmax.f32 %v572_v31, 0.0  ;;  %v1101_v49 = vld [vmem:[%s1419_s6] sm:$0xff]  }
 0x17f   : > { %v583_v40 = vmax.f32 %v574_v35, 0.0  ;;  %v586_v47 = vpack.c.bf16 %v582_v37, %v580_v42 }
 0x181   : > { %v587_v44 = vpack.c.bf16 %v583_v40, %v581_v39 }
 0x183   : > { %623 = vmatprep.subr.bf16.mxu1 %v587_v44 }
 0x184   : > { %624 = vmatpush1.bf16.msra.mxu1 %v586_v47 }
 0x185   : > { %625 = vmatprep.subr.bf16.mxu1 %v585_v48 }
 0x188   : > { %626 = vmatpush1.bf16.msra.mxu1 %v584_v46 }
 0x189   : > { %1051 = vmatprep.subr.msk.bf16.mxu1 %vm516_vm0, %v1251_v13 }
 0x18b   : > { %1040 = vmatmul.mubr.msk.bf16.vlgmr.msra.gmra.mxu1 %vm607_vm2, %v1101_v49 }
 0x18c   : > { %729 = vmatpush1.bf16.msra.mxu1 %v1262_v17  ;;  %748 = vmatprep.mubr.bf16.mxu1 %v1146_v6 }
 0x24b   : > { %v645_v52 = vpop.f32.mrf.mxu1 }
 0x24c   : > { %v646_v59 = vadd.f32 %v645_v52, %v1298_v55 }
 0x24d   : > { %v647_v60 = vpop.f32.mrf.mxu1 }
 0x24e   : > { %1105 = vtanh.f32 %v646_v59  ;;  %v648_v61 = vadd.f32 %v647_v60, %v1298_v55  ;;  %v461_v55 = vmax.f32 %v457_v3, 0.0  ;;  %v1104_v60 = vld [vmem:[%s1419_s6 + $0x8] sm:$0xff]  }
 0x24f   : > { %v649_v4 = vpop.f32.mrf.mxu1 }
 0x250   : > { %1107 = vtanh.f32 %v648_v61  ;;  %v650_v16 = vadd.f32 %v649_v4, %v600_v8 }
 0x251   : > { %v651_v9 = vpop.f32.mrf.mxu1 }
 0x252   : > { %v652_v18 = vadd.f32 %v651_v9, %v600_v8 }
 0x25b   : > { %v1106_v62 = vpop.eup %1105 }
 0x25c   : > { %v1355_v63 = vmul.f32 1.9, %v1106_v62 }
 0x25d   : > { %v1108_v0 = vpop.eup %1107 }
 0x25e   : > { %v658_v13 = vmul.f32 1.442695, %v1355_v63  ;;  %v1358_v1 = vmul.f32 1.9, %v1108_v0 }
 0x260   : > { %1109 = vpow2.f32 %v658_v13  ;;  %v660_v17 = vmul.f32 1.442695, %v1358_v1 }
 0x262   : > { %1111 = vpow2.f32 %v660_v17 }
 0x26d   : > { %v1110_v7 = vpop.eup %1109 }
 0x26e   : > { %v662_v14 = vmul.f32 %v1110_v7, %v461_v55 }
 0x26f   : > { %v1112_v15 = vpop.eup %1111 }
 0x270   : > { %v663_v19 = vmul.f32 %v1112_v15, %v462_v10  ;;  %v1363_v20 = vadd.f32 %v662_v14, %v650_v16 }
 0x272   : > { %v1365_v21 = vadd.f32 %v663_v19, %v652_v18  ;;  %v668_v12 = vpack.c.bf16 %v1296_v54, %v1363_v20  ;;  %v902_v8 = vmul.f32 %v1363_v20, %v1363_v20  ;;  %v874_v9 = vrot.slane %v1363_v20, 4 }
 0x274   : > { %v669_v11 = vpack.c.bf16 %v1293_v53, %v1365_v21  ;;  %v693_v53 = vpop.permute.xlu1 %692  ;;  %v903_v10 = vmul.f32 %v1365_v21, %v1365_v21  ;;  %v904_v14 = vrot.slane %v902_v8, 4  ;;  %v880_v15 = vrot.slane %v1365_v21, 4 }
 0x275   : > { %v875_v18 = vadd.f32 %v874_v9, %v1363_v20 }
 0x276   : > { %730 = vmatprep.subr.bf16.mxu1 %v669_v11  ;;  %v910_v19 = vrot.slane %v903_v10, 4 }
 0x277   : > { %731 = vmatpush1.bf16.msra.mxu1 %v668_v12  ;;  %v905_v12 = vadd.f32 %v904_v14, %v902_v8 }
 0x278   : > { %v698_v26 = vpop.permute.xlu1 %697 }
 0x27a   : > { %1052 = vmatmul.mubr.msk.bf16.vlgmr.msra.gmra.mxu1 %vm509_vm1, %v1102_v22  ;;  %v881_v22 = vadd.f32 %v880_v15, %v1365_v21 }
 0x27b   : > { %758 = vmatprep.mubr.bf16.mxu1 %v1146_v6  ;;  %v683_v6 = vpop.permute.xlu0 %682 }
 0x27c   : > { %v688_v30 = vpop.permute.xlu1 %687  ;;  %v882_v21 = vrot.slane %v881_v22, 2 }
 0x27f   : > { %v790_v61 = vpop.permute.xlu0 %789 }
 0x282   : > { %1053 = vmatmul.mubr.msk.bf16.gmra.mxu1 %vm509_vm1, %v1103_v23  ;;  %v795_v23 = vpop.permute.xlu1 %794 }
 0x33a   : > { %v750_v24 = vpop.f32.mrf.mxu1 }
 0x33b   : > { %v751_v44 = vadd.f32 %v750_v24, %v683_v6 }
 0x33c   : > { %v752_v25 = vpop.f32.mrf.mxu1 }
 0x33d   : > { %v753_v37 = vadd.f32 %v752_v25, %v683_v6  ;;  %v769_v52 = vmax.f32 %v751_v44, 0.0 }
 0x33e   : > { %v754_v54 = vpop.f32.mrf.mxu1 }
 0x33f   : > { %v755_v39 = vadd.f32 %v754_v54, %v688_v30  ;;  %v770_v47 = vmax.f32 %v753_v37, 0.0 }
 0x340   : > { %v756_v27 = vpop.f32.mrf.mxu1 }
 0x341   : > { %v757_v32 = vadd.f32 %v756_v27, %v688_v30  ;;  %v771_v58 = vmax.f32 %v755_v39, 0.0 }
 0x342   : > { %v760_v28 = vpop.f32.mrf.mxu1 }
 0x343   : > { %v761_v35 = vadd.f32 %v760_v28, %v693_v53  ;;  %v772_v41 = vmax.f32 %v757_v32, 0.0  ;;  %v777_v59 = vpack.c.bf16 %v771_v58, %v769_v52  ;;  %v876_v28 = vrot.slane %v875_v18, 2 }
 0x344   : > { %v762_v29 = vpop.f32.mrf.mxu1  ;;  %v906_v32 = vrot.slane %v905_v12, 2 }
 0x345   : > { %v763_v33 = vadd.f32 %v762_v29, %v693_v53  ;;  %v773_v45 = vmax.f32 %v761_v35, 0.0  ;;  %v778_v49 = vpack.c.bf16 %v772_v41, %v770_v47  ;;  %v911_v29 = vadd.f32 %v910_v19, %v903_v10 }
 0x346   : > { %v764_v31 = vpop.f32.mrf.mxu1  ;;  %v877_v35 = vadd.f32 %v876_v28, %v875_v18  ;;  %v907_v39 = vadd.f32 %v906_v32, %v905_v12 }
 0x347   : > { %v765_v34 = vadd.f32 %v764_v31, %v698_v26  ;;  %v774_v42 = vmax.f32 %v763_v33, 0.0 }
 0x348   : > { %v766_v36 = vpop.f32.mrf.mxu1  ;;  %v908_v52 = vrot.slane %v907_v39, 1 }
 0x349   : > { %v767_v38 = vadd.f32 %v766_v36, %v698_v26  ;;  %v775_v40 = vmax.f32 %v765_v34, 0.0  ;;  %v912_v36 = vrot.slane %v911_v29, 2 }
 0x34a   : > { %v909_v8 = vadd.f32 %v908_v52, %v907_v39 }
 0x34b   : > { %v776_v43 = vmax.f32 %v767_v38, 0.0  ;;  %v779_v46 = vpack.c.bf16 %v775_v40, %v773_v45  ;;  %v883_v40 = vadd.f32 %v882_v21, %v881_v22  ;;  %v878_v45 = vrot.slane %v877_v35, 1 }
 0x34c   : > { %v913_v47 = vadd.f32 %v912_v36, %v911_v29 }
 0x34d   : > { %v780_v48 = vpack.c.bf16 %v776_v43, %v774_v42 }
 0x34f   : > { %817 = vmatprep.subr.bf16.mxu0 %v780_v48 }
 0x350   : > { %818 = vmatpush1.bf16.msra.mxu0 %v779_v46 }
 0x351   : > { %819 = vmatprep.subr.bf16.mxu0 %v778_v49 }
 0x354   : > { %820 = vmatpush1.bf16.msra.mxu0 %v777_v59  ;;  %v884_v59 = vrot.slane %v883_v40, 1 }
 0x356   : > { %v885_v9 = vadd.f32 %v884_v59, %v883_v40 }
 0x357   : > { %1059 = vmatmul.mubr.msk.bf16.vlgmr.msra.gmra.mxu0 %vm607_vm2, %v1104_v60 }
 0x417   : > { %v839_v62 = vpop.f32.mrf.mxu0 }
 0x418   : > { %v840_v0 = vadd.f32 %v839_v62, %v790_v61 }
 0x419   : > { %v841_v13 = vpop.f32.mrf.mxu0 }
 0x41a   : > { %1113 = vtanh.f32 %v840_v0  ;;  %v842_v17 = vadd.f32 %v841_v13, %v790_v61 }
 0x41b   : > { %v843_v16 = vpop.f32.mrf.mxu0 }
 0x41c   : > { %1115 = vtanh.f32 %v842_v17  ;;  %v844_v54 = vadd.f32 %v843_v16, %v795_v23 }
 0x41d   : > { %v845_v25 = vpop.f32.mrf.mxu0 }
 0x41e   : > { %v846_v20 = vadd.f32 %v845_v25, %v795_v23 }
 0x427   : > { %v1114_v2 = vpop.eup %1113 }
 0x428   : > { %v850_v3 = vmul.f32 1.9, %v1114_v2  ;;  %v879_v2 = vadd.f32 %v878_v45, %v877_v35 }
 0x429   : > { %v1116_v4 = vpop.eup %1115 }
 0x42a   : > { %v852_v5 = vmul.f32 1.442695, %v850_v3  ;;  %v851_v55 = vmul.f32 1.9, %v1116_v4  ;;  %v860_v53 = vadd.f32 %v850_v3, %v1355_v63  ;;  %v914_v3 = vrot.slane %v913_v47, 1 }
 0x42c   : > { %1117 = vpow2.f32 %v852_v5  ;;  %v854_v7 = vmul.f32 1.442695, %v851_v55  ;;  %v861_v24 = vadd.f32 %v851_v55, %v1358_v1  ;;  %v918_v33 = vrot.slane %v860_v53, 4 }
 0x42e   : > { %1119 = vpow2.f32 %v854_v7  ;;  %v924_v34 = vrot.slane %v861_v24, 4  ;;  %v919_v41 = vadd.f32 %v918_v33, %v860_v53 }
 0x430   : > { %v925_v42 = vadd.f32 %v924_v34, %v861_v24  ;;  %v920_v60 = vrot.slane %v919_v41, 2 }
 0x432   : > { %v926_v61 = vrot.slane %v925_v42, 2  ;;  %v921_v10 = vadd.f32 %v920_v60, %v919_v41 }
 0x434   : > { %v927_v14 = vadd.f32 %v926_v61, %v925_v42  ;;  %v922_v53 = vrot.slane %v921_v10, 1 }
 0x436   : > { %v928_v24 = vrot.slane %v927_v14, 1 }
 0x439   : > { %v1118_v11 = vpop.eup %1117 }
 0x43a   : > { %v856_v26 = vmul.f32 %v1118_v11, %v459_v57  ;;  %v915_v11 = vadd.f32 %v914_v3, %v913_v47 }
 0x43b   : > { %v1120_v27 = vpop.eup %1119 }
 0x43c   : > { %v858_v30 = vadd.f32 %v856_v26, %v844_v54  ;;  %v857_v31 = vmul.f32 %v1120_v27, %v460_v56 }
 0x43e   : > { %v862_v63 = vrot.slane %v858_v30, 4  ;;  %v888_v6 = vmul.f32 %v858_v30, %v858_v30  ;;  %v859_v1 = vadd.f32 %v857_v31, %v846_v20  ;;  %v929_v20 = vadd.f32 %v928_v24, %v927_v14 }
 0x440   : > { %v863_v37 = vadd.f32 %v862_v63, %v858_v30  ;;  %v890_v51 = vrot.slane %v888_v6, 4  ;;  %v868_v57 = vrot.slane %v859_v1, 4  ;;  %v889_v38 = vmul.f32 %v859_v1, %v859_v1 }
 0x441   : > { %v923_v30 = vadd.f32 %v922_v53, %v921_v10 }
 0x442   : > { %v864_v43 = vrot.slane %v863_v37, 2  ;;  %v891_v50 = vadd.f32 %v890_v51, %v888_v6  ;;  %v869_v56 = vadd.f32 %v868_v57, %v859_v1  ;;  %v896_v44 = vrot.slane %v889_v38, 4 }
 0x444   : > { %v865_v48 = vadd.f32 %v864_v43, %v863_v37  ;;  %v892_v58 = vrot.slane %v891_v50, 2  ;;  %v870_v46 = vrot.slane %v869_v56, 2  ;;  %v897_v49 = vadd.f32 %v896_v44, %v889_v38 }
 0x446   : > { %v866_v62 = vrot.slane %v865_v48, 1  ;;  %v893_v0 = vadd.f32 %v892_v58, %v891_v50  ;;  %v871_v13 = vadd.f32 %v870_v46, %v869_v56  ;;  %v898_v17 = vrot.slane %v897_v49, 2 }
 0x448   : > { %v867_v4 = vadd.f32 %v866_v62, %v865_v48  ;;  %v894_v5 = vrot.slane %v893_v0, 1  ;;  %v872_v55 = vrot.slane %v871_v13, 1  ;;  %v899_v7 = vadd.f32 %v898_v17, %v897_v49 }
 0x44a   : > { %v886_v15 = vadd.f32 %v879_v2, %v867_v4  ;;  %v895_v16 = vadd.f32 %v894_v5, %v893_v0  ;;  %v873_v18 = vadd.f32 %v872_v55, %v871_v13  ;;  %v900_v19 = vrot.slane %v899_v7, 1 }
 0x44c   : > { %v916_v12 = vadd.f32 %v909_v8, %v895_v16  ;;  %v887_v22 = vadd.f32 %v885_v9, %v873_v18  ;;  %v901_v23 = vadd.f32 %v900_v19, %v899_v7  ;;  %v930_v25 = vmul.f32 0.0625, %v886_v15 }
 0x44e   : > { %v932_v54 = vmul.f32 0.5, %v916_v12  ;;  %v917_v26 = vadd.f32 %v915_v11, %v901_v23  ;;  %v931_v28 = vmul.f32 0.0625, %v887_v22 }
 0x450   : > { %v935_v27 = vsel %vm934_vm3, %v930_v25, %v932_v54  ;;  %v933_v29 = vmul.f32 0.5, %v917_v26 }
 0x451   : > { %v938_v32 = vsel %vm937_vm4, %v935_v27, %v923_v30 }
 0x452   : > { %v936_v31 = vsel %vm934_vm3, %v931_v28, %v933_v29 }
 0x453   : > { %v939_v21 = vsel %vm937_vm4, %v936_v31, %v929_v20 }
 0x454   : > { %v942_v33 = vcombine.low %v938_v32, %v939_v21 }
 0x456   : > { %944 = vst [vmem:[%s354_s21] sm:$0x77] %v942_v33 }
 0x457 PF: > { %p15_p9 = scmp.ge.s32.totalorder %s1210_s9, 4   ;;  %s1422_s27 = smov %s1139_s28 }
 0x458   : > { %s1423_s28 = smov %s1219_s12  ;;  %s1424_s29 = smov %s1210_s9 }
 0x459   :  { %17 = sbr.rel (!%p15_p9) target bundleno = 2 (0x2), region = 119 }

// kernel: tile.24
= control target key start
LH: loop header
LB: loop body
LE: loop exit
PB: predicated region body
PF: predicated region fallthrough
CT: control target
= control target key end

     0   :  { %vm4_vm0 = vcmask 1047556   ;;  %s209_s14 = smov 96   ;;  %s210_s19 = smov 112   ;;  %vm6_vm1 = vcmask 130048   ;;  %vm25_vm2 = vcmask 1048448   ;;  %vm46_vm3 = vcmask 917248   ;;  %s388_s0 = inlined_call_operand.vmem [shape: f32[16,8,16], index: 0, kind: input, shape index: {}]   ;;  %s389_s1 = inlined_call_operand.vmem [shape: f32[16,128], index: 1, kind: output, shape index: {}]  }
   0x1   :  { %v172_v0 = vld [vmem:[%s388_s0 + $0x6] ss:$8 sm:$0xf]   ;;  %v167_v3 = vld [vmem:[%s388_s0 + $0x7] ss:$8 sm:$0xf]  }
   0x2   :  { %v173_v1 = vld [vmem:[%s388_s0 + $0x6] ss:$8 sm:$0xf0]   ;;  %v168_v4 = vld [vmem:[%s388_s0 + $0x7] ss:$8 sm:$0xf0]  }
   0x3   :  { %v43_v2 = vsel %vm4_vm0, %v173_v1, %v172_v0  ;;  %v22_v5 = vsel %vm4_vm0, %v168_v4, %v167_v3  ;;  %v174_v6 = vld [vmem:[%s388_s0 + $0x46] ss:$8 sm:$0xf]   ;;  %v169_v9 = vld [vmem:[%s388_s0 + $0x47] ss:$8 sm:$0xf]  }
   0x4   :  { %44 = vrot.lane.b32.xlu1 %v43_v2, %s209_s14  ;;  %v175_v7 = vld [vmem:[%s388_s0 + $0x46] ss:$8 sm:$0xf0]   ;;  %23 = vrot.lane.b32.xlu0 %v22_v5, %s210_s19  ;;  %v170_v10 = vld [vmem:[%s388_s0 + $0x47] ss:$8 sm:$0xf0]  }
   0x5   :  { %v53_v8 = vsel %vm4_vm0, %v175_v7, %v174_v6  ;;  %v32_v11 = vsel %vm4_vm0, %v170_v10, %v169_v9  ;;  %v179_v12 = vld [vmem:[%s388_s0 + $0x45] ss:$8 sm:$0xf]   ;;  %v184_v18 = vld [vmem:[%s388_s0 + $0x44] ss:$8 sm:$0xf]  }
   0x6   :  { %v180_v13 = vld [vmem:[%s388_s0 + $0x45] ss:$8 sm:$0xf0]   ;;  %v185_v19 = vld [vmem:[%s388_s0 + $0x44] ss:$8 sm:$0xf0]  }
   0x7   :  { %v177_v14 = vld [vmem:[%s388_s0 + $0x5] ss:$8 sm:$0xf]   ;;  %v74_v16 = vsel %vm4_vm0, %v180_v13, %v179_v12  ;;  %v182_v20 = vld [vmem:[%s388_s0 + $0x4] ss:$8 sm:$0xf]   ;;  %v95_v22 = vsel %vm4_vm0, %v185_v19, %v184_v18 }
   0x8   :  { %54 = vrot.lane.b32.xlu1 %v53_v8, %s209_s14  ;;  %v178_v15 = vld [vmem:[%s388_s0 + $0x5] ss:$8 sm:$0xf0]   ;;  %33 = vrot.lane.b32.xlu0 %v32_v11, %s210_s19  ;;  %v183_v21 = vld [vmem:[%s388_s0 + $0x4] ss:$8 sm:$0xf0]  }
   0x9   :  { %v64_v17 = vsel %vm4_vm0, %v178_v15, %v177_v14  ;;  %s211_s11 = smov 80   ;;  %v85_v23 = vsel %vm4_vm0, %v183_v21, %v182_v20  ;;  %v189_v24 = vld [vmem:[%s388_s0 + $0x43] ss:$8 sm:$0xf]   ;;  %s212_s20 = smov 64   ;;  %vm67_vm4 = vcmask 786048  }
   0xa   :  { %v190_v25 = vld [vmem:[%s388_s0 + $0x43] ss:$8 sm:$0xf0]   ;;  %v194_v28 = vld [vmem:[%s388_s0 + $0x42] ss:$8 sm:$0xf]  }
   0xb   :  { %v187_v26 = vld [vmem:[%s388_s0 + $0x3] ss:$8 sm:$0xf]   ;;  %v195_v29 = vld [vmem:[%s388_s0 + $0x42] ss:$8 sm:$0xf0]   ;;  %v116_v30 = vsel %vm4_vm0, %v190_v25, %v189_v24 }
   0xc   :  { %75 = vrot.lane.b32.xlu1 %v74_v16, %s211_s11  ;;  %65 = vrot.lane.b32.xlu0 %v64_v17, %s211_s11  ;;  %v188_v27 = vld [vmem:[%s388_s0 + $0x3] ss:$8 sm:$0xf0]   ;;  %v192_v31 = vld [vmem:[%s388_s0 + $0x2] ss:$8 sm:$0xf]   ;;  %v137_v40 = vsel %vm4_vm0, %v195_v29, %v194_v28 }
   0xd   :  { %v2_v32 = vld [vmem:[%s388_s0] ss:$8 sm:$0xf]   ;;  %v106_v33 = vsel %vm4_vm0, %v188_v27, %v187_v26  ;;  %v193_v36 = vld [vmem:[%s388_s0 + $0x2] ss:$8 sm:$0xf0]  }
   0xe   :  { %v3_v34 = vld [vmem:[%s388_s0] ss:$8 sm:$0xf0]   ;;  %s213_s8 = smov 48   ;;  %v127_v41 = vsel %vm4_vm0, %v193_v36, %v192_v31  ;;  %s215_s21 = smov 16   ;;  %vm88_vm5 = vcmask 654848  }
   0xf   :  { %v164_v35 = vld [vmem:[%s388_s0 + $0x40] ss:$8 sm:$0xf]   ;;  %v5_v37 = vsel %vm4_vm0, %v3_v34, %v2_v32  ;;  %v199_v42 = vld [vmem:[%s388_s0 + $0x41] ss:$8 sm:$0xf]  }
  0x10   :  { %96 = vrot.lane.b32.xlu1 %v95_v22, %s212_s20  ;;  %86 = vrot.lane.b32.xlu0 %v85_v23, %s212_s20  ;;  %v165_v38 = vld [vmem:[%s388_s0 + $0x40] ss:$8 sm:$0xf0]   ;;  %7 = vst.msk [vmem:[%s389_s1] sm:$0xff] %vm6_vm1, %v5_v37   ;;  %vm109_vm6 = vcmask 523648   ;;  %vm130_vm7 = vcmask 392448  }
  0x11   :  { %v13_v39 = vsel %vm4_vm0, %v165_v38, %v164_v35  ;;  %v200_v43 = vld [vmem:[%s388_s0 + $0x41] ss:$8 sm:$0xf0]   ;;  %vm151_vm8 = vcmask 261248  }
  0x12   :  { %166 = vst.msk [vmem:[%s389_s1 + $0x8] sm:$0xff] %vm6_vm1, %v13_v39   ;;  %v197_v44 = vld [vmem:[%s388_s0 + $0x1] ss:$8 sm:$0xf]   ;;  %v158_v46 = vsel %vm4_vm0, %v200_v43, %v199_v42 }
  0x13   :  { %v198_v45 = vld [vmem:[%s388_s0 + $0x1] ss:$8 sm:$0xf0]   ;;  %s214_s0 = smov 32  }
  0x14   :  { %117 = vrot.lane.b32.xlu1 %v116_v30, %s213_s8  ;;  %107 = vrot.lane.b32.xlu0 %v106_v33, %s213_s8  ;;  %v148_v47 = vsel %vm4_vm0, %v198_v45, %v197_v44 }
  0x18   :  { %138 = vrot.lane.b32.xlu1 %v137_v40, %s214_s0  ;;  %128 = vrot.lane.b32.xlu0 %v127_v41, %s214_s0 }
  0x1c   :  { %159 = vrot.lane.b32.xlu1 %v158_v46, %s215_s21  ;;  %149 = vrot.lane.b32.xlu0 %v148_v47, %s215_s21 }
  0x76   :  { %v45_v48 = vpop.permute.xlu1 %44   ;;  %v24_v49 = vpop.permute.xlu0 %23  }
  0x77   :  { %26 = vst.msk [vmem:[%s389_s1] sm:$0xff] %vm25_vm2, %v24_v49  }
  0x78   :  { %47 = vst.msk [vmem:[%s389_s1] sm:$0xff] %vm46_vm3, %v45_v48  }
  0x7a   :  { %v55_v50 = vpop.permute.xlu1 %54   ;;  %v34_v51 = vpop.permute.xlu0 %33  }
  0x7b   :  { %171 = vst.msk [vmem:[%s389_s1 + $0x8] sm:$0xff] %vm25_vm2, %v34_v51  }
  0x7c   :  { %176 = vst.msk [vmem:[%s389_s1 + $0x8] sm:$0xff] %vm46_vm3, %v55_v50  }
  0x7e   :  { %v76_v52 = vpop.permute.xlu1 %75   ;;  %v66_v53 = vpop.permute.xlu0 %65  }
  0x7f   :  { %181 = vst.msk [vmem:[%s389_s1 + $0x8] sm:$0xff] %vm67_vm4, %v76_v52   ;;  %68 = vst.msk [vmem:[%s389_s1] sm:$0xff] %vm67_vm4, %v66_v53  }
  0x82   :  { %v97_v54 = vpop.permute.xlu1 %96   ;;  %v87_v55 = vpop.permute.xlu0 %86  }
  0x83   :  { %186 = vst.msk [vmem:[%s389_s1 + $0x8] sm:$0xff] %vm88_vm5, %v97_v54   ;;  %89 = vst.msk [vmem:[%s389_s1] sm:$0xff] %vm88_vm5, %v87_v55  }
  0x86   :  { %v118_v56 = vpop.permute.xlu1 %117   ;;  %v108_v57 = vpop.permute.xlu0 %107  }
  0x87   :  { %191 = vst.msk [vmem:[%s389_s1 + $0x8] sm:$0xff] %vm109_vm6, %v118_v56   ;;  %110 = vst.msk [vmem:[%s389_s1] sm:$0xff] %vm109_vm6, %v108_v57  }
  0x8a   :  { %v139_v58 = vpop.permute.xlu1 %138   ;;  %v129_v59 = vpop.permute.xlu0 %128  }
  0x8b   :  { %196 = vst.msk [vmem:[%s389_s1 + $0x8] sm:$0xff] %vm130_vm7, %v139_v58   ;;  %131 = vst.msk [vmem:[%s389_s1] sm:$0xff] %vm130_vm7, %v129_v59  }
  0x8e   :  { %v160_v60 = vpop.permute.xlu1 %159   ;;  %v150_v61 = vpop.permute.xlu0 %149  }
  0x8f   :  { %201 = vst.msk [vmem:[%s389_s1 + $0x8] sm:$0xff] %vm151_vm8, %v160_v60   ;;  %152 = vst.msk [vmem:[%s389_s1] sm:$0xff] %vm151_vm8, %v150_v61  }

// kernel: fastflow_forward.5
= control target key start
LH: loop header
LB: loop body
LE: loop exit
PB: predicated region body
PF: predicated region fallthrough
CT: control target
= control target key end

     0   :  { %v926_v0 = vmov 1   ;;  %v927_v1 = vmov 0   ;;  %v928_v4 = vmov 2   ;;  %vm233_vm0 = vcmask 261120   ;;  %s1213_s2 = inlined_call_operand.vmem [shape: f32[32,3], index: 2, kind: input, shape index: {}]   ;;  %s1214_s3 = inlined_call_operand.vmem [shape: f32[32,1], index: 3, kind: input, shape index: {}]   ;;  %s1215_s1 = inlined_call_operand.vmem [shape: f32[16,128], index: 1, kind: input, shape index: {}]   ;;  %s1216_s5 = inlined_call_operand.vmem [shape: f32[2,64,1], index: 5, kind: input, shape index: {}]   ;;  %s1217_s4 = inlined_call_operand.vmem [shape: bf16[2,64,32], index: 4, kind: input, shape index: {}]   ;;  %s1218_s7 = inlined_call_operand.vmem [shape: f32[2,32,1], index: 7, kind: input, shape index: {}]   ;;  %s1219_s0 = inlined_call_operand.vmem [shape: f32[3,128], index: 0, kind: input, shape index: {}]   ;;  %s1220_s6 = inlined_call_operand.vmem [shape: bf16[2,32,64], index: 6, kind: input, shape index: {}]   ;;  %s1221_s8 = inlined_call_operand.vmem [shape: f32[3,128], index: 8, kind: output, shape index: {}]  }
   0x1   :  { %887 = vset.pattern.permute.xlu1 %v926_v0  ;;  %886 = vset.pattern.permute.xlu0 %v927_v1  ;;  %v30_v2 = vld [vmem:[%s1213_s2] sm:$0xff]  ;;  %v31_v3 = vld [vmem:[%s1213_s2 + $0x8] sm:$0xff]  ;;  %v171_v10 = vld [vmem:[%s1216_s5 + $0x30] sm:$0xff]  ;;  %vm361_vm1 = vcmask 523264   ;;  %vm751_vm2 = vcmask 1040384   ;;  %vm753_vm3 = vcmask 1041408  }
   0x2   :  { %65 = vperm.xlu1 %887, %v30_v2   ;;  %37 = vperm.xlu0 %886, %v30_v2   ;;  %v153_v5 = vld [vmem:[%s1215_s1] sm:$0xff]  ;;  %v154_v6 = vld [vmem:[%s1215_s1 + $0x8] sm:$0xff]  ;;  %v172_v12 = vld [vmem:[%s1216_s5 + $0x38] sm:$0xff] }
   0x3   :  { %v987_v7 = vpack.c.bf16 %v154_v6, %v153_v5  ;;  %v121_v8 = vld [vmem:[%s1214_s3] sm:$0xff]  ;;  %v122_v9 = vld [vmem:[%s1214_s3 + $0x8] sm:$0xff]  ;;  %v167_v14 = vld [vmem:[%s1216_s5 + $0x10] sm:$0xff] }
   0x4   :  { %v169_v11 = vld [vmem:[%s1216_s5 + $0x20] sm:$0xff]  ;;  %v170_v15 = vld [vmem:[%s1216_s5 + $0x28] sm:$0xff]  ;;  %v168_v17 = vld [vmem:[%s1216_s5 + $0x18] sm:$0xff] }
   0x5   :  { %835 = vmatprep.subr.bf16.mxu0 %v987_v7  ;;  %v898_v13 = vld [vmem:[%s1217_s4] sm:$0xff]   ;;  %v166_v19 = vld [vmem:[%s1216_s5 + $0x8] sm:$0xff]  ;;  %v32_v20 = vld [vmem:[%s1213_s2 + $0x10] sm:$0xff] }
   0x6   :  { %69 = vperm.xlu1 %887, %v31_v3   ;;  %42 = vperm.xlu0 %886, %v31_v3   ;;  %v165_v16 = vld [vmem:[%s1216_s5] sm:$0xff]  ;;  %v328_v21 = vld [vmem:[%s1218_s7 + $0x8] sm:$0xff]  ;;  %v33_v22 = vld [vmem:[%s1213_s2 + $0x18] sm:$0xff] }
   0x7   :  { %836 = vmatpush3.bf16.msra.mxu0 %v987_v7  ;;  %839 = vmatprep.mubr.msk.bf16.mxu0 %vm233_vm0, %v898_v13  ;;  %v327_v18 = vld [vmem:[%s1218_s7] sm:$0xff]  ;;  %v123_v23 = vld [vmem:[%s1214_s3 + $0x10] sm:$0xff]  ;;  %v124_v24 = vld [vmem:[%s1214_s3 + $0x18] sm:$0xff] }
   0x8   :  { %v761_v27 = vld [vmem:[%s1219_s0 + $0x1] ss:$0 sm:$0xff]  ;;  %v760_v28 = vld [vmem:[%s1219_s0] ss:$0 sm:$0xff]  ;;  %v762_v35 = vld [vmem:[%s1219_s0 + $0x2] ss:$0 sm:$0xff] }
   0x9   :  { %v899_v53 = vld [vmem:[%s1217_s4 + $0x8] sm:$0xff]   ;;  %v900_v56 = vld [vmem:[%s1217_s4 + $0x10] sm:$0xff]   ;;  %v901_v59 = vld [vmem:[%s1217_s4 + $0x18] sm:$0xff]  }
   0xa   :  { %889 = vset.pattern.permute.xlu1 %v928_v4  ;;  %888 = vset.pattern.permute.xlu0 %v928_v4 }
   0xb   :  { %98 = vperm.xlu1 %889, %v31_v3   ;;  %94 = vperm.xlu0 %888, %v30_v2  }
   0xf   :  { %890 = vset.pattern.permute.xlu1 %v927_v1  ;;  %891 = vset.pattern.permute.xlu0 %v927_v1 }
  0x10   :  { %127 = vperm.xlu1 %890, %v121_v8   ;;  %132 = vperm.xlu0 %891, %v122_v9  }
  0x14   :  { %205 = vperm.xlu1 %890, %v171_v10   ;;  %195 = vperm.xlu0 %891, %v169_v11  }
  0x18   :  { %210 = vperm.xlu1 %890, %v172_v12   ;;  %185 = vperm.xlu0 %891, %v167_v14  }
  0x1c   :  { %200 = vperm.xlu1 %890, %v170_v15   ;;  %175 = vperm.xlu0 %891, %v165_v16   ;;  %v902_v16 = vld [vmem:[%s1220_s6] sm:$0xff]  }
  0x1d   :  { %855 = vmatprep.mubr.msk.bf16.mxu1 %vm361_vm1, %v902_v16 }
  0x20   :  { %190 = vperm.xlu1 %890, %v168_v17   ;;  %333 = vperm.xlu0 %891, %v327_v18   ;;  %v329_v17 = vld [vmem:[%s1218_s7 + $0x10] sm:$0xff]  ;;  %v330_v18 = vld [vmem:[%s1218_s7 + $0x18] sm:$0xff] }
  0x24   :  { %180 = vperm.xlu1 %890, %v166_v19   ;;  %47 = vperm.xlu0 %891, %v32_v20   ;;  %v789_v19 = vld [vmem:[%s1216_s5 + $0x70] sm:$0xff] }
  0x28   :  { %338 = vperm.xlu1 %890, %v328_v21   ;;  %892 = vset.pattern.permute.xlu0 %v926_v0  ;;  %v787_v21 = vld [vmem:[%s1216_s5 + $0x60] sm:$0xff] }
  0x29   :  { %73 = vperm.xlu0 %892, %v32_v20  }
  0x2c   :  { %52 = vperm.xlu1 %890, %v33_v22  }
  0x2d   :  { %895 = vset.pattern.permute.xlu0 %v928_v4 }
  0x2e   :  { %106 = vperm.xlu0 %895, %v33_v22  }
  0x30   :  { %893 = vset.pattern.permute.xlu1 %v926_v0 }
  0x31   :  { %77 = vperm.xlu1 %893, %v33_v22   ;;  %v788_v22 = vld [vmem:[%s1216_s5 + $0x68] sm:$0xff] }
  0x32   :  { %897 = vset.pattern.permute.xlu0 %v927_v1 }
  0x33   :  { %343 = vperm.xlu0 %897, %v329_v17  }
  0x35   :  { %894 = vset.pattern.permute.xlu1 %v928_v4 }
  0x36   :  { %102 = vperm.xlu1 %894, %v32_v20   ;;  %v790_v20 = vld [vmem:[%s1216_s5 + $0x78] sm:$0xff] }
  0x37   :  { %487 = vperm.xlu0 %897, %v790_v20  }
  0x3a   :  { %896 = vset.pattern.permute.xlu1 %v927_v1 }
  0x3b   :  { %137 = vperm.xlu1 %896, %v123_v23   ;;  %477 = vperm.xlu0 %897, %v788_v22   ;;  %v785_v23 = vld [vmem:[%s1216_s5 + $0x50] sm:$0xff] }
  0x3f   :  { %142 = vperm.xlu1 %896, %v124_v24   ;;  %v786_v24 = vld [vmem:[%s1216_s5 + $0x58] sm:$0xff] }
  0x40   :  { %467 = vperm.xlu0 %897, %v786_v24  }
  0x43   :  { %348 = vperm.xlu1 %896, %v330_v18  }
  0x47   :  { %482 = vperm.xlu1 %896, %v789_v19  }
  0x4b   :  { %472 = vperm.xlu1 %896, %v787_v21  }
  0x4f   :  { %462 = vperm.xlu1 %896, %v785_v23  }
  0x7d   :  { %v66_v25 = vpop.permute.xlu1 %65  ;;  %v38_v26 = vpop.permute.xlu0 %37 }
  0x7e   :  { %v84_v31 = vmul.f32 %v761_v27, %v66_v25  ;;  %v59_v32 = vmul.f32 %v760_v28, %v38_v26  ;;  %v783_v25 = vld [vmem:[%s1216_s5 + $0x40] sm:$0xff]  ;;  %v784_v26 = vld [vmem:[%s1216_s5 + $0x48] sm:$0xff] }
  0x7f   :  { %452 = vperm.xlu1 %896, %v783_v25   ;;  %457 = vperm.xlu0 %897, %v784_v26  }
  0x80   :  { %v88_v38 = vadd.f32 %v84_v31, %v59_v32 }
  0x81   :  { %v70_v29 = vpop.permute.xlu1 %69  ;;  %v43_v30 = vpop.permute.xlu0 %42 }
  0x82   :  { %v85_v33 = vmul.f32 %v761_v27, %v70_v29  ;;  %v60_v34 = vmul.f32 %v760_v28, %v43_v30  ;;  %v805_v29 = vld [vmem:[%s1218_s7 + $0x30] sm:$0xff]  ;;  %v806_v30 = vld [vmem:[%s1218_s7 + $0x38] sm:$0xff] }
  0x84   :  { %v89_v39 = vadd.f32 %v85_v33, %v60_v34 }
  0x86   :  { %v99_v36 = vpop.permute.xlu1 %98  ;;  %v95_v37 = vpop.permute.xlu0 %94 }
  0x87   :  { %v114_v40 = vmul.f32 %v762_v35, %v99_v36  ;;  %v113_v41 = vmul.f32 %v762_v35, %v95_v37 }
  0x89   :  { %v117_v42 = vadd.f32 %v113_v41, %v88_v38  ;;  %v118_v43 = vadd.f32 %v114_v40, %v89_v39 }
  0x8b   :  { %v128_v44 = vpop.permute.xlu1 %127  ;;  %v133_v45 = vpop.permute.xlu0 %132 }
  0x8c   :  { %v1056_v46 = vadd.f32 %v128_v44, %v117_v42  ;;  %v1058_v47 = vadd.f32 %v133_v45, %v118_v43 }
  0x8e   :  { %v149_v48 = vmax.f32 %v1056_v46, 0.0  ;;  %v150_v49 = vmax.f32 %v1058_v47, 0.0 }
  0x8f   :  { %v1062_v50 = vpop.permute.xlu1 %205  ;;  %v1064_v51 = vpop.permute.xlu0 %195 }
  0x90   :  { %v155_v52 = vpack.c.bf16 %v150_v49, %v149_v48 }
  0x92   :  { %837 = vmatprep.subr.bf16.mxu0 %v155_v52 }
  0x93   :  { %v1073_v54 = vpop.permute.xlu1 %210  ;;  %v1075_v55 = vpop.permute.xlu0 %185  ;;  %838 = vmatpush3.bf16.msra.mxu0 %v155_v52 }
  0x94   :  { %859 = vmatprep.subr.bf16.mxu0 %v987_v7 }
  0x96   :  { %840 = vmatmul.mubr.msk.bf16.vlgmr.msra.gmra.mxu0 %vm233_vm0, %v899_v53 }
  0x97   :  { %v1082_v57 = vpop.permute.xlu1 %200  ;;  %v1084_v58 = vpop.permute.xlu0 %175  ;;  %843 = vmatprep.mubr.msk.bf16.mxu0 %vm233_vm0, %v900_v56  ;;  %860 = vmatpush3.bf16.msra.mxu0 %v987_v7 }
  0x9b   :  { %v1091_v60 = vpop.permute.xlu1 %190  ;;  %v1093_v61 = vpop.permute.xlu0 %333 }
  0x9e   :  { %844 = vmatmul.mubr.msk.bf16.gmra.mxu0 %vm233_vm0, %v901_v59 }
  0x9f   :  { %v1096_v62 = vpop.permute.xlu1 %180  ;;  %v48_v63 = vpop.permute.xlu0 %47 }
  0xa0   :  { %v61_v2 = vmul.f32 %v760_v28, %v48_v63 }
  0xa3   :  { %v1098_v0 = vpop.permute.xlu1 %338 }
  0xa4   :  { %v74_v1 = vpop.permute.xlu0 %73 }
  0xa5   :  { %v86_v3 = vmul.f32 %v761_v27, %v74_v1 }
  0xa7   :  { %v90_v4 = vadd.f32 %v86_v3, %v61_v2  ;;  %v53_v5 = vpop.permute.xlu1 %52 }
  0xa8   :  { %v62_v8 = vmul.f32 %v760_v28, %v53_v5  ;;  %v804_v28 = vld [vmem:[%s1218_s7 + $0x28] sm:$0xff] }
  0xa9   :  { %v107_v6 = vpop.permute.xlu0 %106  ;;  %616 = vperm.xlu0 %897, %v804_v28  }
  0xaa   :  { %v116_v10 = vmul.f32 %v762_v35, %v107_v6 }
  0xac   :  { %v78_v7 = vpop.permute.xlu1 %77 }
  0xad   :  { %v87_v9 = vmul.f32 %v761_v27, %v78_v7  ;;  %v803_v27 = vld [vmem:[%s1218_s7 + $0x20] sm:$0xff]  ;;  %626 = vperm.xlu0 %897, %v806_v30  }
  0xae   :  { %611 = vperm.xlu1 %896, %v803_v27   ;;  %v344_v21 = vpop.permute.xlu0 %343 }
  0xaf   :  { %v91_v11 = vadd.f32 %v87_v9, %v62_v8 }
  0xb1   :  { %v103_v12 = vpop.permute.xlu1 %102  ;;  %v1100_v13 = vadd.f32 %v116_v10, %v91_v11 }
  0xb2   :  { %v115_v14 = vmul.f32 %v762_v35, %v103_v12  ;;  %621 = vperm.xlu1 %896, %v805_v29  }
  0xb4   :  { %v1102_v15 = vadd.f32 %v115_v14, %v90_v4 }
  0xb6   :  { %v138_v17 = vpop.permute.xlu1 %137 }
  0xba   :  { %v143_v18 = vpop.permute.xlu1 %142 }
  0xbe   :  { %v349_v23 = vpop.permute.xlu1 %348 }
 0x156   :  { %v841_v31 = vpop.f32.mrf.mxu0 }
 0x157   :  { %v289_v52 = vadd.f32 %v841_v31, %v1075_v55  ;;  %v903_v55 = vld [vmem:[%s1220_s6 + $0x8] sm:$0xff]  }
 0x158   :  { %v280_v32 = vpop.f32.mrf.mxu0 }
 0x15a   :  { %v842_v33 = vpop.f32.mrf.mxu0 }
 0x15b   :  { %v292_v42 = vadd.f32 %v842_v33, %v1091_v60 }
 0x15c   :  { %v283_v34 = vpop.f32.mrf.mxu0 }
 0x15d   :  { %v314_v63 = vmax.f32 %v292_v42, 0.0 }
 0x15e   :  { %v845_v35 = vpop.f32.mrf.mxu0 }
 0x15f   :  { %v305_v37 = vadd.f32 %v845_v35, %v1062_v50  ;;  %v284_v50 = vadd.f32 %v283_v34, %v1096_v62  ;;  %v906_v35 = vld [vmem:[%s1217_s4 + $0x30] sm:$0xff]  }
 0x160   :  { %v296_v36 = vpop.f32.mrf.mxu0 }
 0x161   :  { %v297_v39 = vadd.f32 %v296_v36, %v1064_v51  ;;  %v317_v43 = vmax.f32 %v305_v37, 0.0  ;;  %v313_v51 = vmax.f32 %v289_v52, 0.0  ;;  %v312_v2 = vmax.f32 %v284_v50, 0.0  ;;  %v907_v36 = vld [vmem:[%s1217_s4 + $0x38] sm:$0xff]   ;;  %v908_v37 = vld [vmem:[%s1220_s6 + $0x10] sm:$0xff]  }
 0x162   :  { %v846_v38 = vpop.f32.mrf.mxu0 }
 0x163   :  { %v308_v40 = vadd.f32 %v846_v38, %v1073_v54  ;;  %v315_v53 = vmax.f32 %v297_v39, 0.0  ;;  %v281_v54 = vadd.f32 %v280_v32, %v1084_v58  ;;  %v320_v60 = vpack.c.bf16 %v314_v63, %v313_v51  ;;  %v904_v58 = vld [vmem:[%s1217_s4 + $0x20] sm:$0xff]   ;;  %v488_v38 = vpop.permute.xlu0 %487 }
 0x164   :  { %v299_v41 = vpop.f32.mrf.mxu0  ;;  %863 = vmatprep.mubr.msk.bf16.mxu0 %vm233_vm0, %v904_v58 }
 0x165   :  { %v318_v44 = vmax.f32 %v308_v40, 0.0  ;;  %v300_v45 = vadd.f32 %v299_v41, %v1082_v57  ;;  %v311_v3 = vmax.f32 %v281_v54, 0.0  ;;  %v483_v40 = vpop.permute.xlu1 %482 }
 0x167   :  { %v316_v56 = vmax.f32 %v300_v45, 0.0  ;;  %v322_v59 = vpack.c.bf16 %v318_v44, %v317_v43  ;;  %v319_v57 = vpack.c.bf16 %v312_v2, %v311_v3  ;;  %v478_v43 = vpop.permute.xlu0 %477 }
 0x169   :  { %v321_v1 = vpack.c.bf16 %v316_v56, %v315_v53  ;;  %847 = vmatprep.subr.bf16.mxu1 %v322_v59  ;;  %v473_v45 = vpop.permute.xlu1 %472 }
 0x16a   :  { %848 = vmatpush3.bf16.msra.mxu1 %v322_v59 }
 0x16b   :  { %849 = vmatprep.subr.bf16.mxu1 %v321_v1  ;;  %v468_v59 = vpop.permute.xlu0 %467 }
 0x16d   :  { %v463_v51 = vpop.permute.xlu1 %462 }
 0x16e   :  { %850 = vmatpush3.bf16.msra.mxu1 %v321_v1 }
 0x16f   :  { %851 = vmatprep.subr.bf16.mxu1 %v320_v60 }
 0x172   :  { %852 = vmatpush3.bf16.msra.mxu1 %v320_v60 }
 0x173   :  { %853 = vmatprep.subr.bf16.mxu1 %v319_v57 }
 0x176   :  { %854 = vmatpush3.bf16.msra.mxu1 %v319_v57 }
 0x179   :  { %856 = vmatmul.mubr.msk.bf16.vlgmr.msra.gmra.mxu1 %vm361_vm1, %v903_v55 }
 0x17a   :  { %879 = vmatprep.mubr.msk.bf16.mxu1 %vm361_vm1, %v908_v37 }
 0x239   :  { %v857_v62 = vpop.f32.mrf.mxu1 }
 0x23a   :  { %v411_v25 = vadd.f32 %v857_v62, %v344_v21 }
 0x23b   :  { %v402_v4 = vpop.f32.mrf.mxu1 }
 0x23c   :  { %v403_v5 = vadd.f32 %v402_v4, %v1093_v61  ;;  %v147_v61 = vadd.f32 %v138_v17, %v1102_v15 }
 0x23d   :  { %v858_v6 = vpop.f32.mrf.mxu1 }
 0x23e   :  { %910 = vtanh.f32 %v403_v5  ;;  %v151_v19 = vmax.f32 %v147_v61, 0.0  ;;  %v414_v27 = vadd.f32 %v858_v6, %v349_v23  ;;  %v458_v5 = vpop.permute.xlu0 %457 }
 0x23f   :  { %v405_v7 = vpop.f32.mrf.mxu1 }
 0x240   :  { %v406_v8 = vadd.f32 %v405_v7, %v1098_v0  ;;  %v148_v0 = vadd.f32 %v143_v18, %v1100_v13  ;;  %v905_v13 = vld [vmem:[%s1217_s4 + $0x28] sm:$0xff]  }
 0x242   :  { %912 = vtanh.f32 %v406_v8  ;;  %v152_v24 = vmax.f32 %v148_v0, 0.0 }
 0x24b   :  { %v911_v9 = vpop.eup %910 }
 0x24c   :  { %v1168_v10 = vmul.f32 1.9, %v911_v9  ;;  %v453_v9 = vpop.permute.xlu1 %452 }
 0x24e   :  { %v421_v11 = vmul.f32 1.442695, %v1168_v10 }
 0x24f   :  { %v913_v12 = vpop.eup %912 }
 0x250   :  { %914 = vpow2.f32 %v421_v11  ;;  %v1171_v14 = vmul.f32 1.9, %v913_v12 }
 0x252   :  { %v423_v16 = vmul.f32 1.442695, %v1171_v14 }
 0x254   :  { %916 = vpow2.f32 %v423_v16 }
 0x25d   :  { %v915_v20 = vpop.eup %914 }
 0x25e   :  { %v425_v22 = vmul.f32 %v915_v20, %v151_v19  ;;  %v909_v19 = vld [vmem:[%s1220_s6 + $0x18] sm:$0xff]   ;;  %v612_v20 = vpop.permute.xlu1 %611 }
 0x260   :  { %v427_v29 = vadd.f32 %v425_v22, %v411_v25 }
 0x261   :  { %v917_v26 = vpop.eup %916 }
 0x262   :  { %v426_v28 = vmul.f32 %v917_v26, %v152_v24  ;;  %v732_v33 = vmul.f32 %v427_v29, %v427_v29  ;;  %v617_v24 = vpop.permute.xlu0 %616  ;;  %v622_v37 = vpop.permute.xlu1 %621 }
 0x264   :  { %v428_v30 = vadd.f32 %v426_v28, %v414_v27 }
 0x266   :  { %v431_v31 = vpack.c.bf16 %v428_v30, %v427_v29  ;;  %v1176_v32 = vadd.f32 %v428_v30, %v427_v29  ;;  %v733_v15 = vmul.f32 %v428_v30, %v428_v30 }
 0x268   :  { %861 = vmatprep.subr.bf16.mxu0 %v431_v31  ;;  %v1178_v34 = vadd.f32 %v733_v15, %v732_v33 }
 0x269   :  { %862 = vmatpush3.bf16.msra.mxu0 %v431_v31 }
 0x26c   :  { %864 = vmatmul.mubr.msk.bf16.vlgmr.msra.gmra.mxu0 %vm233_vm0, %v905_v13 }
 0x26d   :  { %867 = vmatprep.mubr.msk.bf16.mxu0 %vm233_vm0, %v906_v35  ;;  %v716_v35 = vrot.slane %v1176_v32, 4 }
 0x274   :  { %868 = vmatmul.mubr.msk.bf16.gmra.mxu0 %vm233_vm0, %v907_v36 }
 0x32c   :  { %v865_v39 = vpop.f32.mrf.mxu0 }
 0x32d   :  { %v565_v55 = vadd.f32 %v865_v39, %v463_v51  ;;  %v735_v39 = vrot.slane %v1178_v34, 4 }
 0x32e   :  { %v556_v41 = vpop.f32.mrf.mxu0 }
 0x32f   :  { %v589_v11 = vmax.f32 %v565_v55, 0.0  ;;  %v557_v12 = vadd.f32 %v556_v41, %v453_v9 }
 0x330   :  { %v866_v42 = vpop.f32.mrf.mxu0 }
 0x331   :  { %v568_v60 = vadd.f32 %v866_v42, %v468_v59  ;;  %v587_v61 = vmax.f32 %v557_v12, 0.0  ;;  %v627_v42 = vpop.permute.xlu0 %626 }
 0x332   :  { %v559_v44 = vpop.f32.mrf.mxu0 }
 0x333   :  { %v590_v6 = vmax.f32 %v568_v60, 0.0  ;;  %v560_v7 = vadd.f32 %v559_v44, %v458_v5  ;;  %v717_v44 = vadd.f32 %v716_v35, %v1176_v32 }
 0x334   :  { %v869_v52 = vpop.f32.mrf.mxu0 }
 0x335   :  { %v581_v56 = vadd.f32 %v869_v52, %v483_v40  ;;  %v596_v16 = vpack.c.bf16 %v590_v6, %v589_v11  ;;  %v588_v17 = vmax.f32 %v560_v7, 0.0 }
 0x336   :  { %v572_v53 = vpop.f32.mrf.mxu0 }
 0x337   :  { %v573_v50 = vadd.f32 %v572_v53, %v473_v45  ;;  %v593_v2 = vmax.f32 %v581_v56, 0.0  ;;  %v595_v18 = vpack.c.bf16 %v588_v17, %v587_v61  ;;  %v736_v53 = vadd.f32 %v735_v39, %v1178_v34 }
 0x338   :  { %v870_v63 = vpop.f32.mrf.mxu0  ;;  %v718_v56 = vrot.slane %v717_v44, 2 }
 0x339   :  { %v584_v1 = vadd.f32 %v870_v63, %v488_v38  ;;  %v591_v58 = vmax.f32 %v573_v50, 0.0  ;;  %v737_v50 = vrot.slane %v736_v53, 2 }
 0x33a   :  { %v575_v54 = vpop.f32.mrf.mxu0  ;;  %v719_v60 = vadd.f32 %v718_v56, %v717_v44 }
 0x33b   :  { %v594_v3 = vmax.f32 %v584_v1, 0.0  ;;  %v576_v57 = vadd.f32 %v575_v54, %v478_v43 }
 0x33d   :  { %v598_v62 = vpack.c.bf16 %v594_v3, %v593_v2  ;;  %v592_v4 = vmax.f32 %v576_v57, 0.0  ;;  %v738_v3 = vadd.f32 %v737_v50, %v736_v53 }
 0x33f   :  { %v597_v8 = vpack.c.bf16 %v592_v4, %v591_v58  ;;  %871 = vmatprep.subr.bf16.mxu1 %v598_v62 }
 0x340   :  { %872 = vmatpush3.bf16.msra.mxu1 %v598_v62  ;;  %v739_v62 = vrot.slane %v738_v3, 1 }
 0x341   :  { %873 = vmatprep.subr.bf16.mxu1 %v597_v8 }
 0x342   :  { %v740_v11 = vadd.f32 %v739_v62, %v738_v3 }
 0x344   :  { %874 = vmatpush3.bf16.msra.mxu1 %v597_v8 }
 0x345   :  { %875 = vmatprep.subr.bf16.mxu1 %v596_v16 }
 0x348   :  { %876 = vmatpush3.bf16.msra.mxu1 %v596_v16 }
 0x349   :  { %877 = vmatprep.subr.bf16.mxu1 %v595_v18 }
 0x34c   :  { %878 = vmatpush3.bf16.msra.mxu1 %v595_v18 }
 0x34f   :  { %880 = vmatmul.mubr.msk.bf16.vlgmr.msra.gmra.mxu1 %vm361_vm1, %v909_v19 }
 0x40f   :  { %v881_v0 = vpop.f32.mrf.mxu1 }
 0x410   :  { %v688_v40 = vadd.f32 %v881_v0, %v622_v37 }
 0x411   :  { %v679_v21 = vpop.f32.mrf.mxu1 }
 0x412   :  { %v680_v22 = vadd.f32 %v679_v21, %v612_v20 }
 0x413   :  { %v882_v23 = vpop.f32.mrf.mxu1 }
 0x414   :  { %918 = vtanh.f32 %v680_v22  ;;  %v691_v52 = vadd.f32 %v882_v23, %v627_v42 }
 0x415   :  { %v682_v25 = vpop.f32.mrf.mxu1 }
 0x416   :  { %v683_v26 = vadd.f32 %v682_v25, %v617_v24 }
 0x418   :  { %920 = vtanh.f32 %v683_v26 }
 0x421   :  { %v919_v27 = vpop.eup %918 }
 0x422   :  { %v696_v28 = vmul.f32 1.9, %v919_v27 }
 0x424   :  { %v698_v29 = vmul.f32 1.442695, %v696_v28  ;;  %v706_v38 = vadd.f32 %v696_v28, %v1168_v10 }
 0x425   :  { %v921_v30 = vpop.eup %920 }
 0x426   :  { %922 = vpow2.f32 %v698_v29  ;;  %v697_v31 = vmul.f32 1.9, %v921_v30 }
 0x428   :  { %v700_v33 = vmul.f32 1.442695, %v697_v31  ;;  %v707_v13 = vadd.f32 %v697_v31, %v1171_v14 }
 0x42a   :  { %924 = vpow2.f32 %v700_v33  ;;  %v742_v43 = vadd.f32 %v707_v13, %v706_v38 }
 0x433   :  { %v923_v15 = vpop.eup %922 }
 0x434   :  { %v702_v36 = vmul.f32 %v923_v15, %v149_v48  ;;  %v743_v48 = vrot.slane %v742_v43, 4 }
 0x436   :  { %v704_v45 = vadd.f32 %v702_v36, %v688_v40  ;;  %v744_v54 = vadd.f32 %v743_v48, %v742_v43 }
 0x437   :  { %v925_v41 = vpop.eup %924 }
 0x438   :  { %v703_v14 = vmul.f32 %v925_v41, %v150_v49  ;;  %v723_v59 = vmul.f32 %v704_v45, %v704_v45  ;;  %v745_v47 = vrot.slane %v744_v54, 2  ;;  %v720_v49 = vrot.slane %v719_v60, 1 }
 0x43a   :  { %v705_v46 = vadd.f32 %v703_v14, %v691_v52  ;;  %v746_v6 = vadd.f32 %v745_v47, %v744_v54  ;;  %v721_v7 = vadd.f32 %v720_v49, %v719_v60 }
 0x43c   :  { %v708_v10 = vadd.f32 %v705_v46, %v704_v45  ;;  %v724_v63 = vmul.f32 %v705_v46, %v705_v46  ;;  %v747_v17 = vrot.slane %v746_v6, 1 }
 0x43e   :  { %v709_v1 = vrot.slane %v708_v10, 4  ;;  %v725_v51 = vadd.f32 %v724_v63, %v723_v59  ;;  %v748_v0 = vadd.f32 %v747_v17, %v746_v6 }
 0x440   :  { %v710_v2 = vadd.f32 %v709_v1, %v708_v10  ;;  %v726_v32 = vrot.slane %v725_v51, 4 }
 0x442   :  { %v711_v57 = vrot.slane %v710_v2, 2  ;;  %v727_v55 = vadd.f32 %v726_v32, %v725_v51 }
 0x444   :  { %v712_v58 = vadd.f32 %v711_v57, %v710_v2  ;;  %v728_v34 = vrot.slane %v727_v55, 2 }
 0x446   :  { %v713_v4 = vrot.slane %v712_v58, 1  ;;  %v729_v5 = vadd.f32 %v728_v34, %v727_v55 }
 0x448   :  { %v714_v8 = vadd.f32 %v713_v4, %v712_v58  ;;  %v730_v9 = vrot.slane %v729_v5, 1 }
 0x44a   :  { %v722_v12 = vadd.f32 %v721_v7, %v714_v8  ;;  %v731_v16 = vadd.f32 %v730_v9, %v729_v5 }
 0x44c   :  { %v741_v61 = vadd.f32 %v740_v11, %v731_v16  ;;  %v749_v18 = vmul.f32 0.03125, %v722_v12 }
 0x44e   :  { %v750_v19 = vmul.f32 0.5, %v741_v61 }
 0x450   :  { %v752_v20 = vsel %vm751_vm2, %v749_v18, %v750_v19 }
 0x451   :  { %v754_v21 = vsel %vm753_vm3, %v752_v20, %v748_v0 }
 0x452   :  { %755 = vst [vmem:[%s1221_s8] sm:$0x7] %v754_v21 }

// kernel: fastflow_forward.6
= control target key start
LH: loop header
LB: loop body
LE: loop exit
PB: predicated region body
PF: predicated region fallthrough
CT: control target
= control target key end

     0   :  { %v1606_v0 = vmov 2   ;;  %v1607_v1 = vmov 1   ;;  %v1608_v5 = vmov 0   ;;  %vm418_vm0 = vcmask 392192   ;;  %s2098_s2 = inlined_call_operand.vmem [shape: f32[64,3], index: 2, kind: input, shape index: {}]   ;;  %s2099_s3 = inlined_call_operand.vmem [shape: f32[64,1], index: 3, kind: input, shape index: {}]   ;;  %s2100_s5 = inlined_call_operand.vmem [shape: f32[2,128,1], index: 5, kind: input, shape index: {}]   ;;  %s2101_s1 = inlined_call_operand.vmem [shape: f32[16,32], index: 1, kind: input, shape index: {}]   ;;  %s2102_s4 = inlined_call_operand.vmem [shape: bf16[2,128,48], index: 4, kind: input, shape index: {}]   ;;  %s2103_s7 = inlined_call_operand.vmem [shape: f32[2,64,1], index: 7, kind: input, shape index: {}]   ;;  %s2104_s0 = inlined_call_operand.vmem [shape: f32[3,32], index: 0, kind: input, shape index: {}]   ;;  %s2105_s6 = inlined_call_operand.vmem [shape: bf16[2,64,128], index: 6, kind: input, shape index: {}]   ;;  %s2106_s8 = inlined_call_operand.vmem [shape: f32[3,32], index: 8, kind: output, shape index: {}]  }
   0x1   :  { %1534 = vset.pattern.permute.xlu0 %v1606_v0  ;;  %1533 = vset.pattern.permute.xlu1 %v1607_v1  ;;  %v32_v2 = vld [vmem:[%s2098_s2 + $0x10] sm:$0xff]  ;;  %v33_v3 = vld [vmem:[%s2098_s2 + $0x18] sm:$0xff]  ;;  %v30_v4 = vld [vmem:[%s2098_s2] sm:$0xff]  ;;  %vm1213_vm1 = vcmask 261120   ;;  %vm1291_vm2 = vcmask 1040384   ;;  %vm1293_vm3 = vcmask 1041408  }
   0x2   :  { %154 = vperm.xlu0 %1534, %v32_v2   ;;  %101 = vperm.xlu1 %1533, %v32_v2   ;;  %v31_v6 = vld [vmem:[%s2098_s2 + $0x8] sm:$0xff]  ;;  %v200_v7 = vld [vmem:[%s2099_s3 + $0x18] sm:$0xff]  ;;  %v296_v8 = vld [vmem:[%s2100_s5 + $0x70] sm:$0xff]  ;;  %vm1295_vm4 = vcmask 256000  }
   0x3   :  { %v294_v9 = vld [vmem:[%s2100_s5 + $0x60] sm:$0xff]  ;;  %v262_v11 = vld [vmem:[%s2101_s1 + $0x8] sm:$0xff]  ;;  %v292_v13 = vld [vmem:[%s2100_s5 + $0x50] sm:$0xff] }
   0x4   :  { %v261_v10 = vld [vmem:[%s2101_s1] sm:$0xff]  ;;  %v199_v14 = vld [vmem:[%s2099_s3 + $0x10] sm:$0xff]  ;;  %v198_v18 = vld [vmem:[%s2099_s3 + $0x8] sm:$0xff] }
   0x5   :  { %v1688_v12 = vpack.c.bf16 %v262_v11, %v261_v10  ;;  %v290_v15 = vld [vmem:[%s2100_s5 + $0x40] sm:$0xff]  ;;  %v288_v17 = vld [vmem:[%s2100_s5 + $0x30] sm:$0xff]  ;;  %v297_v20 = vld [vmem:[%s2100_s5 + $0x78] sm:$0xff] }
   0x6   :  { %105 = vperm.xlu1 %1533, %v33_v3   ;;  %146 = vperm.xlu0 %1534, %v30_v4   ;;  %v197_v16 = vld [vmem:[%s2099_s3] sm:$0xff]  ;;  %v284_v21 = vld [vmem:[%s2100_s5 + $0x10] sm:$0xff]  ;;  %v295_v23 = vld [vmem:[%s2100_s5 + $0x68] sm:$0xff] }
   0x7   :  { %1438 = vmatprep.subr.bf16.mxu0 %v1688_v12  ;;  %v286_v19 = vld [vmem:[%s2100_s5 + $0x20] sm:$0xff]  ;;  %v293_v25 = vld [vmem:[%s2100_s5 + $0x58] sm:$0xff]  ;;  %v574_v26 = vld [vmem:[%s2103_s7 + $0x10] sm:$0xff] }
   0x8   :  { %1439 = vmatpush3.bf16.msra.mxu0 %v1688_v12  ;;  %v1550_v22 = vld [vmem:[%s2102_s4] sm:$0xff]   ;;  %v291_v27 = vld [vmem:[%s2100_s5 + $0x48] sm:$0xff]  ;;  %v289_v29 = vld [vmem:[%s2100_s5 + $0x38] sm:$0xff] }
   0x9   :  { %1444 = vmatprep.mubr.msk.bf16.mxu0 %vm418_vm0, %v1550_v22  ;;  %v282_v24 = vld [vmem:[%s2100_s5] sm:$0xff]  ;;  %v36_v30 = vld [vmem:[%s2098_s2 + $0x30] sm:$0xff]  ;;  %v287_v31 = vld [vmem:[%s2100_s5 + $0x28] sm:$0xff] }
   0xa   :  { %1535 = vset.pattern.permute.xlu1 %v1606_v0  ;;  %1538 = vset.pattern.permute.xlu0 %v1608_v5  ;;  %v572_v28 = vld [vmem:[%s2103_s7] sm:$0xff]  ;;  %v285_v32 = vld [vmem:[%s2100_s5 + $0x18] sm:$0xff]  ;;  %v283_v33 = vld [vmem:[%s2100_s5 + $0x8] sm:$0xff] }
   0xb   :  { %158 = vperm.xlu1 %1535, %v33_v3   ;;  %51 = vperm.xlu0 %1538, %v32_v2   ;;  %v34_v34 = vld [vmem:[%s2098_s2 + $0x20] sm:$0xff]  ;;  %v575_v35 = vld [vmem:[%s2103_s7 + $0x18] sm:$0xff]  ;;  %v573_v36 = vld [vmem:[%s2103_s7 + $0x8] sm:$0xff] }
   0xc   :  { %v37_v37 = vld [vmem:[%s2098_s2 + $0x38] sm:$0xff]  ;;  %v35_v38 = vld [vmem:[%s2098_s2 + $0x28] sm:$0xff]  ;;  %v203_v39 = vld [vmem:[%s2099_s3 + $0x30] sm:$0xff] }
   0xd   :  { %v204_v40 = vld [vmem:[%s2099_s3 + $0x38] sm:$0xff]  ;;  %v1790_v50 = vld [vmem:[%s2104_s0] ss:$0 sm:$0xff]  ;;  %v1796_v52 = vld [vmem:[%s2104_s0 + $0x1] ss:$0 sm:$0xff] }
   0xe   :  { %v1803_v57 = vld [vmem:[%s2104_s0 + $0x2] ss:$0 sm:$0xff] }
   0xf   :  { %1536 = vset.pattern.permute.xlu1 %v1608_v5  ;;  %56 = vperm.xlu0 %1538, %v33_v3  }
  0x10   :  { %41 = vperm.xlu1 %1536, %v30_v4  }
  0x13   :  { %46 = vperm.xlu0 %1538, %v31_v6  }
  0x14   :  { %1537 = vset.pattern.permute.xlu1 %v1607_v1 }
  0x15   :  { %93 = vperm.xlu1 %1537, %v30_v4  }
  0x17   :  { %222 = vperm.xlu0 %1538, %v200_v7  }
  0x19   :  { %97 = vperm.xlu1 %1537, %v31_v6  }
  0x1b   :  { %370 = vperm.xlu0 %1538, %v296_v8  }
  0x1d   :  { %1539 = vset.pattern.permute.xlu1 %v1606_v0 }
  0x1e   :  { %150 = vperm.xlu1 %1539, %v31_v6  }
  0x1f   :  { %360 = vperm.xlu0 %1538, %v294_v9  }
  0x22   :  { %1540 = vset.pattern.permute.xlu1 %v1608_v5 }
  0x23   :  { %350 = vperm.xlu0 %1538, %v292_v13   ;;  %217 = vperm.xlu1 %1540, %v199_v14  }
  0x27   :  { %340 = vperm.xlu0 %1538, %v290_v15   ;;  %207 = vperm.xlu1 %1540, %v197_v16  }
  0x2b   :  { %330 = vperm.xlu0 %1538, %v288_v17   ;;  %212 = vperm.xlu1 %1540, %v198_v18  }
  0x2f   :  { %320 = vperm.xlu0 %1538, %v286_v19   ;;  %375 = vperm.xlu1 %1540, %v297_v20  }
  0x33   :  { %310 = vperm.xlu0 %1538, %v284_v21   ;;  %365 = vperm.xlu1 %1540, %v295_v23  }
  0x37   :  { %300 = vperm.xlu0 %1538, %v282_v24   ;;  %355 = vperm.xlu1 %1540, %v293_v25  }
  0x3b   :  { %592 = vperm.xlu0 %1538, %v574_v26   ;;  %345 = vperm.xlu1 %1540, %v291_v27   ;;  %v1551_v27 = vld [vmem:[%s2102_s4 + $0x8] sm:$0xff]  }
  0x3f   :  { %582 = vperm.xlu0 %1538, %v572_v28   ;;  %335 = vperm.xlu1 %1540, %v289_v29   ;;  %v1552_v28 = vld [vmem:[%s2102_s4 + $0x10] sm:$0xff]   ;;  %v1553_v29 = vld [vmem:[%s2102_s4 + $0x18] sm:$0xff]  }
  0x43   :  { %71 = vperm.xlu0 %1538, %v36_v30   ;;  %325 = vperm.xlu1 %1540, %v287_v31   ;;  %v1555_v31 = vld [vmem:[%s2102_s4 + $0x28] sm:$0xff]  }
  0x47   :  { %1541 = vset.pattern.permute.xlu0 %v1607_v1  ;;  %315 = vperm.xlu1 %1540, %v285_v32   ;;  %v1557_v32 = vld [vmem:[%s2102_s4 + $0x38] sm:$0xff]  }
  0x48   :  { %117 = vperm.xlu0 %1541, %v36_v30  }
  0x4b   :  { %305 = vperm.xlu1 %1540, %v283_v33   ;;  %v1558_v33 = vld [vmem:[%s2105_s6] sm:$0xff]  }
  0x4c   :  { %109 = vperm.xlu0 %1541, %v34_v34   ;;  %1476 = vmatprep.mubr.bf16.mxu1 %v1558_v33 }
  0x4f   :  { %597 = vperm.xlu1 %1540, %v575_v35   ;;  %v201_v35 = vld [vmem:[%s2099_s3 + $0x20] sm:$0xff] }
  0x50   :  { %1545 = vset.pattern.permute.xlu0 %v1606_v0 }
  0x51   :  { %174 = vperm.xlu0 %1545, %v37_v37  }
  0x53   :  { %587 = vperm.xlu1 %1540, %v573_v36   ;;  %v578_v36 = vld [vmem:[%s2103_s7 + $0x30] sm:$0xff] }
  0x55   :  { %166 = vperm.xlu0 %1545, %v35_v38  }
  0x57   :  { %76 = vperm.xlu1 %1540, %v37_v37  }
  0x59   :  { %1549 = vset.pattern.permute.xlu0 %v1608_v5 }
  0x5a   :  { %227 = vperm.xlu0 %1549, %v201_v35  }
  0x5b   :  { %1542 = vset.pattern.permute.xlu1 %v1607_v1 }
  0x5c   :  { %121 = vperm.xlu1 %1542, %v37_v37   ;;  %v579_v37 = vld [vmem:[%s2103_s7 + $0x38] sm:$0xff] }
  0x5e   :  { %617 = vperm.xlu0 %1549, %v579_v37  }
  0x60   :  { %1543 = vset.pattern.permute.xlu1 %v1606_v0 }
  0x61   :  { %170 = vperm.xlu1 %1543, %v36_v30   ;;  %v1554_v30 = vld [vmem:[%s2102_s4 + $0x20] sm:$0xff]  }
  0x65   :  { %1544 = vset.pattern.permute.xlu1 %v1608_v5 }
  0x66   :  { %61 = vperm.xlu1 %1544, %v34_v34  }
  0x6a   :  { %66 = vperm.xlu1 %1544, %v35_v38  }
  0x6e   :  { %1546 = vset.pattern.permute.xlu1 %v1607_v1 }
  0x6f   :  { %113 = vperm.xlu1 %1546, %v35_v38   ;;  %v576_v38 = vld [vmem:[%s2103_s7 + $0x20] sm:$0xff] }
  0x73   :  { %1547 = vset.pattern.permute.xlu1 %v1606_v0 }
  0x74   :  { %162 = vperm.xlu1 %1547, %v34_v34   ;;  %v202_v34 = vld [vmem:[%s2099_s3 + $0x28] sm:$0xff] }
  0x78   :  { %1548 = vset.pattern.permute.xlu1 %v1608_v5 }
  0x79   :  { %237 = vperm.xlu1 %1548, %v203_v39   ;;  %v577_v39 = vld [vmem:[%s2103_s7 + $0x28] sm:$0xff] }
  0x7a   :  { %607 = vperm.xlu0 %1549, %v577_v39  }
  0x7d   :  { %v102_v41 = vpop.permute.xlu1 %101  ;;  %242 = vperm.xlu1 %1548, %v204_v40   ;;  %v155_v42 = vpop.permute.xlu0 %154  ;;  %v1354_v40 = vld [vmem:[%s2100_s5 + $0xf0] sm:$0xff] }
  0x7e   :  { %v130_v58 = vmul.f32 %v1796_v52, %v102_v41  ;;  %v183_v60 = vmul.f32 %v1803_v57, %v155_v42  ;;  %v1355_v41 = vld [vmem:[%s2100_s5 + $0xf8] sm:$0xff]  ;;  %v1352_v42 = vld [vmem:[%s2100_s5 + $0xe0] sm:$0xff] }
  0x7f   :  { %850 = vperm.xlu0 %1549, %v1355_v41  }
  0x81   :  { %v106_v43 = vpop.permute.xlu1 %105  ;;  %v147_v44 = vpop.permute.xlu0 %146  ;;  %232 = vperm.xlu1 %1548, %v202_v34  }
  0x82   :  { %v131_v55 = vmul.f32 %v1796_v52, %v106_v43  ;;  %v181_v11 = vmul.f32 %v1803_v57, %v147_v44  ;;  %v1353_v43 = vld [vmem:[%s2100_s5 + $0xe8] sm:$0xff]  ;;  %v1350_v44 = vld [vmem:[%s2100_s5 + $0xd0] sm:$0xff] }
  0x83   :  { %840 = vperm.xlu0 %1549, %v1353_v43  }
  0x85   :  { %612 = vperm.xlu1 %1548, %v578_v36  }
  0x86   :  { %v159_v45 = vpop.permute.xlu1 %158  ;;  %v52_v46 = vpop.permute.xlu0 %51 }
  0x87   :  { %v85_v56 = vmul.f32 %v1790_v50, %v52_v46  ;;  %v184_v61 = vmul.f32 %v1803_v57, %v159_v45  ;;  %v1351_v45 = vld [vmem:[%s2100_s5 + $0xd8] sm:$0xff]  ;;  %v1348_v46 = vld [vmem:[%s2100_s5 + $0xc0] sm:$0xff] }
  0x88   :  { %830 = vperm.xlu0 %1549, %v1351_v45  }
  0x89   :  { %v138_v62 = vadd.f32 %v130_v58, %v85_v56  ;;  %602 = vperm.xlu1 %1548, %v576_v38   ;;  %v1340_v56 = vld [vmem:[%s2100_s5 + $0x80] sm:$0xff]  ;;  %v1341_v58 = vld [vmem:[%s2100_s5 + $0x88] sm:$0xff] }
  0x8a   :  { %v57_v48 = vpop.permute.xlu0 %56 }
  0x8b   :  { %v42_v47 = vpop.permute.xlu1 %41  ;;  %v86_v51 = vmul.f32 %v1790_v50, %v57_v48  ;;  %v191_v5 = vadd.f32 %v183_v60, %v138_v62  ;;  %v1346_v48 = vld [vmem:[%s2100_s5 + $0xb0] sm:$0xff]  ;;  %v1381_v60 = vld [vmem:[%s2103_s7 + $0x48] sm:$0xff]  ;;  %v1383_v62 = vld [vmem:[%s2103_s7 + $0x58] sm:$0xff] }
  0x8c   :  { %v83_v3 = vmul.f32 %v1790_v50, %v42_v47  ;;  %v1349_v47 = vld [vmem:[%s2100_s5 + $0xc8] sm:$0xff] }
  0x8d   :  { %v139_v59 = vadd.f32 %v131_v55, %v86_v51  ;;  %845 = vperm.xlu1 %1548, %v1354_v40   ;;  %820 = vperm.xlu0 %1549, %v1349_v47   ;;  %v1344_v51 = vld [vmem:[%s2100_s5 + $0xa0] sm:$0xff]  ;;  %v1343_v55 = vld [vmem:[%s2100_s5 + $0x98] sm:$0xff] }
  0x8e   :  { %v47_v53 = vpop.permute.xlu0 %46 }
  0x8f   :  { %v192_v2 = vadd.f32 %v184_v61, %v139_v59  ;;  %v84_v7 = vmul.f32 %v1790_v50, %v47_v53  ;;  %v1345_v53 = vld [vmem:[%s2100_s5 + $0xa8] sm:$0xff]  ;;  %v1380_v59 = vld [vmem:[%s2103_s7 + $0x40] sm:$0xff]  ;;  %v1382_v61 = vld [vmem:[%s2103_s7 + $0x50] sm:$0xff] }
  0x90   :  { %v94_v49 = vpop.permute.xlu1 %93 }
  0x91   :  { %v128_v1 = vmul.f32 %v1796_v52, %v94_v49  ;;  %835 = vperm.xlu1 %1548, %v1352_v42   ;;  %v1347_v49 = vld [vmem:[%s2100_s5 + $0xb8] sm:$0xff] }
  0x92   :  { %v223_v0 = vpop.permute.xlu0 %222  ;;  %810 = vperm.xlu0 %1549, %v1347_v49  }
  0x93   :  { %v1810_v4 = vadd.f32 %v223_v0, %v192_v2  ;;  %v136_v8 = vadd.f32 %v128_v1, %v83_v3  ;;  %v1385_v0 = vld [vmem:[%s2103_s7 + $0x68] sm:$0xff]  ;;  %v1386_v2 = vld [vmem:[%s2103_s7 + $0x70] sm:$0xff]  ;;  %v1387_v3 = vld [vmem:[%s2103_s7 + $0x78] sm:$0xff] }
  0x94   :  { %v98_v54 = vpop.permute.xlu1 %97 }
  0x95   :  { %v129_v9 = vmul.f32 %v1796_v52, %v98_v54  ;;  %v256_v13 = vmax.f32 %v1810_v4, 0.0  ;;  %v189_v19 = vadd.f32 %v181_v11, %v136_v8  ;;  %825 = vperm.xlu1 %1548, %v1350_v44   ;;  %v1342_v54 = vld [vmem:[%s2100_s5 + $0x90] sm:$0xff] }
  0x96   :  { %800 = vperm.xlu0 %1549, %v1345_v53   ;;  %v371_v11 = vpop.permute.xlu0 %370 }
  0x97   :  { %v137_v17 = vadd.f32 %v129_v9, %v84_v7 }
  0x99   :  { %v151_v63 = vpop.permute.xlu1 %150  ;;  %815 = vperm.xlu1 %1548, %v1348_v46  }
  0x9a   :  { %v182_v14 = vmul.f32 %v1803_v57, %v151_v63  ;;  %790 = vperm.xlu0 %1549, %v1343_v55   ;;  %v1384_v63 = vld [vmem:[%s2103_s7 + $0x60] sm:$0xff] }
  0x9c   :  { %v190_v21 = vadd.f32 %v182_v14, %v137_v17 }
  0x9d   :  { %805 = vperm.xlu1 %1548, %v1346_v48  }
  0x9e   :  { %v218_v6 = vpop.permute.xlu1 %217  ;;  %780 = vperm.xlu0 %1549, %v1341_v58  }
  0x9f   :  { %v1814_v10 = vadd.f32 %v218_v6, %v191_v5 }
  0xa1   :  { %v255_v15 = vmax.f32 %v1814_v10, 0.0  ;;  %795 = vperm.xlu1 %1548, %v1344_v51  }
  0xa2   :  { %v208_v16 = vpop.permute.xlu1 %207  ;;  %1063 = vperm.xlu0 %1549, %v1381_v60  }
  0xa3   :  { %v264_v18 = vpack.c.bf16 %v256_v13, %v255_v15  ;;  %v1824_v20 = vadd.f32 %v208_v16, %v189_v19  ;;  %v361_v19 = vpop.permute.xlu0 %360 }
  0xa5   :  { %1440 = vmatprep.subr.bf16.mxu0 %v264_v18  ;;  %v253_v24 = vmax.f32 %v1824_v20, 0.0  ;;  %785 = vperm.xlu1 %1548, %v1342_v54  }
  0xa6   :  { %v213_v22 = vpop.permute.xlu1 %212  ;;  %1441 = vmatpush3.bf16.msra.mxu0 %v264_v18  ;;  %1073 = vperm.xlu0 %1549, %v1383_v62  }
  0xa7   :  { %v1826_v23 = vadd.f32 %v213_v22, %v190_v21 }
  0xa9   :  { %v254_v25 = vmax.f32 %v1826_v23, 0.0  ;;  %775 = vperm.xlu1 %1548, %v1340_v56  }
  0xaa   :  { %1083 = vperm.xlu0 %1549, %v1385_v0   ;;  %v376_v8 = vpop.permute.xlu1 %375 }
  0xab   :  { %v263_v26 = vpack.c.bf16 %v254_v25, %v253_v24 }
  0xad   :  { %1442 = vmatprep.subr.bf16.mxu0 %v263_v26  ;;  %1058 = vperm.xlu1 %1548, %v1380_v59  }
  0xae   :  { %1443 = vmatpush3.bf16.msra.mxu0 %v263_v26  ;;  %1093 = vperm.xlu0 %1549, %v1387_v3   ;;  %v366_v17 = vpop.permute.xlu1 %365 }
  0xaf   :  { %1484 = vmatprep.subr.bf16.mxu0 %v1688_v12 }
  0xb1   :  { %1445 = vmatmul.mubr.msk.bf16.vlgmr.msra.gmra.mxu0 %vm418_vm0, %v1551_v27  ;;  %1068 = vperm.xlu1 %1548, %v1382_v61  }
  0xb2   :  { %1448 = vmatprep.mubr.msk.bf16.mxu0 %vm418_vm0, %v1552_v28  ;;  %1485 = vmatpush3.bf16.msra.mxu0 %v1688_v12  ;;  %v1556_v12 = vld [vmem:[%s2102_s4 + $0x30] sm:$0xff]   ;;  %v356_v26 = vpop.permute.xlu1 %355  ;;  %v351_v28 = vpop.permute.xlu0 %350 }
  0xb5   :  { %1078 = vperm.xlu1 %1548, %v1384_v63  }
  0xb6   :  { %v341_v33 = vpop.permute.xlu0 %340 }
  0xb9   :  { %1449 = vmatmul.mubr.msk.bf16.gmra.mxu0 %vm418_vm0, %v1553_v29  ;;  %1088 = vperm.xlu1 %1548, %v1386_v2  }
  0xba   :  { %1452 = vmatprep.mubr.msk.bf16.mxu0 %vm418_vm0, %v1554_v30  ;;  %v331_v47 = vpop.permute.xlu0 %330 }
  0xbe   :  { %v321_v60 = vpop.permute.xlu0 %320 }
  0xc1   :  { %1453 = vmatmul.mubr.msk.bf16.gmra.mxu0 %vm418_vm0, %v1555_v31  ;;  %v346_v31 = vpop.permute.xlu1 %345 }
  0xc2   :  { %1456 = vmatprep.mubr.msk.bf16.mxu0 %vm418_vm0, %v1556_v12 }
  0xc5   :  { %v336_v42 = vpop.permute.xlu1 %335 }
  0xc9   :  { %1457 = vmatmul.mubr.msk.bf16.gmra.mxu0 %vm418_vm0, %v1557_v32  ;;  %v326_v55 = vpop.permute.xlu1 %325 }
  0xcd   :  { %v316_v3 = vpop.permute.xlu1 %315 }
 0x171   :  { %v1951_v1 = vpop.f32.mrf.mxu0 }
 0x173   :  { %v1959_v5 = vpop.f32.mrf.mxu0 }
 0x175   :  { %v1961_v6 = vpop.f32.mrf.mxu0 }
 0x177   :  { %v1963_v7 = vpop.f32.mrf.mxu0 }
 0x179   :  { %v1450_v9 = vpop.f32.mrf.mxu0 }
 0x17a   :  { %v502_v61 = vadd.f32 %v1450_v9, %v331_v47  ;;  %v306_v9 = vpop.permute.xlu1 %305 }
 0x17b   :  { %v493_v14 = vpop.f32.mrf.mxu0 }
 0x17d   :  { %v1451_v16 = vpop.f32.mrf.mxu0 }
 0x17e   :  { %v505_v56 = vadd.f32 %v1451_v16, %v336_v42 }
 0x17f   :  { %v496_v18 = vpop.f32.mrf.mxu0 }
 0x180   :  { %v547_v63 = vmax.f32 %v505_v56, 0.0  ;;  %v497_v0 = vadd.f32 %v496_v18, %v326_v55  ;;  %v481_v18 = vadd.f32 %v1963_v7, %v306_v9  ;;  %v1560_v7 = vld [vmem:[%s2105_s6 + $0x10] sm:$0xff]  }
 0x181   :  { %v1454_v21 = vpop.f32.mrf.mxu0 }
 0x182   :  { %v518_v43 = vadd.f32 %v1454_v21, %v351_v28  ;;  %v545_v16 = vmax.f32 %v497_v0, 0.0 }
 0x183   :  { %v509_v22 = vpop.f32.mrf.mxu0 }
 0x184   :  { %v550_v53 = vmax.f32 %v518_v43, 0.0  ;;  %v510_v54 = vadd.f32 %v509_v22, %v341_v33  ;;  %v1562_v33 = vld [vmem:[%s2102_s4 + $0x40] sm:$0xff]  }
 0x185   :  { %v1455_v27 = vpop.f32.mrf.mxu0  ;;  %1490 = vmatprep.mubr.msk.bf16.mxu0 %vm418_vm0, %v1562_v33 }
 0x186   :  { %v521_v38 = vadd.f32 %v1455_v27, %v356_v26  ;;  %v548_v62 = vmax.f32 %v510_v54, 0.0 }
 0x187   :  { %v512_v29 = vpop.f32.mrf.mxu0 }
 0x188   :  { %v551_v48 = vmax.f32 %v521_v38, 0.0  ;;  %v513_v49 = vadd.f32 %v512_v29, %v346_v31 }
 0x189   :  { %v1458_v30 = vpop.f32.mrf.mxu0 }
 0x18a   :  { %v534_v32 = vadd.f32 %v1458_v30, %v371_v11  ;;  %v561_v58 = vpack.c.bf16 %v551_v48, %v550_v53  ;;  %v549_v59 = vmax.f32 %v513_v49, 0.0  ;;  %v494_v11 = vadd.f32 %v493_v14, %v321_v60 }
 0x18b   :  { %v525_v12 = vpop.f32.mrf.mxu0 }
 0x18c   :  { %v526_v35 = vadd.f32 %v525_v12, %v361_v19  ;;  %v554_v39 = vmax.f32 %v534_v32, 0.0  ;;  %v560_v2 = vpack.c.bf16 %v549_v59, %v548_v62  ;;  %v489_v19 = vadd.f32 %v1961_v6, %v316_v3 }
 0x18d   :  { %v1459_v34 = vpop.f32.mrf.mxu0  ;;  %v544_v26 = vmax.f32 %v494_v11, 0.0  ;;  %v541_v6 = vmax.f32 %v481_v18, 0.0 }
 0x18e   :  { %v537_v36 = vadd.f32 %v1459_v34, %v376_v8  ;;  %v552_v44 = vmax.f32 %v526_v35, 0.0  ;;  %v546_v8 = vmax.f32 %v502_v61, 0.0  ;;  %v543_v27 = vmax.f32 %v489_v19, 0.0  ;;  %v598_v34 = vpop.permute.xlu1 %597 }
 0x18f   :  { %v528_v37 = vpop.f32.mrf.mxu0  ;;  %v558_v28 = vpack.c.bf16 %v545_v16, %v544_v26 }
 0x190   :  { %v555_v40 = vmax.f32 %v537_v36, 0.0  ;;  %v529_v41 = vadd.f32 %v528_v37, %v366_v17  ;;  %v311_v17 = vpop.permute.xlu0 %310  ;;  %v559_v21 = vpack.c.bf16 %v547_v63, %v546_v8 }
 0x191   :  { %v486_v22 = vadd.f32 %v1951_v1, %v311_v17  ;;  %v1559_v1 = vld [vmem:[%s2105_s6 + $0x8] sm:$0xff]  }
 0x192   :  { %v553_v45 = vmax.f32 %v529_v41, 0.0  ;;  %v563_v46 = vpack.c.bf16 %v555_v40, %v554_v39  ;;  %v588_v35 = vpop.permute.xlu1 %587 }
 0x193   :  { %v542_v30 = vmax.f32 %v486_v22, 0.0 }
 0x194   :  { %v562_v51 = vpack.c.bf16 %v553_v45, %v552_v44  ;;  %1460 = vmatprep.subr.bf16.mxu1 %v563_v46  ;;  %v301_v29 = vpop.permute.xlu0 %300 }
 0x195   :  { %1461 = vmatpush3.bf16.msra.mxu1 %v563_v46  ;;  %v478_v14 = vadd.f32 %v1959_v5, %v301_v29  ;;  %v557_v31 = vpack.c.bf16 %v543_v27, %v542_v30  ;;  %v1561_v5 = vld [vmem:[%s2105_s6 + $0x18] sm:$0xff]  }
 0x196   :  { %1462 = vmatprep.subr.bf16.mxu1 %v562_v51  ;;  %v77_v36 = vpop.permute.xlu1 %76 }
 0x197   :  { %v540_v12 = vmax.f32 %v478_v14, 0.0 }
 0x198   :  { %v593_v39 = vpop.permute.xlu0 %592 }
 0x199   :  { %1463 = vmatpush3.bf16.msra.mxu1 %v562_v51  ;;  %v556_v32 = vpack.c.bf16 %v541_v6, %v540_v12  ;;  %v90_v6 = vmul.f32 %v1790_v50, %v77_v36 }
 0x19a   :  { %1464 = vmatprep.subr.bf16.mxu1 %v561_v58  ;;  %v122_v37 = vpop.permute.xlu1 %121 }
 0x19b   :  { %v135_v26 = vmul.f32 %v1796_v52, %v122_v37 }
 0x19c   :  { %v583_v41 = vpop.permute.xlu0 %582 }
 0x19d   :  { %1465 = vmatpush3.bf16.msra.mxu1 %v561_v58 }
 0x19e   :  { %1466 = vmatprep.subr.bf16.mxu1 %v560_v2  ;;  %v171_v38 = vpop.permute.xlu1 %170 }
 0x19f   :  { %v187_v12 = vmul.f32 %v1803_v57, %v171_v38 }
 0x1a0   :  { %v72_v46 = vpop.permute.xlu0 %71 }
 0x1a1   :  { %1467 = vmatpush3.bf16.msra.mxu1 %v560_v2  ;;  %v89_v30 = vmul.f32 %v1790_v50, %v72_v46 }
 0x1a2   :  { %1468 = vmatprep.subr.bf16.mxu1 %v559_v21  ;;  %v62_v40 = vpop.permute.xlu1 %61 }
 0x1a3   :  { %v87_v0 = vmul.f32 %v1790_v50, %v62_v40 }
 0x1a4   :  { %v118_v55 = vpop.permute.xlu0 %117 }
 0x1a5   :  { %1469 = vmatpush3.bf16.msra.mxu1 %v559_v21  ;;  %v134_v22 = vmul.f32 %v1796_v52, %v118_v55 }
 0x1a6   :  { %1470 = vmatprep.subr.bf16.mxu1 %v558_v28  ;;  %v67_v42 = vpop.permute.xlu1 %66 }
 0x1a7   :  { %v88_v14 = vmul.f32 %v1790_v50, %v67_v42 }
 0x1a8   :  { %v110_v58 = vpop.permute.xlu0 %109 }
 0x1a9   :  { %1471 = vmatpush3.bf16.msra.mxu1 %v558_v28  ;;  %v132_v63 = vmul.f32 %v1796_v52, %v110_v58 }
 0x1aa   :  { %1472 = vmatprep.subr.bf16.mxu1 %v557_v31  ;;  %v114_v47 = vpop.permute.xlu1 %113 }
 0x1ab   :  { %v140_v9 = vadd.f32 %v132_v63, %v87_v0 }
 0x1ac   :  { %v175_v2 = vpop.permute.xlu0 %174 }
 0x1ad   :  { %1473 = vmatpush3.bf16.msra.mxu1 %v557_v31  ;;  %v133_v31 = vmul.f32 %v1796_v52, %v114_v47  ;;  %v188_v33 = vmul.f32 %v1803_v57, %v175_v2 }
 0x1ae   :  { %1474 = vmatprep.subr.bf16.mxu1 %v556_v32  ;;  %v163_v56 = vpop.permute.xlu1 %162 }
 0x1af   :  { %v185_v27 = vmul.f32 %v1803_v57, %v163_v56 }
 0x1b0   :  { %v167_v18 = vpop.permute.xlu0 %166 }
 0x1b1   :  { %1475 = vmatpush3.bf16.msra.mxu1 %v556_v32  ;;  %v186_v37 = vmul.f32 %v1803_v57, %v167_v18 }
 0x1b2   :  { %v238_v59 = vpop.permute.xlu1 %237 }
 0x1b4   :  { %1477 = vmatmul.mubr.bf16.vlgmr.msra.gmra.mxu1 %v1559_v1  ;;  %v228_v40 = vpop.permute.xlu0 %227 }
 0x1b5   :  { %1480 = vmatprep.mubr.bf16.mxu1 %v1560_v7  ;;  %v142_v7 = vadd.f32 %v134_v22, %v89_v30 }
 0x1b6   :  { %v243_v17 = vpop.permute.xlu1 %242 }
 0x1ba   :  { %v233_v32 = vpop.permute.xlu1 %232 }
 0x1bc   :  { %1481 = vmatmul.mubr.bf16.gmra.mxu1 %v1561_v5  ;;  %v143_v5 = vadd.f32 %v135_v26, %v90_v6 }
 0x1be   :  { %v196_v50 = vadd.f32 %v188_v33, %v143_v5  ;;  %v613_v36 = vpop.permute.xlu1 %612 }
 0x1c2   :  { %v603_v55 = vpop.permute.xlu1 %602 }
 0x274   :  { %v1478_v43 = vpop.f32.mrf.mxu1 }
 0x275   :  { %v687_v44 = vadd.f32 %v1478_v43, %v593_v39  ;;  %v195_v39 = vadd.f32 %v187_v12, %v142_v7  ;;  %v252_v43 = vadd.f32 %v243_v17, %v196_v50 }
 0x276   :  { %v678_v45 = vpop.f32.mrf.mxu1 }
 0x277   :  { %1574 = vtanh.f32 %v687_v44  ;;  %v679_v48 = vadd.f32 %v678_v45, %v583_v41  ;;  %v251_v41 = vadd.f32 %v238_v59, %v195_v39 }
 0x278   :  { %v1479_v49 = vpop.f32.mrf.mxu1 }
 0x279   :  { %1576 = vtanh.f32 %v679_v48  ;;  %v690_v51 = vadd.f32 %v1479_v49, %v598_v34  ;;  %v193_v34 = vadd.f32 %v185_v27, %v140_v9  ;;  %v259_v46 = vmax.f32 %v251_v41, 0.0  ;;  %v618_v48 = vpop.permute.xlu0 %617 }
 0x27a   :  { %v681_v53 = vpop.f32.mrf.mxu1 }
 0x27b   :  { %1578 = vtanh.f32 %v690_v51  ;;  %v682_v54 = vadd.f32 %v681_v53, %v588_v35  ;;  %v141_v35 = vadd.f32 %v133_v31, %v88_v14  ;;  %v249_v38 = vadd.f32 %v228_v40, %v193_v34  ;;  %v1564_v40 = vld [vmem:[%s2102_s4 + $0x50] sm:$0xff]  }
 0x27c   :  { %v1482_v52 = vpop.f32.mrf.mxu1 }
 0x27d   :  { %1580 = vtanh.f32 %v682_v54  ;;  %v194_v42 = vadd.f32 %v186_v37, %v141_v35  ;;  %v257_v47 = vmax.f32 %v249_v38, 0.0  ;;  %v260_v54 = vmax.f32 %v252_v43, 0.0  ;;  %v608_v17 = vpop.permute.xlu0 %607  ;;  %v1563_v35 = vld [vmem:[%s2102_s4 + $0x48] sm:$0xff]   ;;  %v1565_v38 = vld [vmem:[%s2102_s4 + $0x58] sm:$0xff]  }
 0x27e   :  { %v694_v44 = vpop.f32.mrf.mxu1  ;;  %v703_v59 = vadd.f32 %v1482_v52, %v613_v36  ;;  %v1567_v43 = vld [vmem:[%s2102_s4 + $0x68] sm:$0xff]  }
 0x27f   :  { %v250_v53 = vadd.f32 %v233_v32, %v194_v42  ;;  %v1566_v42 = vld [vmem:[%s2102_s4 + $0x60] sm:$0xff]  }
 0x280   :  { %v1483_v49 = vpop.f32.mrf.mxu1 }
 0x282   :  { %v697_v0 = vpop.f32.mrf.mxu1 }
 0x283   :  { %v698_v22 = vadd.f32 %v697_v0, %v608_v17 }
 0x284   :  { %v1575_v60 = vpop.eup %1574 }
 0x285   :  { %v1982_v61 = vmul.f32 1.9, %v1575_v60  ;;  %v695_v60 = vadd.f32 %v694_v44, %v603_v55  ;;  %v1568_v44 = vld [vmem:[%s2102_s4 + $0x70] sm:$0xff]   ;;  %v846_v55 = vpop.permute.xlu1 %845 }
 0x286   :  { %v1577_v62 = vpop.eup %1576 }
 0x287   :  { %v721_v3 = vmul.f32 1.442695, %v1982_v61  ;;  %v1987_v8 = vmul.f32 1.9, %v1577_v62  ;;  %v706_v62 = vadd.f32 %v1483_v49, %v618_v48 }
 0x288   :  { %v1579_v11 = vpop.eup %1578 }
 0x289   :  { %1582 = vpow2.f32 %v721_v3  ;;  %v717_v19 = vmul.f32 1.442695, %v1987_v8  ;;  %v1990_v21 = vmul.f32 1.9, %v1579_v11  ;;  %v258_v3 = vmax.f32 %v250_v53, 0.0  ;;  %v851_v53 = vpop.permute.xlu0 %850 }
 0x28a   :  { %v1581_v16 = vpop.eup %1580 }
 0x28b   :  { %1584 = vpow2.f32 %v717_v19  ;;  %v723_v28 = vmul.f32 1.442695, %v1990_v21  ;;  %v1996_v29 = vmul.f32 1.9, %v1581_v16 }
 0x28d   :  { %1586 = vpow2.f32 %v723_v28  ;;  %v719_v1 = vmul.f32 1.442695, %v1996_v29 }
 0x28f   :  { %1588 = vpow2.f32 %v719_v1 }
 0x296   :  { %v1583_v45 = vpop.eup %1582 }
 0x297   :  { %v727_v57 = vmul.f32 %v1583_v45, %v259_v46  ;;  %v1569_v45 = vld [vmem:[%s2102_s4 + $0x78] sm:$0xff]   ;;  %v1570_v46 = vld [vmem:[%s2105_s6 + $0x20] sm:$0xff]  }
 0x298   :  { %v1585_v51 = vpop.eup %1584  ;;  %1522 = vmatprep.mubr.bf16.mxu1 %v1570_v46 }
 0x299   :  { %v725_v56 = vmul.f32 %v1585_v51, %v257_v47  ;;  %v731_v19 = vadd.f32 %v727_v57, %v703_v59  ;;  %v836_v59 = vpop.permute.xlu1 %835 }
 0x29a   :  { %v1587_v58 = vpop.eup %1586 }
 0x29b   :  { %v728_v63 = vmul.f32 %v1587_v58, %v260_v54  ;;  %v729_v11 = vadd.f32 %v725_v56, %v695_v60  ;;  %v1260_v28 = vmul.f32 %v731_v19, %v731_v19  ;;  %v1230_v32 = vsel %vm1213_vm1, %v731_v19, 0.0  ;;  %v841_v58 = vpop.permute.xlu0 %840 }
 0x29c   :  { %v1589_v2 = vpop.eup %1588 }
 0x29d   :  { %v732_v16 = vadd.f32 %v728_v63, %v706_v62  ;;  %v726_v26 = vmul.f32 %v1589_v2, %v258_v3  ;;  %v1258_v27 = vmul.f32 %v729_v11, %v729_v11  ;;  %v1227_v30 = vsel %vm1213_vm1, %v729_v11, 0.0  ;;  %v826_v3 = vpop.permute.xlu1 %825 }
 0x29e   :  { %v1265_v37 = vsel %vm1213_vm1, %v1260_v28, 0.0 }
 0x29f   :  { %v738_v9 = vpack.c.bf16 %v732_v16, %v731_v19  ;;  %v730_v18 = vadd.f32 %v726_v26, %v698_v22  ;;  %v1262_v1 = vsel %vm1213_vm1, %v1258_v27, 0.0  ;;  %v1261_v7 = vmul.f32 %v732_v16, %v732_v16  ;;  %v831_v0 = vpop.permute.xlu0 %830 }
 0x2a0   :  { %v1232_v39 = vsel %vm1213_vm1, %v732_v16, 0.0 }
 0x2a1   :  { %1486 = vmatprep.subr.bf16.mxu0 %v738_v9  ;;  %v1228_v14 = vsel %vm1213_vm1, %v730_v18, 0.0  ;;  %v1259_v31 = vmul.f32 %v730_v18, %v730_v18  ;;  %v737_v6 = vpack.c.bf16 %v730_v18, %v729_v11  ;;  %v1267_v50 = vsel %vm1213_vm1, %v1261_v7, 0.0  ;;  %v816_v26 = vpop.permute.xlu1 %815 }
 0x2a2   :  { %1487 = vmatpush3.bf16.msra.mxu0 %v738_v9  ;;  %v1229_v12 = vadd.f32 %v1228_v14, %v1227_v30 }
 0x2a3   :  { %v1263_v5 = vsel %vm1213_vm1, %v1259_v31, 0.0  ;;  %1488 = vmatprep.subr.bf16.mxu0 %v737_v6  ;;  %v821_v19 = vpop.permute.xlu0 %820 }
 0x2a4   :  { %v1231_v33 = vadd.f32 %v1230_v32, %v1229_v12  ;;  %v1264_v34 = vadd.f32 %v1263_v5, %v1262_v1 }
 0x2a6   :  { %1489 = vmatpush3.bf16.msra.mxu0 %v737_v6  ;;  %v2019_v52 = vadd.f32 %v1232_v39, %v1231_v33  ;;  %v1266_v41 = vadd.f32 %v1265_v37, %v1264_v34  ;;  %v806_v33 = vpop.permute.xlu1 %805 }
 0x2a7   :  { %v811_v12 = vpop.permute.xlu0 %810 }
 0x2a8   :  { %v2022_v36 = vadd.f32 %v1267_v50, %v1266_v41 }
 0x2a9   :  { %1491 = vmatmul.mubr.msk.bf16.vlgmr.msra.gmra.mxu0 %vm418_vm0, %v1563_v35 }
 0x2aa   :  { %1494 = vmatprep.mubr.msk.bf16.mxu0 %vm418_vm0, %v1564_v40 }
 0x2ab   :  { %v801_v41 = vpop.permute.xlu0 %800 }
 0x2b1   :  { %1495 = vmatmul.mubr.msk.bf16.gmra.mxu0 %vm418_vm0, %v1565_v38 }
 0x2b2   :  { %1498 = vmatprep.mubr.msk.bf16.mxu0 %vm418_vm0, %v1566_v42 }
 0x2b9   :  { %1499 = vmatmul.mubr.msk.bf16.gmra.mxu0 %vm418_vm0, %v1567_v43  ;;  %v796_v43 = vpop.permute.xlu1 %795 }
 0x2ba   :  { %1502 = vmatprep.mubr.msk.bf16.mxu0 %vm418_vm0, %v1568_v44 }
 0x2c1   :  { %1503 = vmatmul.mubr.msk.bf16.gmra.mxu0 %vm418_vm0, %v1569_v45 }
 0x369   :  { %v2049_v47 = vpop.f32.mrf.mxu0 }
 0x36b   :  { %v2051_v48 = vpop.f32.mrf.mxu0 }
 0x36d   :  { %v1493_v49 = vpop.f32.mrf.mxu0 }
 0x36f   :  { %v2053_v51 = vpop.f32.mrf.mxu0 }
 0x371   :  { %v1496_v54 = vpop.f32.mrf.mxu0 }
 0x372   :  { %v976_v44 = vadd.f32 %v1496_v54, %v806_v33 }
 0x373   :  { %v967_v57 = vpop.f32.mrf.mxu0 }
 0x375   :  { %v1497_v56 = vpop.f32.mrf.mxu0 }
 0x376   :  { %v979_v50 = vadd.f32 %v1497_v56, %v811_v12 }
 0x377   :  { %v970_v60 = vpop.f32.mrf.mxu0 }
 0x378   :  { %v1021_v46 = vmax.f32 %v979_v50, 0.0 }
 0x379   :  { %v1500_v62 = vpop.f32.mrf.mxu0 }
 0x37a   :  { %v992_v32 = vadd.f32 %v1500_v62, %v826_v3  ;;  %v968_v62 = vadd.f32 %v967_v57, %v796_v43 }
 0x37b   :  { %v983_v63 = vpop.f32.mrf.mxu0 }
 0x37c   :  { %v1024_v39 = vmax.f32 %v992_v32, 0.0  ;;  %v984_v40 = vadd.f32 %v983_v63, %v816_v26 }
 0x37d   :  { %v1501_v2 = vpop.f32.mrf.mxu0 }
 0x37e   :  { %v995_v30 = vadd.f32 %v1501_v2, %v831_v0  ;;  %v1022_v45 = vmax.f32 %v984_v40, 0.0  ;;  %v786_v0 = vpop.permute.xlu1 %785 }
 0x37f   :  { %v986_v11 = vpop.f32.mrf.mxu0  ;;  %v960_v56 = vadd.f32 %v2049_v47, %v786_v0  ;;  %v1571_v47 = vld [vmem:[%s2105_s6 + $0x28] sm:$0xff]  }
 0x380   :  { %v1025_v34 = vmax.f32 %v995_v30, 0.0  ;;  %v987_v35 = vadd.f32 %v986_v11, %v821_v19  ;;  %v1018_v11 = vmax.f32 %v968_v62, 0.0 }
 0x381   :  { %v1504_v17 = vpop.f32.mrf.mxu0 }
 0x382   :  { %v1008_v22 = vadd.f32 %v1504_v17, %v846_v55  ;;  %v1035_v38 = vpack.c.bf16 %v1025_v34, %v1024_v39  ;;  %v1023_v42 = vmax.f32 %v987_v35, 0.0 }
 0x383   :  { %v999_v16 = vpop.f32.mrf.mxu0 }
 0x384   :  { %v1000_v27 = vadd.f32 %v999_v16, %v836_v59  ;;  %v1028_v14 = vmax.f32 %v1008_v22, 0.0  ;;  %v1034_v55 = vpack.c.bf16 %v1023_v42, %v1022_v45  ;;  %v1020_v59 = vmax.f32 %v976_v44, 0.0  ;;  %v776_v16 = vpop.permute.xlu1 %775 }
 0x385   :  { %v1505_v9 = vpop.f32.mrf.mxu0  ;;  %v1016_v22 = vmax.f32 %v960_v56, 0.0  ;;  %v952_v57 = vadd.f32 %v2051_v48, %v776_v16  ;;  %v1573_v48 = vld [vmem:[%s2105_s6 + $0x38] sm:$0xff]  }
 0x386   :  { %v1011_v18 = vadd.f32 %v1505_v9, %v851_v53  ;;  %v1026_v1 = vmax.f32 %v1000_v27, 0.0  ;;  %v971_v53 = vadd.f32 %v970_v60, %v801_v41  ;;  %v1033_v2 = vpack.c.bf16 %v1021_v46, %v1020_v59 }
 0x387   :  { %v1002_v28 = vpop.f32.mrf.mxu0  ;;  %v1014_v9 = vmax.f32 %v952_v57, 0.0 }
 0x388   :  { %v1029_v31 = vmax.f32 %v1011_v18, 0.0  ;;  %v1003_v6 = vadd.f32 %v1002_v28, %v841_v58  ;;  %v791_v58 = vpop.permute.xlu0 %790  ;;  %v1019_v3 = vmax.f32 %v971_v53, 0.0  ;;  %v1059_v18 = vpop.permute.xlu1 %1058 }
 0x389   :  { %v963_v63 = vadd.f32 %v1493_v49, %v791_v58 }
 0x38a   :  { %v1037_v7 = vpack.c.bf16 %v1029_v31, %v1028_v14  ;;  %v1027_v5 = vmax.f32 %v1003_v6, 0.0  ;;  %v1032_v60 = vpack.c.bf16 %v1019_v3, %v1018_v11 }
 0x38b   :  { %v1017_v17 = vmax.f32 %v963_v63, 0.0 }
 0x38c   :  { %v1036_v37 = vpack.c.bf16 %v1027_v5, %v1026_v1  ;;  %1506 = vmatprep.subr.bf16.mxu1 %v1037_v7  ;;  %v781_v54 = vpop.permute.xlu0 %780  ;;  %v1069_v30 = vpop.permute.xlu1 %1068 }
 0x38d   :  { %1507 = vmatpush3.bf16.msra.mxu1 %v1037_v7  ;;  %v955_v19 = vadd.f32 %v2053_v51, %v781_v54  ;;  %v1031_v26 = vpack.c.bf16 %v1017_v17, %v1016_v22  ;;  %v1572_v51 = vld [vmem:[%s2105_s6 + $0x30] sm:$0xff]  }
 0x38e   :  { %1508 = vmatprep.subr.bf16.mxu1 %v1036_v37 }
 0x38f   :  { %v1015_v49 = vmax.f32 %v955_v19, 0.0 }
 0x390   :  { %v1064_v28 = vpop.permute.xlu0 %1063  ;;  %v1079_v59 = vpop.permute.xlu1 %1078 }
 0x391   :  { %1509 = vmatpush3.bf16.msra.mxu1 %v1036_v37  ;;  %v1030_v27 = vpack.c.bf16 %v1015_v49, %v1014_v9 }
 0x392   :  { %1510 = vmatprep.subr.bf16.mxu1 %v1035_v38 }
 0x394   :  { %v1074_v32 = vpop.permute.xlu0 %1073 }
 0x395   :  { %1511 = vmatpush3.bf16.msra.mxu1 %v1035_v38 }
 0x396   :  { %1512 = vmatprep.subr.bf16.mxu1 %v1034_v55 }
 0x398   :  { %v1084_v63 = vpop.permute.xlu0 %1083 }
 0x399   :  { %1513 = vmatpush3.bf16.msra.mxu1 %v1034_v55 }
 0x39a   :  { %1514 = vmatprep.subr.bf16.mxu1 %v1033_v2 }
 0x39c   :  { %v1094_v9 = vpop.permute.xlu0 %1093 }
 0x39d   :  { %1515 = vmatpush3.bf16.msra.mxu1 %v1033_v2 }
 0x39e   :  { %1516 = vmatprep.subr.bf16.mxu1 %v1032_v60 }
 0x3a1   :  { %1517 = vmatpush3.bf16.msra.mxu1 %v1032_v60 }
 0x3a2   :  { %1518 = vmatprep.subr.bf16.mxu1 %v1031_v26 }
 0x3a5   :  { %1519 = vmatpush3.bf16.msra.mxu1 %v1031_v26 }
 0x3a6   :  { %1520 = vmatprep.subr.bf16.mxu1 %v1030_v27 }
 0x3a9   :  { %1521 = vmatpush3.bf16.msra.mxu1 %v1030_v27 }
 0x3ac   :  { %1523 = vmatmul.mubr.bf16.vlgmr.msra.gmra.mxu1 %v1571_v47 }
 0x3ad   :  { %1526 = vmatprep.mubr.bf16.mxu1 %v1572_v51 }
 0x3b4   :  { %1527 = vmatmul.mubr.bf16.gmra.mxu1 %v1573_v48 }
 0x46c   :  { %v1524_v14 = vpop.f32.mrf.mxu1 }
 0x46d   :  { %v1163_v31 = vadd.f32 %v1524_v14, %v1069_v30  ;;  %v1269_v30 = vrot.slane %v2022_v36, 4 }
 0x46e   :  { %v1154_v6 = vpop.f32.mrf.mxu1 }
 0x46f   :  { %1590 = vtanh.f32 %v1163_v31  ;;  %v1155_v12 = vadd.f32 %v1154_v6, %v1059_v18 }
 0x470   :  { %v1525_v1 = vpop.f32.mrf.mxu1 }
 0x471   :  { %1592 = vtanh.f32 %v1155_v12  ;;  %v1166_v7 = vadd.f32 %v1525_v1, %v1074_v32 }
 0x472   :  { %v1157_v5 = vpop.f32.mrf.mxu1 }
 0x473   :  { %1594 = vtanh.f32 %v1166_v7  ;;  %v1158_v33 = vadd.f32 %v1157_v5, %v1064_v28  ;;  %v1270_v5 = vadd.f32 %v1269_v30, %v2022_v36 }
 0x474   :  { %v1528_v46 = vpop.f32.mrf.mxu1 }
 0x475   :  { %1596 = vtanh.f32 %v1158_v33 }
 0x476   :  { %v1170_v55 = vpop.f32.mrf.mxu1 }
 0x477   :  { %v1171_v19 = vadd.f32 %v1170_v55, %v1079_v59 }
 0x478   :  { %v1529_v2 = vpop.f32.mrf.mxu1 }
 0x479   :  { %v1182_v47 = vadd.f32 %v1529_v2, %v1094_v9 }
 0x47a   :  { %v1173_v60 = vpop.f32.mrf.mxu1 }
 0x47b   :  { %v1174_v51 = vadd.f32 %v1173_v60, %v1084_v63 }
 0x47c   :  { %v1591_v34 = vpop.eup %1590 }
 0x47d   :  { %v1191_v35 = vmul.f32 1.9, %v1591_v34 }
 0x47e   :  { %v1593_v37 = vpop.eup %1592 }
 0x47f   :  { %v1197_v39 = vmul.f32 1.442695, %v1191_v35  ;;  %v1189_v40 = vmul.f32 1.9, %v1593_v37  ;;  %v1211_v3 = vadd.f32 %v1191_v35, %v1982_v61 }
 0x480   :  { %v1595_v41 = vpop.eup %1594 }
 0x481   :  { %1598 = vpow2.f32 %v1197_v39  ;;  %v1193_v50 = vmul.f32 1.442695, %v1189_v40  ;;  %v1192_v42 = vmul.f32 1.9, %v1595_v41  ;;  %v1209_v58 = vadd.f32 %v1189_v40, %v1987_v8  ;;  %v1089_v8 = vpop.permute.xlu1 %1088 }
 0x482   :  { %v1597_v38 = vpop.eup %1596  ;;  %v1279_v22 = vsel %vm1213_vm1, %v1211_v3, 0.0  ;;  %v1179_v26 = vadd.f32 %v1528_v46, %v1089_v8 }
 0x483   :  { %1600 = vpow2.f32 %v1193_v50  ;;  %v1190_v43 = vmul.f32 1.9, %v1597_v38  ;;  %v1199_v44 = vmul.f32 1.442695, %v1192_v42  ;;  %v1276_v56 = vsel %vm1213_vm1, %v1209_v58, 0.0 }
 0x484   :  { %v1212_v57 = vadd.f32 %v1192_v42, %v1990_v21  ;;  %v1271_v38 = vrot.slane %v1270_v5, 2 }
 0x485   :  { %v1195_v45 = vmul.f32 1.442695, %v1190_v43  ;;  %1602 = vpow2.f32 %v1199_v44  ;;  %v1210_v53 = vadd.f32 %v1190_v43, %v1996_v29 }
 0x486   :  { %v1281_v48 = vsel %vm1213_vm1, %v1212_v57, 0.0  ;;  %v1272_v36 = vadd.f32 %v1271_v38, %v1270_v5 }
 0x487   :  { %1604 = vpow2.f32 %v1195_v45  ;;  %v1277_v62 = vsel %vm1213_vm1, %v1210_v53, 0.0 }
 0x488   :  { %v1278_v54 = vadd.f32 %v1277_v62, %v1276_v56  ;;  %v1273_v2 = vrot.slane %v1272_v36, 1 }
 0x48a   :  { %v1280_v27 = vadd.f32 %v1279_v22, %v1278_v54 }
 0x48c   :  { %v1282_v14 = vadd.f32 %v1281_v48, %v1280_v27 }
 0x48e   :  { %v1599_v0 = vpop.eup %1598  ;;  %v1283_v35 = vrot.slane %v1282_v14, 4 }
 0x48f   :  { %v1203_v17 = vmul.f32 %v1599_v0, %v255_v15 }
 0x490   :  { %v1601_v11 = vpop.eup %1600  ;;  %v1284_v44 = vadd.f32 %v1283_v35, %v1282_v14 }
 0x491   :  { %v1201_v29 = vmul.f32 %v1601_v11, %v253_v24  ;;  %v1207_v15 = vadd.f32 %v1203_v17, %v1179_v26  ;;  %v1234_v24 = vrot.slane %v2019_v52, 4 }
 0x492   :  { %v1603_v16 = vpop.eup %1602  ;;  %v1285_v59 = vrot.slane %v1284_v44, 2 }
 0x493   :  { %v1205_v61 = vadd.f32 %v1201_v29, %v1171_v19  ;;  %v1204_v10 = vmul.f32 %v1603_v16, %v256_v13  ;;  %v1243_v31 = vmul.f32 %v1207_v15, %v1207_v15  ;;  %v1235_v12 = vadd.f32 %v1234_v24, %v2019_v52 }
 0x494   :  { %v1605_v49 = vpop.eup %1604  ;;  %v1286_v11 = vadd.f32 %v1285_v59, %v1284_v44  ;;  %v1274_v29 = vadd.f32 %v1273_v2, %v1272_v36 }
 0x495   :  { %v1202_v20 = vmul.f32 %v1605_v49, %v254_v25  ;;  %v1241_v18 = vmul.f32 %v1205_v61, %v1205_v61  ;;  %v1208_v21 = vadd.f32 %v1204_v10, %v1182_v47  ;;  %v1214_v4 = vsel %vm1213_vm1, %v1205_v61, 0.0 }
 0x496   :  { %v1217_v25 = vsel %vm1213_vm1, %v1207_v15, 0.0  ;;  %v1248_v37 = vsel %vm1213_vm1, %v1243_v31, 0.0  ;;  %v1236_v40 = vrot.slane %v1235_v12, 2  ;;  %v1287_v16 = vrot.slane %v1286_v11, 1 }
 0x497   :  { %v1206_v28 = vadd.f32 %v1202_v20, %v1174_v51  ;;  %v1245_v32 = vsel %vm1213_vm1, %v1241_v18, 0.0  ;;  %v1244_v1 = vmul.f32 %v1208_v21, %v1208_v21  ;;  %v1219_v39 = vsel %vm1213_vm1, %v1208_v21, 0.0 }
 0x498   :  { %v1237_v45 = vadd.f32 %v1236_v40, %v1235_v12  ;;  %v1288_v61 = vadd.f32 %v1287_v16, %v1286_v11 }
 0x499   :  { %v1215_v13 = vsel %vm1213_vm1, %v1206_v28, 0.0  ;;  %v1242_v6 = vmul.f32 %v1206_v28, %v1206_v28  ;;  %v1250_v50 = vsel %vm1213_vm1, %v1244_v1, 0.0 }
 0x49a   :  { %v1216_v23 = vadd.f32 %v1215_v13, %v1214_v4  ;;  %v1238_v62 = vrot.slane %v1237_v45, 1 }
 0x49b   :  { %v1246_v7 = vsel %vm1213_vm1, %v1242_v6, 0.0 }
 0x49c   :  { %v1218_v33 = vadd.f32 %v1217_v25, %v1216_v23  ;;  %v1247_v34 = vadd.f32 %v1246_v7, %v1245_v32  ;;  %v1239_v54 = vadd.f32 %v1238_v62, %v1237_v45 }
 0x49e   :  { %v1220_v41 = vadd.f32 %v1219_v39, %v1218_v33  ;;  %v1249_v52 = vadd.f32 %v1248_v37, %v1247_v34 }
 0x4a0   :  { %v1221_v42 = vrot.slane %v1220_v41, 4  ;;  %v1251_v43 = vadd.f32 %v1250_v50, %v1249_v52 }
 0x4a2   :  { %v1222_v46 = vadd.f32 %v1221_v42, %v1220_v41  ;;  %v1252_v53 = vrot.slane %v1251_v43, 4 }
 0x4a4   :  { %v1223_v55 = vrot.slane %v1222_v46, 2  ;;  %v1253_v58 = vadd.f32 %v1252_v53, %v1251_v43 }
 0x4a6   :  { %v1224_v0 = vadd.f32 %v1223_v55, %v1222_v46  ;;  %v1254_v63 = vrot.slane %v1253_v58, 2 }
 0x4a8   :  { %v1225_v3 = vrot.slane %v1224_v0, 1  ;;  %v1255_v56 = vadd.f32 %v1254_v63, %v1253_v58 }
 0x4aa   :  { %v1226_v17 = vadd.f32 %v1225_v3, %v1224_v0  ;;  %v1256_v19 = vrot.slane %v1255_v56, 1 }
 0x4ac   :  { %v1240_v8 = vadd.f32 %v1239_v54, %v1226_v17  ;;  %v1257_v60 = vadd.f32 %v1256_v19, %v1255_v56 }
 0x4ae   :  { %v1275_v22 = vadd.f32 %v1274_v29, %v1257_v60  ;;  %v1289_v57 = vmul.f32 0.015625, %v1240_v8 }
 0x4b0   :  { %v1290_v26 = vmul.f32 0.5, %v1275_v22 }
 0x4b2   :  { %v1292_v49 = vsel %vm1291_vm2, %v1289_v57, %v1290_v26 }
 0x4b3   :  { %v1294_v9 = vsel %vm1293_vm3, %v1292_v49, %v1288_v61 }
 0x4b4   :  { %1296 = vst.msk [vmem:[%s2106_s8] sm:$0x7] %vm1295_vm4, %v1294_v9 }

// kernel: fastflow_forward.7
= control target key start
LH: loop header
LB: loop body
LE: loop exit
PB: predicated region body
PF: predicated region fallthrough
CT: control target
= control target key end

     0   :  { %v1761_v3 = vmov 0.0   ;;  %v1762_v39 = vmov 2   ;;  %v1763_v40 = vmov 0   ;;  %vm1125_vm0 = vcmask 523264   ;;  %s3228_s1 = inlined_call_operand.vmem [shape: f32[64,1024], index: 1, kind: input, shape index: {}]   ;;  %s3229_s0 = inlined_call_operand.vmem [shape: f32[8,64], index: 0, kind: input, shape index: {}]   ;;  %s3230_s2 = inlined_call_operand.vmem [shape: f32[8,16], index: 2, kind: input, shape index: {}]   ;;  %s3231_s4 = inlined_call_operand.vmem [shape: f32[8,4], index: 4, kind: input, shape index: {}]   ;;  %s3232_s3 = inlined_call_operand.vmem [shape: f32[16,1024], index: 3, kind: input, shape index: {}]   ;;  %s3233_s5 = inlined_call_operand.vmem [shape: f32[4,1024], index: 5, kind: input, shape index: {}]   ;;  %s3234_s6 = inlined_call_operand.vmem [shape: f32[8,1024], index: 6, kind: output, shape index: {}]  }
   0x1   :  { %v83_v0 = vld [vmem:[%s3228_s1 + $0x1c8] sm:$0xff]  ;;  %v85_v1 = vld [vmem:[%s3228_s1 + $0x1d8] sm:$0xff]  ;;  %v82_v2 = vld [vmem:[%s3228_s1 + $0x1c0] sm:$0xff]  ;;  %1193 = vmatprep.mubr.f32.mxu0 %v1761_v3  ;;  %1264 = vmatprep.mubr.f32.mxu1 %v1761_v3 }
   0x2   :  { %1145 = vmatprep.subr.mxu0 %v83_v0  ;;  %1216 = vmatprep.subr.mxu1 %v85_v1  ;;  %v84_v4 = vld [vmem:[%s3228_s1 + $0x1d0] sm:$0xff]  ;;  %v75_v5 = vld [vmem:[%s3228_s1 + $0x188] sm:$0xff]  ;;  %v77_v6 = vld [vmem:[%s3228_s1 + $0x198] sm:$0xff] }
   0x3   :  { %1146 = vmatpush1.msra.mxu0 %v82_v2  ;;  %1217 = vmatpush1.msra.mxu1 %v84_v4  ;;  %v74_v7 = vld [vmem:[%s3228_s1 + $0x180] sm:$0xff]  ;;  %v76_v8 = vld [vmem:[%s3228_s1 + $0x190] sm:$0xff]  ;;  %v67_v9 = vld [vmem:[%s3228_s1 + $0x148] sm:$0xff]  ;;  %v1764_v2 = vmov 3  }
   0x4   :  { %1147 = vmatprep.subr.mxu0 %v75_v5  ;;  %1218 = vmatprep.subr.mxu1 %v77_v6  ;;  %v69_v10 = vld [vmem:[%s3228_s1 + $0x158] sm:$0xff]  ;;  %v66_v11 = vld [vmem:[%s3228_s1 + $0x140] sm:$0xff]  ;;  %v68_v12 = vld [vmem:[%s3228_s1 + $0x150] sm:$0xff] }
   0x5   :  { %1148 = vmatpush1.msra.mxu0 %v74_v7  ;;  %1219 = vmatpush1.msra.mxu1 %v76_v8  ;;  %v59_v13 = vld [vmem:[%s3228_s1 + $0x108] sm:$0xff]  ;;  %v61_v14 = vld [vmem:[%s3228_s1 + $0x118] sm:$0xff]  ;;  %v58_v15 = vld [vmem:[%s3228_s1 + $0x100] sm:$0xff] }
   0x6   :  { %1149 = vmatprep.subr.mxu0 %v67_v9  ;;  %1220 = vmatprep.subr.mxu1 %v69_v10  ;;  %v60_v16 = vld [vmem:[%s3228_s1 + $0x110] sm:$0xff]  ;;  %v51_v17 = vld [vmem:[%s3228_s1 + $0xc8] sm:$0xff]  ;;  %v53_v18 = vld [vmem:[%s3228_s1 + $0xd8] sm:$0xff] }
   0x7   :  { %1150 = vmatpush1.msra.mxu0 %v66_v11  ;;  %1221 = vmatpush1.msra.mxu1 %v68_v12  ;;  %v50_v19 = vld [vmem:[%s3228_s1 + $0xc0] sm:$0xff]  ;;  %v52_v20 = vld [vmem:[%s3228_s1 + $0xd0] sm:$0xff]  ;;  %v43_v21 = vld [vmem:[%s3228_s1 + $0x88] sm:$0xff]  ;;  %v1765_v11 = vmov 4   ;;  %v1766_v12 = vmov 6  }
   0x8   :  { %1151 = vmatprep.subr.mxu0 %v59_v13  ;;  %1222 = vmatprep.subr.mxu1 %v61_v14  ;;  %v45_v22 = vld [vmem:[%s3228_s1 + $0x98] sm:$0xff]  ;;  %v42_v23 = vld [vmem:[%s3228_s1 + $0x80] sm:$0xff]  ;;  %v44_v24 = vld [vmem:[%s3228_s1 + $0x90] sm:$0xff]  ;;  %v1767_v13 = vmov 1   ;;  %v1769_v14 = vmov 5  }
   0x9   :  { %1152 = vmatpush1.msra.mxu0 %v58_v15  ;;  %1223 = vmatpush1.msra.mxu1 %v60_v16  ;;  %v35_v25 = vld [vmem:[%s3228_s1 + $0x48] sm:$0xff]  ;;  %v37_v26 = vld [vmem:[%s3228_s1 + $0x58] sm:$0xff]  ;;  %v23_v27 = vld [vmem:[%s3229_s0] sm:$0xff]  ;;  %v1770_v16 = vmov 9  }
   0xa   :  { %1153 = vmatprep.subr.mxu0 %v51_v17  ;;  %1224 = vmatprep.subr.mxu1 %v53_v18  ;;  %v34_v28 = vld [vmem:[%s3228_s1 + $0x40] sm:$0xff]  ;;  %v36_v29 = vld [vmem:[%s3228_s1 + $0x50] sm:$0xff]  ;;  %v24_v30 = vmul.f32 1.442695, %v23_v27  ;;  %v27_v31 = vld [vmem:[%s3228_s1 + $0x8] sm:$0xff]  ;;  %v1771_v17 = vmov 8  }
   0xb   :  { %1154 = vmatpush1.msra.mxu0 %v50_v19  ;;  %1225 = vmatpush1.msra.mxu1 %v52_v20  ;;  %v29_v32 = vld [vmem:[%s3228_s1 + $0x18] sm:$0xff]  ;;  %v26_v33 = vld [vmem:[%s3228_s1] sm:$0xff]  ;;  %v28_v34 = vld [vmem:[%s3228_s1 + $0x10] sm:$0xff]  ;;  %v1772_v19 = vmov 10   ;;  %v1773_v20 = vmov 11  }
   0xc   :  { %1155 = vmatprep.subr.mxu0 %v43_v21  ;;  %1226 = vmatprep.subr.mxu1 %v45_v22  ;;  %1755 = vpow2.f32 %v24_v30  ;;  %v87_v35 = vld [vmem:[%s3228_s1 + $0x1e8] sm:$0xff]  ;;  %v89_v36 = vld [vmem:[%s3228_s1 + $0x1f8] sm:$0xff]  ;;  %v90_v37 = vld [vmem:[%s3230_s2] sm:$0xff]  ;;  %v1774_v21 = vmov 12   ;;  %v1775_v22 = vmov 14  }
   0xd   :  { %1156 = vmatpush1.msra.mxu0 %v42_v23  ;;  %1227 = vmatpush1.msra.mxu1 %v44_v24  ;;  %v91_v38 = vmul.f32 1.442695, %v90_v37  ;;  %v86_v41 = vld [vmem:[%s3228_s1 + $0x1e0] sm:$0xff]  ;;  %v88_v42 = vld [vmem:[%s3228_s1 + $0x1f0] sm:$0xff]  ;;  %v79_v44 = vld [vmem:[%s3228_s1 + $0x1a8] sm:$0xff]  ;;  %v1776_v23 = vmov 13  }
   0xe   :  { %1157 = vmatprep.subr.mxu0 %v35_v25  ;;  %1228 = vmatprep.subr.mxu1 %v37_v26  ;;  %v81_v45 = vld [vmem:[%s3228_s1 + $0x1b8] sm:$0xff]  ;;  %v78_v46 = vld [vmem:[%s3228_s1 + $0x1a0] sm:$0xff]  ;;  %v80_v47 = vld [vmem:[%s3228_s1 + $0x1b0] sm:$0xff]  ;;  %v1777_v24 = vmov 15   ;;  %v102_v26 = vlaneseq }
   0xf   :  { %1158 = vmatpush1.msra.mxu0 %v34_v28  ;;  %1229 = vmatpush1.msra.mxu1 %v36_v29  ;;  %1757 = vpow2.f32 %v91_v38  ;;  %v71_v48 = vld [vmem:[%s3228_s1 + $0x168] sm:$0xff]  ;;  %v73_v49 = vld [vmem:[%s3228_s1 + $0x178] sm:$0xff]  ;;  %v70_v50 = vld [vmem:[%s3228_s1 + $0x160] sm:$0xff] }
  0x10   :  { %1159 = vmatprep.subr.mxu0 %v27_v31  ;;  %1230 = vmatprep.subr.mxu1 %v29_v32  ;;  %v72_v51 = vld [vmem:[%s3228_s1 + $0x170] sm:$0xff]  ;;  %v63_v52 = vld [vmem:[%s3228_s1 + $0x128] sm:$0xff]  ;;  %v65_v53 = vld [vmem:[%s3228_s1 + $0x138] sm:$0xff]  ;;  %v103_v27 = vshrl.u32 %v102_v26, 7 }
  0x11   :  { %1160 = vmatpush1.msra.mxu0 %v26_v33  ;;  %1231 = vmatpush1.msra.mxu1 %v28_v34  ;;  %v62_v55 = vld [vmem:[%s3228_s1 + $0x120] sm:$0xff]  ;;  %v64_v56 = vld [vmem:[%s3228_s1 + $0x130] sm:$0xff]  ;;  %v55_v57 = vld [vmem:[%s3228_s1 + $0xe8] sm:$0xff] }
  0x12   :  { %1287 = vmatprep.subr.mxu0 %v87_v35  ;;  %1358 = vmatprep.subr.mxu1 %v89_v36  ;;  %v57_v58 = vld [vmem:[%s3228_s1 + $0xf8] sm:$0xff]  ;;  %v54_v59 = vld [vmem:[%s3228_s1 + $0xe0] sm:$0xff]  ;;  %v56_v60 = vld [vmem:[%s3228_s1 + $0xf0] sm:$0xff]  ;;  %v2065_v32 = vsub.s32 0, %v103_v27  ;;  %v2075_v36 = vsub.s32 1, %v103_v27  ;;  %v2077_v37 = vsub.s32 2, %v103_v27 }
  0x13   :  { %1736 = vset.pattern.permute.xlu1 %v1762_v39  ;;  %1734 = vset.pattern.permute.xlu0 %v1763_v40  ;;  %v47_v61 = vld [vmem:[%s3228_s1 + $0xa8] sm:$0xff]  ;;  %v49_v62 = vld [vmem:[%s3228_s1 + $0xb8] sm:$0xff]  ;;  %v46_v63 = vld [vmem:[%s3228_s1 + $0xa0] sm:$0xff]  ;;  %v2079_v38 = vsub.s32 3, %v103_v27 }
  0x14   :  { %v48_v0 = vld [vmem:[%s3228_s1 + $0xb0] sm:$0xff]  ;;  %v39_v1 = vld [vmem:[%s3228_s1 + $0x68] sm:$0xff]  ;;  %v41_v4 = vld [vmem:[%s3228_s1 + $0x78] sm:$0xff] }
  0x15   :  { %v38_v5 = vld [vmem:[%s3228_s1 + $0x60] sm:$0xff]  ;;  %v40_v6 = vld [vmem:[%s3228_s1 + $0x70] sm:$0xff]  ;;  %v31_v7 = vld [vmem:[%s3228_s1 + $0x28] sm:$0xff] }
  0x16   :  { %v33_v8 = vld [vmem:[%s3228_s1 + $0x38] sm:$0xff]  ;;  %v30_v9 = vld [vmem:[%s3228_s1 + $0x20] sm:$0xff]  ;;  %v32_v10 = vld [vmem:[%s3228_s1 + $0x30] sm:$0xff] }
  0x17   :  { %v1413_v15 = vld [vmem:[%s3231_s4] sm:$0xff] }
  0x18   :  { %v1414_v18 = vmul.f32 1.442695, %v1413_v15  ;;  %v1682_v28 = vld [vmem:[%s3232_s3 + $0x2] ss:$8 sm:$0xf] }
  0x19   :  { %v1931_v43 = vpop.eup %1755  ;;  %v1683_v29 = vld [vmem:[%s3232_s3 + $0x2] ss:$8 sm:$0xf0]  ;;  %v1684_v30 = vld [vmem:[%s3232_s3 + $0x3] ss:$8 sm:$0xf] }
  0x1a   :  { %1710 = vmatmul.mubr.msk.f32.vlgmr.msra.gmra.mxu0 %vm1125_vm0, %v1931_v43  ;;  %1711 = vmatmul.mubr.msk.f32.vlgmr.msra.gmra.mxu1 %vm1125_vm0, %v1931_v43  ;;  %1759 = vpow2.f32 %v1414_v18  ;;  %v1685_v31 = vld [vmem:[%s3232_s3 + $0x3] ss:$8 sm:$0xf0]  ;;  %v2067_v33 = vor.u32 %v1683_v29, %v1682_v28  ;;  %v93_v34 = vld [vmem:[%s3232_s3] ss:$8 sm:$0xf] }
  0x1b   :  { %1288 = vmatpush1.msra.mxu0 %v86_v41  ;;  %1359 = vmatpush1.msra.mxu1 %v88_v42  ;;  %v94_v35 = vld [vmem:[%s3232_s3] ss:$8 sm:$0xf0]  ;;  %v2085_v41 = vsub.s32 5, %v103_v27  ;;  %v2087_v42 = vsub.s32 6, %v103_v27 }
  0x1c   :  { %1289 = vmatprep.subr.mxu0 %v79_v44  ;;  %1360 = vmatprep.subr.mxu1 %v81_v45  ;;  %v1967_v54 = vpop.eup %1757  ;;  %v227_v44 = vrot.slane %v2067_v33, %v2065_v32  ;;  %v231_v45 = vrot.slane %v2067_v33, %v2075_v36  ;;  %v1689_v28 = vld [vmem:[%s3232_s3 + $0x5] ss:$8 sm:$0xf0] }
  0x1d   :  { %1290 = vmatpush1.msra.mxu0 %v78_v46  ;;  %1361 = vmatpush1.msra.mxu1 %v80_v47  ;;  %3262 = vst [vmem:[#allocation2_spill] sm:$0xff] %v2085_v41  ;;  %v2095_v46 = vor.u32 %v94_v35, %v93_v34  ;;  %v1686_v47 = vld [vmem:[%s3232_s3 + $0x4] ss:$8 sm:$0xf] }
  0x1e   :  { %1291 = vmatprep.subr.mxu0 %v71_v48  ;;  %1362 = vmatprep.subr.mxu1 %v73_v49  ;;  %v1687_v48 = vld [vmem:[%s3232_s3 + $0x4] ss:$8 sm:$0xf0]  ;;  %v235_v49 = vrot.slane %v2067_v33, %v2077_v37 }
  0x1f   :  { %1292 = vmatpush1.msra.mxu0 %v70_v50  ;;  %1363 = vmatpush1.msra.mxu1 %v72_v51  ;;  %v239_v50 = vrot.slane %v2067_v33, %v2079_v38 }
  0x20   :  { %1293 = vmatprep.subr.mxu0 %v63_v52  ;;  %1364 = vmatprep.subr.mxu1 %v65_v53  ;;  %v247_v52 = vrot.slane %v2067_v33, %v2085_v41  ;;  %v251_v53 = vrot.slane %v2067_v33, %v2087_v42 }
  0x21   :  { %220 = vperm.xlu1 %1736, %v1967_v54   ;;  %1294 = vmatpush1.msra.mxu0 %v62_v55 }
  0x22   :  { %1365 = vmatpush1.msra.mxu1 %v64_v56  ;;  %1295 = vmatprep.subr.mxu0 %v55_v57  ;;  %v1680_v57 = vld [vmem:[%s3232_s3 + $0x1] ss:$8 sm:$0xf] }
  0x23   :  { %1366 = vmatprep.subr.mxu1 %v57_v58  ;;  %1296 = vmatpush1.msra.mxu0 %v54_v59  ;;  %v1681_v58 = vld [vmem:[%s3232_s3 + $0x1] ss:$8 sm:$0xf0] }
  0x24   :  { %1367 = vmatpush1.msra.mxu1 %v56_v60  ;;  %1297 = vmatprep.subr.mxu0 %v47_v61 }
  0x25   :  { %1368 = vmatprep.subr.mxu1 %v49_v62  ;;  %1737 = vset.pattern.permute.xlu1 %v1764_v2  ;;  %v2131_v62 = vor.u32 %v1687_v48, %v1686_v47 }
  0x26   :  { %1298 = vmatpush1.msra.mxu0 %v46_v63  ;;  %1369 = vmatpush1.msra.mxu1 %v48_v0 }
  0x27   :  { %285 = vperm.xlu1 %1737, %v1967_v54   ;;  %1299 = vmatprep.subr.mxu0 %v39_v1  ;;  %v1760_v25 = vpop.eup %1759 }
  0x28   :  { %1370 = vmatprep.subr.mxu1 %v41_v4  ;;  %1300 = vmatpush1.msra.mxu0 %v38_v5  ;;  %v1690_v4 = vld [vmem:[%s3232_s3 + $0x6] ss:$8 sm:$0xf] }
  0x29   :  { %1371 = vmatpush1.msra.mxu1 %v40_v6  ;;  %1301 = vmatprep.subr.mxu0 %v31_v7  ;;  %v1691_v5 = vld [vmem:[%s3232_s3 + $0x6] ss:$8 sm:$0xf0]  ;;  %v109_v6 = vrot.slane %v2095_v46, %v2075_v36  ;;  %v113_v7 = vrot.slane %v2095_v46, %v2077_v37 }
  0x2a   :  { %1372 = vmatprep.subr.mxu1 %v33_v8  ;;  %1302 = vmatpush1.msra.mxu0 %v30_v9  ;;  %v117_v8 = vrot.slane %v2095_v46, %v2079_v38  ;;  %v2153_v9 = vor.u32 %v1681_v58, %v1680_v57  ;;  %v2175_v18 = vor.u32 %v1691_v5, %v1690_v4  ;;  %v1694_v58 = vld [vmem:[%s3232_s3 + $0x40] ss:$8 sm:$0xf]  ;;  %v1696_v57 = vld [vmem:[%s3232_s3 + $0x41] ss:$8 sm:$0xf] }
  0x2b   :  { %1335 = vmatprep.mubr.f32.mxu0 %v1761_v3  ;;  %1373 = vmatpush1.msra.mxu1 %v32_v10  ;;  %v1695_v4 = vld [vmem:[%s3232_s3 + $0x40] ss:$8 sm:$0xf0] }
  0x2c   :  { %1406 = vmatprep.mubr.f32.mxu1 %v1761_v3  ;;  %1738 = vset.pattern.permute.xlu1 %v1765_v11  ;;  %v1768_v3 = vmov 7   ;;  %v125_v11 = vrot.slane %v2095_v46, %v2085_v41  ;;  %3264 = vst [vmem:[#allocation4_spill] sm:$0xff] %v2175_v18  ;;  %v170_v29 = vrot.slane %v2153_v9, %v2077_v37 }
  0x2d   :  { %1712 = vmatmul.mubr.msk.f32.vlgmr.msra.gmra.mxu0 %vm1125_vm0, %v1931_v43  ;;  %1713 = vmatmul.mubr.msk.f32.vlgmr.msra.gmra.mxu1 %vm1125_vm0, %v1931_v43  ;;  %v2089_v43 = vsub.s32 7, %v103_v27 }
  0x2e   :  { %350 = vperm.xlu1 %1738, %v1967_v54   ;;  %98 = vperm.xlu0 %1734, %v1967_v54  }
  0x2f   :  { %3263 = vst [vmem:[#allocation3_spill] sm:$0xff] %v2089_v43 }
  0x32   :  { %1740 = vset.pattern.permute.xlu1 %v1766_v12  ;;  %1735 = vset.pattern.permute.xlu0 %v1767_v13  ;;  %v129_v12 = vrot.slane %v2095_v46, %v2087_v42 }
  0x33   :  { %480 = vperm.xlu1 %1740, %v1967_v54   ;;  %155 = vperm.xlu0 %1735, %v1967_v54  }
  0x37   :  { %1741 = vset.pattern.permute.xlu1 %v1768_v3  ;;  %1739 = vset.pattern.permute.xlu0 %v1769_v14  ;;  %v1692_v3 = vld [vmem:[%s3232_s3 + $0x7] ss:$8 sm:$0xf] }
  0x38   :  { %545 = vperm.xlu1 %1741, %v1967_v54   ;;  %415 = vperm.xlu0 %1739, %v1967_v54   ;;  %v1693_v14 = vld [vmem:[%s3232_s3 + $0x7] ss:$8 sm:$0xf0] }
  0x39   :  { %v2191_v26 = vor.u32 %v1693_v14, %v1692_v3  ;;  %v1699_v14 = vld [vmem:[%s3232_s3 + $0x42] ss:$8 sm:$0xf0] }
  0x3c   :  { %1743 = vset.pattern.permute.xlu1 %v1770_v16  ;;  %1742 = vset.pattern.permute.xlu0 %v1771_v17  ;;  %v1703_v17 = vld [vmem:[%s3232_s3 + $0x44] ss:$8 sm:$0xf0] }
  0x3d   :  { %675 = vperm.xlu1 %1743, %v1967_v54   ;;  %610 = vperm.xlu0 %1742, %v1967_v54  }
  0x41   :  { %1744 = vset.pattern.permute.xlu1 %v1772_v19  ;;  %1745 = vset.pattern.permute.xlu0 %v1773_v20  ;;  %v1701_v20 = vld [vmem:[%s3232_s3 + $0x43] ss:$8 sm:$0xf0]  ;;  %v2267_v19 = vor.u32 %v1695_v4, %v1694_v58 }
  0x42   :  { %740 = vperm.xlu1 %1744, %v1967_v54   ;;  %805 = vperm.xlu0 %1745, %v1967_v54  }
  0x46   :  { %1746 = vset.pattern.permute.xlu1 %v1774_v21  ;;  %1748 = vset.pattern.permute.xlu0 %v1775_v22  ;;  %v1700_v21 = vld [vmem:[%s3232_s3 + $0x43] ss:$8 sm:$0xf] }
  0x47   :  { %870 = vperm.xlu1 %1746, %v1967_v54   ;;  %1000 = vperm.xlu0 %1748, %v1967_v54   ;;  %v2297_v58 = vor.u32 %v1701_v20, %v1700_v21  ;;  %v1708_v20 = vld [vmem:[%s3232_s3 + $0x47] ss:$8 sm:$0xf] }
  0x48   :  { %v1709_v21 = vld [vmem:[%s3232_s3 + $0x47] ss:$8 sm:$0xf0] }
  0x49   :  { %v2337_v15 = vor.u32 %v1709_v21, %v1708_v20  ;;  %v2383_v20 = vld [vmem:[%s3233_s5 + $0x1] ss:$4 sm:$0xff]  ;;  %v2388_v21 = vld [vmem:[%s3233_s5 + $0x2] ss:$4 sm:$0xff] }
  0x4a   :  { %3270 = vst [vmem:[#allocation10_spill] sm:$0xff] %v2383_v20  ;;  %3271 = vst [vmem:[#allocation11_spill] sm:$0xff] %v2388_v21 }
  0x4b   :  { %1747 = vset.pattern.permute.xlu1 %v1776_v23  ;;  %1751 = vset.pattern.permute.xlu0 %v1777_v24  ;;  %v162_v24 = vrot.slane %v2153_v9, %v2065_v32  ;;  %v1697_v23 = vld [vmem:[%s3232_s3 + $0x41] ss:$8 sm:$0xf0]  ;;  %3268 = vst [vmem:[#allocation8_spill] sm:$0xff] %v2337_v15 }
  0x4c   :  { %935 = vperm.xlu1 %1747, %v1967_v54   ;;  %1065 = vperm.xlu0 %1751, %v1967_v54   ;;  %v255_v54 = vrot.slane %v2067_v33, %v2089_v43  ;;  %v2269_v3 = vor.u32 %v1697_v23, %v1696_v57  ;;  %v1704_v23 = vld [vmem:[%s3232_s3 + $0x45] ss:$8 sm:$0xf] }
  0x4d   :  { %v1705_v57 = vld [vmem:[%s3232_s3 + $0x45] ss:$8 sm:$0xf0] }
  0x4e   :  { %v2323_v5 = vor.u32 %v1705_v57, %v1704_v23  ;;  %v2372_v57 = vld [vmem:[%s3233_s5] ss:$4 sm:$0xff]  ;;  %v2393_v23 = vld [vmem:[%s3233_s5 + $0x3] ss:$4 sm:$0xff] }
  0x4f   :  { %3269 = vst [vmem:[#allocation9_spill] sm:$0xff] %v2372_v57  ;;  %3272 = vst [vmem:[#allocation12_spill] sm:$0xff] %v2393_v23 }
  0x50   :  { %1749 = vset.pattern.permute.xlu1 %v1763_v40  ;;  %1754 = vset.pattern.permute.xlu0 %v1764_v2  ;;  %v2083_v40 = vsub.s32 4, %v103_v27  ;;  %v1688_v27 = vld [vmem:[%s3232_s3 + $0x5] ss:$8 sm:$0xf]  ;;  %3266 = vst [vmem:[#allocation6_spill] sm:$0xff] %v2323_v5 }
  0x51   :  { %1419 = vperm.xlu1 %1749, %v1760_v25   ;;  %v2227_v48 = vor.u32 %v1689_v28, %v1688_v27  ;;  %v1698_v28 = vld [vmem:[%s3232_s3 + $0x42] ss:$8 sm:$0xf]  ;;  %v1702_v27 = vld [vmem:[%s3232_s3 + $0x44] ss:$8 sm:$0xf] }
  0x52   :  { %v243_v51 = vrot.slane %v2067_v33, %v2083_v40  ;;  %v121_v10 = vrot.slane %v2095_v46, %v2083_v40  ;;  %v2283_v4 = vor.u32 %v1699_v14, %v1698_v28  ;;  %v1706_v14 = vld [vmem:[%s3232_s3 + $0x46] ss:$8 sm:$0xf]  ;;  %v2311_v22 = vor.u32 %v1703_v17, %v1702_v27 }
  0x53   :  { %3265 = vst [vmem:[#allocation5_spill] sm:$0xff] %v2227_v48  ;;  %v1707_v28 = vld [vmem:[%s3232_s3 + $0x46] ss:$8 sm:$0xf0]  ;;  %v3276_v17 = vrot.slane %v2153_v9, %v2089_v43 }
  0x54   :  { %v2329_v16 = vor.u32 %v1707_v28, %v1706_v14 }
  0x55   :  { %1750 = vset.pattern.permute.xlu1 %v1767_v13  ;;  %v133_v13 = vrot.slane %v2095_v46, %v2089_v43 }
  0x56   :  { %1474 = vperm.xlu1 %1750, %v1760_v25   ;;  %3267 = vst [vmem:[#allocation7_spill] sm:$0xff] %v2329_v16 }
  0x5a   :  { %1752 = vset.pattern.permute.xlu1 %v1762_v39  ;;  %v2081_v39 = vor.u32 %v1685_v31, %v1684_v30  ;;  %v174_v30 = vrot.slane %v2153_v9, %v2079_v38  ;;  %v178_v31 = vrot.slane %v2153_v9, %v2083_v40 }
  0x5b   :  { %1537 = vperm.xlu1 %1752, %v1760_v25  }
  0x5c   :  { %v292_v55 = vrot.slane %v2081_v39, %v2065_v32  ;;  %v296_v56 = vrot.slane %v2081_v39, %v2075_v36  ;;  %v300_v59 = vrot.slane %v2081_v39, %v2077_v37  ;;  %v304_v60 = vrot.slane %v2081_v39, %v2079_v38 }
  0x5d   :  { %v308_v61 = vrot.slane %v2081_v39, %v2083_v40 }
  0x5f   :  { %1753 = vset.pattern.permute.xlu1 %v1764_v2  ;;  %v105_v2 = vrot.slane %v2095_v46, %v2065_v32 }
  0x60   :  { %1600 = vperm.xlu1 %1753, %v1760_v25   ;;  %v166_v25 = vrot.slane %v2153_v9, %v2075_v36 }
  0x9c   :  { %v221_v47 = vpop.permute.xlu1 %220 }
  0x9d   :  { %v264_v28 = vmul.f32 %v227_v44, %v221_v47  ;;  %v265_v63 = vmul.f32 %v231_v45, %v221_v47  ;;  %v266_v0 = vmul.f32 %v235_v49, %v221_v47  ;;  %v267_v44 = vmul.f32 %v239_v50, %v221_v47 }
  0x9e   :  { %v268_v1 = vmul.f32 %v243_v51, %v221_v47  ;;  %v269_v27 = vmul.f32 %v247_v52, %v221_v47  ;;  %v270_v45 = vmul.f32 %v251_v53, %v221_v47  ;;  %v271_v49 = vmul.f32 %v255_v54, %v221_v47 }
  0xa2   :  { %v2475_v35 = vpop.permute.xlu1 %285 }
  0xa3   :  { %v329_v50 = vmul.f32 %v292_v55, %v2475_v35  ;;  %v330_v51 = vmul.f32 %v296_v56, %v2475_v35  ;;  %v331_v52 = vmul.f32 %v300_v59, %v2475_v35  ;;  %v332_v33 = vmul.f32 %v304_v60, %v2475_v35 }
  0xa4   :  { %v333_v53 = vmul.f32 %v308_v61, %v2475_v35 }
  0xa9   :  { %v99_v14 = vpop.permute.xlu0 %98  ;;  %v351_v34 = vpop.permute.xlu1 %350 }
  0xaa   :  { %v142_v54 = vmul.f32 %v105_v2, %v99_v14  ;;  %v143_v55 = vmul.f32 %v109_v6, %v99_v14  ;;  %v144_v56 = vmul.f32 %v113_v7, %v99_v14  ;;  %v145_v59 = vmul.f32 %v117_v8, %v99_v14 }
  0xab   :  { %v146_v60 = vmul.f32 %v121_v10, %v99_v14  ;;  %v147_v61 = vmul.f32 %v125_v11, %v99_v14  ;;  %v148_v2 = vmul.f32 %v129_v12, %v99_v14  ;;  %v149_v6 = vmul.f32 %v133_v13, %v99_v14 }
  0xac   :  { %v3274_v13 = vrot.slane %v2153_v9, %v2085_v41  ;;  %v3275_v14 = vrot.slane %v2153_v9, %v2087_v42  ;;  %v3279_v9 = vrot.slane %v2081_v39, %v2089_v43 }
  0xae   :  { %v156_v7 = vpop.permute.xlu0 %155  ;;  %v2599_v47 = vpop.permute.xlu1 %480 }
  0xaf   :  { %3273 = vst [vmem:[#allocation13_spill] sm:$0xff] %v2599_v47  ;;  %v199_v8 = vmul.f32 %v162_v24, %v156_v7  ;;  %v200_v10 = vmul.f32 %v166_v25, %v156_v7  ;;  %v201_v11 = vmul.f32 %v170_v29, %v156_v7  ;;  %v202_v46 = vmul.f32 %v174_v30, %v156_v7 }
  0xb0   :  { %v203_v12 = vmul.f32 %v178_v31, %v156_v7  ;;  %v204_v24 = vmul.f32 %v3274_v13, %v156_v7  ;;  %v205_v25 = vmul.f32 %v3275_v14, %v156_v7  ;;  %v206_v29 = vmul.f32 %v3276_v17, %v156_v7 }
  0xb1   :  { %v207_v23 = vadd.f32 %v199_v8, %v142_v54  ;;  %v208_v21 = vadd.f32 %v200_v10, %v143_v55  ;;  %v209_v20 = vadd.f32 %v201_v11, %v144_v56  ;;  %v210_v30 = vadd.f32 %v202_v46, %v145_v59 }
  0xb2   :  { %v3277_v31 = vrot.slane %v2081_v39, %v2085_v41  ;;  %v3278_v13 = vrot.slane %v2081_v39, %v2087_v42  ;;  %v211_v5 = vadd.f32 %v203_v12, %v146_v60  ;;  %v213_v14 = vadd.f32 %v205_v25, %v148_v2 }
  0xb3   :  { %v336_v17 = vmul.f32 %v3279_v9, %v2475_v35  ;;  %v3280_v54 = vrot.slane %v2131_v62, %v2065_v32  ;;  %v212_v56 = vadd.f32 %v204_v24, %v147_v61  ;;  %v214_v59 = vadd.f32 %v206_v29, %v149_v6  ;;  %v2640_v7 = vpop.permute.xlu1 %545  ;;  %v2654_v25 = vpop.permute.xlu0 %415 }
  0xb4   :  { %v334_v57 = vmul.f32 %v3277_v31, %v2475_v35  ;;  %v335_v15 = vmul.f32 %v3278_v13, %v2475_v35  ;;  %v3281_v8 = vrot.slane %v2131_v62, %v2075_v36  ;;  %v3282_v60 = vrot.slane %v2131_v62, %v2077_v37  ;;  %3285 = vst [vmem:[#allocation14_spill] sm:$0xff] %v2654_v25 }
  0xb5   :  { %v394_v55 = vmul.f32 %v3280_v54, %v351_v34  ;;  %v3283_v39 = vrot.slane %v2131_v62, %v2079_v38  ;;  %v3284_v11 = vrot.slane %v2131_v62, %v2083_v40  ;;  %v272_v61 = vadd.f32 %v264_v28, %v207_v23 }
  0xb6   :  { %v395_v10 = vmul.f32 %v3281_v8, %v351_v34  ;;  %v396_v2 = vmul.f32 %v3282_v60, %v351_v34  ;;  %v273_v6 = vadd.f32 %v265_v63, %v208_v21  ;;  %v274_v12 = vadd.f32 %v266_v0, %v209_v20 }
  0xb7   :  { %v397_v35 = vmul.f32 %v3283_v39, %v351_v34  ;;  %v398_v46 = vmul.f32 %v3284_v11, %v351_v34  ;;  %v275_v24 = vadd.f32 %v267_v44, %v210_v30  ;;  %v3286_v29 = vrot.slane %v2131_v62, %v2085_v41 }
  0xb8   :  { %v3287_v13 = vrot.slane %v2131_v62, %v2087_v42  ;;  %v276_v54 = vadd.f32 %v268_v1, %v211_v5  ;;  %v278_v8 = vadd.f32 %v270_v45, %v213_v14  ;;  %v3288_v60 = vrot.slane %v2131_v62, %v2089_v43  ;;  %v2691_v45 = vpop.permute.xlu1 %675 }
  0xb9   :  { %v399_v31 = vmul.f32 %v3286_v29, %v351_v34  ;;  %v277_v63 = vadd.f32 %v269_v27, %v212_v56  ;;  %v279_v0 = vadd.f32 %v271_v49, %v214_v59  ;;  %v3290_v23 = vrot.slane %v2175_v18, %v2065_v32  ;;  %v2693_v59 = vpop.permute.xlu0 %610 }
  0xba   :  { %v400_v9 = vmul.f32 %v3287_v13, %v351_v34  ;;  %v2665_v39 = vmul.f32 %v3288_v60, %v351_v34  ;;  %v3291_v20 = vrot.slane %v2175_v18, %v2075_v36  ;;  %v3292_v1 = vrot.slane %v2175_v18, %v2077_v37 }
  0xbb   :  { %v524_v28 = vmul.f32 %v3290_v23, %v2599_v47  ;;  %v3293_v62 = vrot.slane %v2175_v18, %v2079_v38  ;;  %v3294_v27 = vrot.slane %v2175_v18, %v2083_v40  ;;  %v337_v49 = vadd.f32 %v329_v50, %v272_v61 }
  0xbc   :  { %3289 = vst [vmem:[#allocation15_spill] sm:$0xff] %v2665_v39  ;;  %v525_v21 = vmul.f32 %v3291_v20, %v2599_v47  ;;  %v526_v5 = vmul.f32 %v3292_v1, %v2599_v47  ;;  %v338_v30 = vadd.f32 %v330_v51, %v273_v6  ;;  %v339_v14 = vadd.f32 %v331_v52, %v274_v12 }
  0xbd   :  { %v2683_v34 = vmul.f32 %v3293_v62, %v2599_v47  ;;  %v2689_v44 = vmul.f32 %v3294_v27, %v2599_v47  ;;  %v340_v56 = vadd.f32 %v332_v33, %v275_v24  ;;  %v3295_v11 = vrot.slane %v2175_v18, %v2085_v41 }
  0xbe   :  { %v3297_v13 = vrot.slane %v2175_v18, %v2087_v42  ;;  %v341_v23 = vadd.f32 %v333_v53, %v276_v54  ;;  %v343_v20 = vadd.f32 %v335_v15, %v278_v8  ;;  %v3298_v50 = vrot.slane %v2191_v26, %v2065_v32 }
  0xbf   :  { %v2699_v29 = vmul.f32 %v3295_v11, %v2599_v47  ;;  %v3299_v52 = vrot.slane %v2191_v26, %v2075_v36  ;;  %v402_v61 = vadd.f32 %v394_v55, %v337_v49  ;;  %v404_v6 = vadd.f32 %v396_v2, %v339_v14 }
  0xc0   :  { %v2705_v60 = vmul.f32 %v3297_v13, %v2599_v47  ;;  %v589_v51 = vmul.f32 %v3298_v50, %v2640_v7  ;;  %v3300_v12 = vrot.slane %v2191_v26, %v2077_v37  ;;  %v342_v1 = vadd.f32 %v334_v57, %v277_v63  ;;  %v2737_v63 = vpop.permute.xlu0 %805 }
  0xc1   :  { %3296 = vst [vmem:[#allocation16_spill] sm:$0xff] %v2699_v29  ;;  %v590_v33 = vmul.f32 %v3299_v52, %v2640_v7  ;;  %v403_v53 = vadd.f32 %v395_v10, %v338_v30  ;;  %v405_v15 = vadd.f32 %v397_v35, %v340_v56  ;;  %v3301_v54 = vrot.slane %v2227_v48, %v2065_v32  ;;  %v2735_v35 = vpop.permute.xlu1 %740 }
  0xc2   :  { %v591_v24 = vmul.f32 %v3300_v12, %v2640_v7  ;;  %v3302_v62 = vrot.slane %v2227_v48, %v2075_v36  ;;  %v3303_v55 = vrot.slane %v2227_v48, %v2077_v37  ;;  %v3304_v57 = vrot.slane %v2227_v48, %v2079_v38 }
  0xc3   :  { %v459_v8 = vmul.f32 %v3301_v54, %v2654_v25  ;;  %v406_v49 = vadd.f32 %v398_v46, %v341_v23  ;;  %v408_v30 = vadd.f32 %v400_v9, %v343_v20  ;;  %v3305_v14 = vrot.slane %v2227_v48, %v2083_v40 }
  0xc4   :  { %v460_v27 = vmul.f32 %v3302_v62, %v2654_v25  ;;  %v461_v2 = vmul.f32 %v3303_v55, %v2654_v25  ;;  %v462_v10 = vmul.f32 %v3304_v57, %v2654_v25  ;;  %v3306_v11 = vrot.slane %v2227_v48, %v2087_v42 }
  0xc5   :  { %v463_v56 = vmul.f32 %v3305_v14, %v2654_v25  ;;  %v3307_v50 = vrot.slane %v2191_v26, %v2079_v38  ;;  %v3308_v46 = vrot.slane %v2191_v26, %v2083_v40  ;;  %v467_v23 = vadd.f32 %v459_v8, %v402_v61 }
  0xc6   :  { %v465_v13 = vmul.f32 %v3306_v11, %v2654_v25  ;;  %v469_v20 = vadd.f32 %v461_v2, %v404_v6  ;;  %v3309_v12 = vrot.slane %v2191_v26, %v2087_v42  ;;  %v2763_v62 = vadd.f32 %v336_v17, %v279_v0  ;;  %v2783_v0 = vpop.permute.xlu0 %1000 }
  0xc7   :  { %v592_v52 = vmul.f32 %v3307_v50, %v2640_v7  ;;  %v2755_v9 = vmul.f32 %v3308_v46, %v2640_v7  ;;  %v2765_v55 = vadd.f32 %v399_v31, %v342_v1  ;;  %v3312_v57 = vrot.slane %v2227_v48, %v2085_v41  ;;  %v2781_v31 = vpop.permute.xlu1 %870  ;;  %3314 = vst [vmem:[#allocation19_spill] sm:$0xff] %v2783_v0 }
  0xc8   :  { %v2761_v54 = vmul.f32 %v3309_v12, %v2640_v7  ;;  %3311 = vst [vmem:[#allocation18_spill] sm:$0xff] %v2763_v62  ;;  %v468_v11 = vadd.f32 %v460_v27, %v403_v53  ;;  %v470_v50 = vadd.f32 %v462_v10, %v405_v15  ;;  %v532_v61 = vadd.f32 %v524_v28, %v467_v23 }
  0xc9   :  { %v2771_v14 = vmul.f32 %v3312_v57, %v2654_v25  ;;  %v3313_v6 = vrot.slane %v2267_v19, %v2065_v32  ;;  %v2777_v2 = vadd.f32 %v463_v56, %v406_v49  ;;  %v2779_v17 = vadd.f32 %v465_v13, %v408_v30 }
  0xca   :  { %3310 = vst [vmem:[#allocation17_spill] sm:$0xff] %v2761_v54  ;;  %v534_v1 = vadd.f32 %v526_v5, %v469_v20  ;;  %v3315_v53 = vrot.slane %v2267_v19, %v2077_v37  ;;  %v597_v28 = vadd.f32 %v589_v51, %v532_v61  ;;  %v3316_v27 = vrot.slane %v2269_v3, %v2065_v32 }
  0xcb   :  { %v654_v8 = vmul.f32 %v3313_v6, %v2693_v59  ;;  %v3317_v49 = vrot.slane %v2283_v4, %v2065_v32  ;;  %v3318_v5 = vrot.slane %v2297_v58, %v2065_v32  ;;  %v3319_v13 = vrot.slane %v2311_v22, %v2065_v32 }
  0xcc   :  { %v656_v15 = vmul.f32 %v3315_v53, %v2693_v59  ;;  %v719_v10 = vmul.f32 %v3316_v27, %v2691_v45  ;;  %v3320_v46 = vrot.slane %v2329_v16, %v2065_v32  ;;  %v599_v20 = vadd.f32 %v591_v24, %v534_v1 }
  0xcd   :  { %v784_v30 = vmul.f32 %v3317_v49, %v2735_v35  ;;  %v849_v56 = vmul.f32 %v3318_v5, %v2737_v63  ;;  %v914_v51 = vmul.f32 %v3319_v13, %v2781_v31  ;;  %v3321_v12 = vrot.slane %v2269_v3, %v2077_v37 }
  0xce   :  { %v1044_v23 = vmul.f32 %v3320_v46, %v2783_v0  ;;  %v662_v61 = vadd.f32 %v654_v8, %v597_v28  ;;  %v3322_v6 = vrot.slane %v2283_v4, %v2077_v37  ;;  %v533_v27 = vadd.f32 %v525_v21, %v468_v11  ;;  %v2833_v46 = vpop.permute.xlu1 %935 }
  0xcf   :  { %v721_v57 = vmul.f32 %v3321_v12, %v2691_v45  ;;  %v3323_v49 = vrot.slane %v2267_v19, %v2075_v36  ;;  %v664_v13 = vadd.f32 %v656_v15, %v599_v20  ;;  %v3324_v24 = vrot.slane %v2297_v58, %v2077_v37  ;;  %v2835_v12 = vpop.permute.xlu0 %1065 }
  0xd0   :  { %v786_v53 = vmul.f32 %v3322_v6, %v2735_v35  ;;  %v3325_v8 = vrot.slane %v2311_v22, %v2077_v37  ;;  %v3326_v21 = vrot.slane %v2329_v16, %v2077_v37  ;;  %3327 = vst [vmem:[#allocation20_spill] sm:$0xff] %v2835_v12  ;;  %v727_v15 = vadd.f32 %v719_v10, %v662_v61 }
  0xd1   :  { %v655_v5 = vmul.f32 %v3323_v49, %v2693_v59  ;;  %v851_v1 = vmul.f32 %v3324_v24, %v2737_v63  ;;  %v598_v20 = vadd.f32 %v590_v33, %v533_v27  ;;  %v3328_v6 = vrot.slane %v2269_v3, %v2075_v36  ;;  %v3332_v27 = vld [vmem:[#allocation6_spill] sm:$0xff] }
  0xd2   :  { %v916_v28 = vmul.f32 %v3325_v8, %v2781_v31  ;;  %v1046_v11 = vmul.f32 %v3326_v21, %v2783_v0  ;;  %v535_v24 = vadd.f32 %v2683_v34, %v470_v50  ;;  %v729_v29 = vadd.f32 %v721_v57, %v664_v13 }
  0xd3   :  { %v720_v49 = vmul.f32 %v3328_v6, %v2691_v45  ;;  %v3329_v8 = vrot.slane %v2283_v4, %v2075_v36  ;;  %v3330_v21 = vrot.slane %v2297_v58, %v2075_v36  ;;  %v3331_v33 = vrot.slane %v2311_v22, %v2075_v36 }
  0xd4   :  { %v792_v61 = vadd.f32 %v784_v30, %v727_v15  ;;  %v3333_v34 = vrot.slane %v3332_v27, %v2065_v32  ;;  %v663_v57 = vadd.f32 %v655_v5, %v598_v20  ;;  %v3334_v13 = vrot.slane %v2329_v16, %v2075_v36 }
  0xd5   :  { %v785_v18 = vmul.f32 %v3329_v8, %v2735_v35  ;;  %v850_v47 = vmul.f32 %v3330_v21, %v2737_v63  ;;  %v915_v10 = vmul.f32 %v3331_v33, %v2781_v31  ;;  %v3335_v8 = vld [vmem:[#allocation8_spill] sm:$0xff]  ;;  %v794_v25 = vadd.f32 %v786_v53, %v729_v29 }
  0xd6   :  { %v979_v50 = vmul.f32 %v3333_v34, %v2833_v46  ;;  %v1045_v6 = vmul.f32 %v3334_v13, %v2783_v0  ;;  %v3336_v21 = vrot.slane %v3335_v8, %v2065_v32  ;;  %v600_v39 = vadd.f32 %v592_v52, %v535_v24 }
  0xd7   :  { %v3337_v30 = vrot.slane %v2267_v19, %v2079_v38  ;;  %v857_v33 = vadd.f32 %v849_v56, %v792_v61  ;;  %v3338_v5 = vrot.slane %v3332_v27, %v2077_v37  ;;  %v728_v34 = vadd.f32 %v720_v49, %v663_v57 }
  0xd8   :  { %v1109_v48 = vmul.f32 %v3336_v21, %v2835_v12  ;;  %v3339_v13 = vrot.slane %v2269_v3, %v2079_v38  ;;  %v2878_v21 = vpop.permute.xlu1 %1419  ;;  %v859_v29 = vadd.f32 %v851_v1, %v794_v25  ;;  %v3340_v52 = vrot.slane %v3335_v8, %v2077_v37 }
  0xd9   :  { %v657_v15 = vmul.f32 %v3337_v30, %v2693_v59  ;;  %v981_v20 = vmul.f32 %v3338_v5, %v2833_v46  ;;  %v3341_v24 = vrot.slane %v2283_v4, %v2079_v38  ;;  %v922_v49 = vadd.f32 %v914_v51, %v857_v33 }
  0xda   :  { %v722_v62 = vmul.f32 %v3339_v13, %v2691_v45  ;;  %v1111_v53 = vmul.f32 %v3340_v52, %v2835_v12  ;;  %v793_v57 = vadd.f32 %v785_v18, %v728_v34  ;;  %v3342_v30 = vrot.slane %v3332_v27, %v2075_v36  ;;  %v3346_v34 = vld [vmem:[#allocation9_spill] sm:$0xff] }
  0xdb   :  { %v665_v56 = vadd.f32 %v657_v15, %v600_v39  ;;  %v787_v61 = vmul.f32 %v3341_v24, %v2735_v35  ;;  %v3343_v25 = vrot.slane %v3335_v8, %v2075_v36  ;;  %v924_v13 = vadd.f32 %v916_v28, %v859_v29 }
  0xdc   :  { %v980_v5 = vmul.f32 %v3342_v30, %v2833_v46  ;;  %v3344_v39 = vrot.slane %v2297_v58, %v2079_v38  ;;  %v3345_v18 = vrot.slane %v2311_v22, %v2079_v38  ;;  %v987_v33 = vadd.f32 %v979_v50, %v922_v49 }
  0xdd   :  { %v1110_v1 = vmul.f32 %v3343_v25, %v2835_v12  ;;  %v730_v52 = vadd.f32 %v722_v62, %v665_v56  ;;  %v3347_v24 = vrot.slane %v3346_v34, %v2065_v32  ;;  %v3348_v62 = vrot.slane %v3346_v34, %v2077_v37 }
  0xde   :  { %v852_v15 = vmul.f32 %v3344_v39, %v2737_v63  ;;  %v917_v51 = vmul.f32 %v3345_v18, %v2781_v31  ;;  %v858_v29 = vadd.f32 %v850_v47, %v793_v57  ;;  %v989_v56 = vadd.f32 %v981_v20, %v924_v13  ;;  %v2920_v18 = vpop.permute.xlu1 %1474  ;;  %v3352_v13 = vld [vmem:[#allocation10_spill] sm:$0xff] }
  0xdf   :  { %v1463_v30 = vmul.f32 %v3347_v24, %v2878_v21  ;;  %v1465_v28 = vmul.f32 %v3348_v62, %v2878_v21  ;;  %v3349_v25 = vrot.slane %v3346_v34, %v2075_v36  ;;  %v795_v43 = vadd.f32 %v787_v61, %v730_v52 }
  0xe0   :  { %v3350_v50 = vrot.slane %v3332_v27, %v2079_v38  ;;  %v1052_v24 = vadd.f32 %v1044_v23, %v987_v33  ;;  %v923_v54 = vadd.f32 %v915_v10, %v858_v29  ;;  %v3351_v47 = vrot.slane %v3346_v34, %v2079_v38 }
  0xe1   :  { %v1464_v39 = vmul.f32 %v3349_v25, %v2878_v21  ;;  %v536_v57 = vadd.f32 %v2689_v44, %v2777_v2  ;;  %v3353_v61 = vrot.slane %v3352_v13, %v2065_v32  ;;  %v1054_v62 = vadd.f32 %v1046_v11, %v989_v56 }
  0xe2   :  { %v982_v49 = vmul.f32 %v3350_v50, %v2833_v46  ;;  %v1466_v20 = vmul.f32 %v3351_v47, %v2878_v21  ;;  %v3354_v25 = vrot.slane %v3352_v13, %v2077_v37  ;;  %v3355_v10 = vrot.slane %v3352_v13, %v2075_v36 }
  0xe3   :  { %v1518_v52 = vmul.f32 %v3353_v61, %v2920_v18  ;;  %v988_v29 = vadd.f32 %v980_v5, %v923_v54  ;;  %v860_v50 = vadd.f32 %v852_v15, %v795_v43  ;;  %v3356_v44 = vrot.slane %v2329_v16, %v2079_v38 }
  0xe4   :  { %v1520_v23 = vmul.f32 %v3354_v25, %v2920_v18  ;;  %v1519_v33 = vmul.f32 %v3355_v10, %v2920_v18  ;;  %v3357_v11 = vrot.slane %v3352_v13, %v2079_v38  ;;  %v3358_v61 = vrot.slane %v3335_v8, %v2079_v38 }
  0xe5   :  { %v1047_v2 = vmul.f32 %v3356_v44, %v2783_v0  ;;  %v1526_v47 = vadd.f32 %v1518_v52, %v1463_v30  ;;  %v3359_v43 = vrot.slane %v2267_v19, %v2083_v40  ;;  %v3360_v5 = vrot.slane %v2269_v3, %v2083_v40  ;;  %v2961_v52 = vpop.permute.xlu1 %1537  ;;  %v3361_v0 = vld [vmem:[#allocation11_spill] sm:$0xff] }
  0xe6   :  { %v1521_v56 = vmul.f32 %v3357_v11, %v2920_v18  ;;  %v1112_v25 = vmul.f32 %v3358_v61, %v2835_v12  ;;  %v1528_v10 = vadd.f32 %v1520_v23, %v1465_v28  ;;  %v1053_v44 = vadd.f32 %v1045_v6, %v988_v29 }
  0xe7   :  { %v658_v54 = vmul.f32 %v3359_v43, %v2693_v59  ;;  %v723_v15 = vmul.f32 %v3360_v5, %v2691_v45  ;;  %v925_v16 = vadd.f32 %v917_v51, %v860_v50  ;;  %v601_v30 = vadd.f32 %v2755_v9, %v536_v57 }
  0xe8   :  { %v1117_v11 = vadd.f32 %v1109_v48, %v1052_v24  ;;  %v1119_v8 = vadd.f32 %v1111_v53, %v1054_v62  ;;  %v1527_v61 = vadd.f32 %v1519_v33, %v1464_v39  ;;  %v1529_v12 = vadd.f32 %v1521_v56, %v1466_v20 }
  0xe9   :  { %v3362_v43 = vrot.slane %v3361_v0, %v2065_v32  ;;  %v3363_v5 = vrot.slane %v3361_v0, %v2077_v37  ;;  %v3364_v9 = vrot.slane %v3361_v0, %v2075_v36  ;;  %v3365_v48 = vrot.slane %v2283_v4, %v2083_v40 }
  0xea   :  { %v990_v51 = vadd.f32 %v982_v49, %v925_v16  ;;  %v3366_v39 = vrot.slane %v3361_v0, %v2079_v38  ;;  %v666_v20 = vadd.f32 %v658_v54, %v601_v30  ;;  %v3367_v57 = vrot.slane %v2297_v58, %v2083_v40  ;;  %v1195_v16 = vpop.f32.mrf.mxu0  ;;  %v1266_v49 = vpop.f32.mrf.mxu1 }
  0xeb   :  { %v1581_v41 = vmul.f32 %v3362_v43, %v2961_v52  ;;  %v1583_v28 = vmul.f32 %v3363_v5, %v2961_v52  ;;  %v1582_v6 = vmul.f32 %v3364_v9, %v2961_v52  ;;  %v788_v53 = vmul.f32 %v3365_v48, %v2735_v35  ;;  %v2991_v54 = vpop.permute.xlu1 %1600 }
  0xec   :  { %v1584_v24 = vmul.f32 %v3366_v39, %v2961_v52  ;;  %v853_v62 = vmul.f32 %v3367_v57, %v2737_v63  ;;  %v1118_v29 = vadd.f32 %v1110_v1, %v1053_v44  ;;  %v3368_v50 = vrot.slane %v2311_v22, %v2083_v40  ;;  %v3371_v44 = vld [vmem:[#allocation12_spill] sm:$0xff] }
  0xed   :  { %v1589_v23 = vadd.f32 %v1581_v41, %v1526_v47  ;;  %v1591_v33 = vadd.f32 %v1583_v28, %v1528_v10  ;;  %v1590_v43 = vadd.f32 %v1582_v6, %v1527_v61  ;;  %v1055_v5 = vadd.f32 %v1047_v2, %v990_v51  ;;  %v1268_v51 = vpop.f32.mrf.mxu1 }
  0xee   :  { %v918_v56 = vmul.f32 %v3368_v50, %v2781_v31  ;;  %v1592_v9 = vadd.f32 %v1584_v24, %v1529_v12  ;;  %v731_v48 = vadd.f32 %v723_v15, %v666_v20  ;;  %v1196_v30 = vadd.f32 %v1195_v16, %v1117_v11  ;;  %v1197_v11 = vpop.f32.mrf.mxu0 }
  0xef   :  { %v1267_v39 = vadd.f32 %v1266_v49, %v1119_v8  ;;  %v3369_v41 = vrot.slane %v3346_v34, %v2083_v40  ;;  %v3370_v47 = vrot.slane %v3352_v13, %v2083_v40  ;;  %v3372_v2 = vrot.slane %v3371_v44, %v2065_v32 }
  0xf0   :  { %v3373_v15 = vrot.slane %v3371_v44, %v2077_v37  ;;  %v3374_v61 = vrot.slane %v3371_v44, %v2075_v36  ;;  %v1120_v6 = vadd.f32 %v1112_v25, %v1055_v5  ;;  %v1198_v24 = vadd.f32 %v1197_v11, %v1118_v29 }
  0xf1   :  { %v1467_v1 = vmul.f32 %v3369_v41, %v2878_v21  ;;  %v1522_v10 = vmul.f32 %v3370_v47, %v2920_v18  ;;  %v1644_v12 = vmul.f32 %v3372_v2, %v2991_v54  ;;  %v3375_v20 = vrot.slane %v3371_v44, %v2079_v38 }
  0xf2   :  { %v1646_v8 = vmul.f32 %v3373_v15, %v2991_v54  ;;  %v1645_v28 = vmul.f32 %v3374_v61, %v2991_v54  ;;  %v796_v57 = vadd.f32 %v788_v53, %v731_v48  ;;  %v3376_v37 = vrot.slane %v3332_v27, %v2083_v40  ;;  %v3386_v61 = vld [vmem:[#allocation14_spill] sm:$0xff] }
  0xf3   :  { %v1647_v32 = vmul.f32 %v3375_v20, %v2991_v54  ;;  %v1652_v16 = vadd.f32 %v1644_v12, %v1589_v23  ;;  %v1269_v47 = vadd.f32 %v1268_v51, %v1120_v6  ;;  %v1530_v25 = vadd.f32 %v1522_v10, %v1467_v1  ;;  %v3379_v1 = vld [vmem:[#allocation2_spill] sm:$0xff]  ;;  %v3390_v20 = vld [vmem:[#allocation7_spill] sm:$0xff] }
  0xf4   :  { %v983_v50 = vmul.f32 %v3376_v37, %v2833_v46  ;;  %v1654_v49 = vadd.f32 %v1646_v8, %v1591_v33  ;;  %v1653_v41 = vadd.f32 %v1645_v28, %v1590_v43  ;;  %v861_v2 = vadd.f32 %v853_v62, %v796_v57  ;;  %v3384_v12 = vld [vmem:[#allocation18_spill] sm:$0xff]  ;;  %v3385_v8 = vld [vmem:[#allocation15_spill] sm:$0xff]  ;;  %v3387_v28 = vld [vmem:[#allocation5_spill] sm:$0xff] }
  0xf5   :  { %v1655_v36 = vadd.f32 %v1647_v32, %v1592_v9  ;;  %v3377_v29 = vrot.slane %v3361_v0, %v2083_v40  ;;  %v1660_v38 = vadd.f32 %v1652_v16, %v1196_v30  ;;  %v538_v48 = vadd.f32 %v2705_v60, %v2779_v17  ;;  %v3381_v60 = vld [vmem:[#allocation17_spill] sm:$0xff] }
  0xf6   :  { %v1662_v15 = vadd.f32 %v1654_v49, %v1267_v39  ;;  %v1661_v53 = vadd.f32 %v1653_v41, %v1198_v24  ;;  %v472_v23 = vadd.f32 %v2771_v14, %v2765_v55  ;;  %v926_v43 = vadd.f32 %v918_v56, %v861_v2  ;;  %v3383_v56 = vld [vmem:[#allocation3_spill] sm:$0xff] }
  0xf7   :  { %v1585_v5 = vmul.f32 %v3377_v29, %v2961_v52  ;;  %v1663_v33 = vadd.f32 %v1655_v36, %v1269_v47  ;;  %v3378_v62 = vrot.slane %v2267_v19, %v2087_v42  ;;  %v3380_v10 = vrot.slane %v2191_v26, %v3379_v1  ;;  %1668 = vst [vmem:[%s3234_s6] sm:$0xff] %v1660_v38  ;;  %v3389_v24 = vld [vmem:[#allocation19_spill] sm:$0xff]  ;;  %v3394_v29 = vld [vmem:[#allocation13_spill] sm:$0xff]  ;;  %v3395_v38 = vld [vmem:[#allocation4_spill] sm:$0xff] }
  0xf8   :  { %1670 = vst [vmem:[%s3234_s6 + $0x10] sm:$0xff] %v1662_v15  ;;  %1669 = vst [vmem:[%s3234_s6 + $0x8] sm:$0xff] %v1661_v53  ;;  %v603_v55 = vadd.f32 %v3381_v60, %v538_v48  ;;  %v3382_v14 = vrot.slane %v2269_v3, %v2087_v42  ;;  %v1509_v39 = vrot.slane %v3352_v13, %v3383_v56 }
  0xf9   :  { %v660_v9 = vmul.f32 %v3378_v62, %v2693_v59  ;;  %v594_v30 = vmul.f32 %v3380_v10, %v2640_v7  ;;  %v409_v11 = vadd.f32 %v3385_v8, %v3384_v12  ;;  %v3388_v6 = vrot.slane %v3387_v28, %v3383_v56  ;;  %1671 = vst [vmem:[%s3234_s6 + $0x18] sm:$0xff] %v1663_v33  ;;  %v3399_v33 = vld [vmem:[#allocation16_spill] sm:$0xff] }
  0xfa   :  { %v725_v17 = vmul.f32 %v3382_v14, %v2691_v45  ;;  %v3391_v32 = vrot.slane %v3390_v20, %v2083_v40  ;;  %v1593_v37 = vadd.f32 %v1585_v5, %v1530_v25  ;;  %v991_v16 = vadd.f32 %v983_v50, %v926_v43  ;;  %v3403_v12 = vld [vmem:[#allocation20_spill] sm:$0xff] }
  0xfb   :  { %v466_v51 = vmul.f32 %v3388_v6, %v3386_v61  ;;  %v3392_v49 = vrot.slane %v3371_v44, %v2083_v40  ;;  %v668_v47 = vadd.f32 %v660_v9, %v603_v55  ;;  %v3393_v36 = vrot.slane %v2283_v4, %v2087_v42  ;;  %v3404_v8 = vld [vmem:[#allocation8_spill] sm:$0xff] }
  0xfc   :  { %v1048_v57 = vmul.f32 %v3391_v32, %v3389_v24  ;;  %v3396_v15 = vrot.slane %v3395_v38, %v3383_v56  ;;  %v3397_v50 = vrot.slane %v2191_v26, %v3383_v56  ;;  %v3398_v5 = vrot.slane %v2297_v58, %v2087_v42 }
  0xfd   :  { %v1648_v41 = vmul.f32 %v3392_v49, %v2991_v54  ;;  %v790_v2 = vmul.f32 %v3393_v36, %v2735_v35  ;;  %v537_v43 = vadd.f32 %v3399_v33, %v472_v23  ;;  %v733_v62 = vadd.f32 %v725_v17, %v668_v47 }
  0xfe   :  { %v531_v53 = vmul.f32 %v3396_v15, %v3394_v29  ;;  %v596_v25 = vmul.f32 %v3397_v50, %v2640_v7  ;;  %v855_v48 = vmul.f32 %v3398_v5, %v2737_v63  ;;  %v3400_v9 = vrot.slane %v3346_v34, %v2087_v42 }
  0xff   :  { %v3401_v60 = vrot.slane %v3352_v13, %v2087_v42  ;;  %v3402_v26 = vrot.slane %v2267_v19, %v3379_v1  ;;  %v474_v14 = vadd.f32 %v466_v51, %v409_v11  ;;  %v3405_v23 = vrot.slane %v3404_v8, %v2083_v40 }
 0x100   :  { %v1469_v10 = vmul.f32 %v3400_v9, %v2878_v21  ;;  %v602_v61 = vadd.f32 %v594_v30, %v537_v43  ;;  %v3406_v28 = vrot.slane %v2269_v3, %v3379_v1  ;;  %v1056_v32 = vadd.f32 %v1048_v57, %v991_v16 }
 0x101   :  { %v1524_v55 = vmul.f32 %v3401_v60, %v2920_v18  ;;  %v659_v7 = vmul.f32 %v3402_v26, %v2693_v59  ;;  %v1113_v17 = vmul.f32 %v3405_v23, %v3403_v12  ;;  %v1656_v49 = vadd.f32 %v1648_v41, %v1593_v37 }
 0x102   :  { %v724_v6 = vmul.f32 %v3406_v28, %v2691_v45  ;;  %v798_v47 = vadd.f32 %v790_v2, %v733_v62  ;;  %v3407_v36 = vrot.slane %v2311_v22, %v2087_v42  ;;  %v3408_v11 = vrot.slane %v3332_v27, %v2087_v42  ;;  %v1337_v28 = vpop.f32.mrf.mxu0 }
 0x103   :  { %v3409_v30 = vrot.slane %v3390_v20, %v2087_v42  ;;  %v667_v38 = vadd.f32 %v659_v7, %v602_v61  ;;  %v3410_v57 = vrot.slane %v2283_v4, %v3379_v1  ;;  %v3411_v41 = vrot.slane %v3404_v8, %v2087_v42 }
 0x104   :  { %v920_v29 = vmul.f32 %v3407_v36, %v2781_v31  ;;  %v985_v40 = vmul.f32 %v3408_v11, %v2833_v46  ;;  %v863_v16 = vadd.f32 %v855_v48, %v798_v47  ;;  %v1532_v15 = vadd.f32 %v1524_v55, %v1469_v10 }
 0x105   :  { %v1050_v51 = vmul.f32 %v3409_v30, %v3389_v24  ;;  %v789_v37 = vmul.f32 %v3410_v57, %v2735_v35  ;;  %v1115_v2 = vmul.f32 %v3411_v41, %v3403_v12  ;;  %v3412_v50 = vrot.slane %v3361_v0, %v2087_v42 }
 0x106   :  { %v732_v33 = vadd.f32 %v724_v6, %v667_v38  ;;  %v3413_v43 = vrot.slane %v2297_v58, %v3379_v1  ;;  %v539_v9 = vadd.f32 %v531_v53, %v474_v14  ;;  %v3414_v48 = vrot.slane %v2267_v19, %v3383_v56 }
 0x107   :  { %v1587_v5 = vmul.f32 %v3412_v50, %v2961_v52  ;;  %v1121_v26 = vadd.f32 %v1113_v17, %v1056_v32  ;;  %v928_v7 = vadd.f32 %v920_v29, %v863_v16  ;;  %v3415_v10 = vrot.slane %v2311_v22, %v3379_v1  ;;  %v1408_v50 = vpop.f32.mrf.mxu1 }
 0x108   :  { %v854_v62 = vmul.f32 %v3413_v43, %v2737_v63  ;;  %v661_v60 = vmul.f32 %v3414_v48, %v2693_v59  ;;  %v3416_v23 = vrot.slane %v3346_v34, %v3379_v1  ;;  %v797_v6 = vadd.f32 %v789_v37, %v732_v33 }
 0x109   :  { %v919_v55 = vmul.f32 %v3415_v10, %v2781_v31  ;;  %v3417_v53 = vrot.slane %v3352_v13, %v3379_v1  ;;  %v604_v59 = vadd.f32 %v596_v25, %v539_v9  ;;  %v3418_v14 = vrot.slane %v2269_v3, %v3383_v56 }
 0x10a   :  { %v1468_v61 = vmul.f32 %v3416_v23, %v2878_v21  ;;  %v1338_v32 = vadd.f32 %v1337_v28, %v1121_v26  ;;  %v993_v47 = vadd.f32 %v985_v40, %v928_v7  ;;  %v1595_v36 = vadd.f32 %v1587_v5, %v1532_v15 }
 0x10b   :  { %v1523_v19 = vmul.f32 %v3417_v53, %v2920_v18  ;;  %v726_v17 = vmul.f32 %v3418_v14, %v2691_v45  ;;  %v3419_v29 = vrot.slane %v3371_v44, %v2087_v42  ;;  %v862_v30 = vadd.f32 %v854_v62, %v797_v6 }
 0x10c   :  { %v3420_v38 = vrot.slane %v3332_v27, %v3379_v1  ;;  %v669_v25 = vadd.f32 %v661_v60, %v604_v59  ;;  %v3421_v3 = vrot.slane %v2283_v4, %v3383_v56  ;;  %v1664_v37 = vadd.f32 %v1656_v49, %v1338_v32 }
 0x10d   :  { %v1650_v11 = vmul.f32 %v3419_v29, %v2991_v54  ;;  %v1058_v40 = vadd.f32 %v1050_v51, %v993_v47  ;;  %v3422_v16 = vrot.slane %v3390_v20, %v3379_v1  ;;  %v3423_v41 = vrot.slane %v3361_v0, %v3379_v1 }
 0x10e   :  { %v984_v57 = vmul.f32 %v3420_v38, %v2833_v46  ;;  %v791_v45 = vmul.f32 %v3421_v3, %v2735_v35  ;;  %v927_v5 = vadd.f32 %v919_v55, %v862_v30  ;;  %v1531_v33 = vadd.f32 %v1523_v19, %v1468_v61  ;;  %1672 = vst [vmem:[%s3234_s6 + $0x20] sm:$0xff] %v1664_v37 }
 0x10f   :  { %v1049_v42 = vmul.f32 %v3422_v16, %v3389_v24  ;;  %v1586_v15 = vmul.f32 %v3423_v41, %v2961_v52  ;;  %v734_v43 = vadd.f32 %v726_v17, %v669_v25  ;;  %v3424_v4 = vrot.slane %v2297_v58, %v3383_v56 }
 0x110   :  { %v1123_v49 = vadd.f32 %v1115_v2, %v1058_v40  ;;  %v3425_v51 = vrot.slane %v3404_v8, %v3379_v1  ;;  %v3426_v9 = vrot.slane %v2311_v22, %v3383_v56  ;;  %v1572_v60 = vrot.slane %v3361_v0, %v3383_v56 }
 0x111   :  { %v856_v35 = vmul.f32 %v3424_v4, %v2737_v63  ;;  %v992_v58 = vadd.f32 %v984_v57, %v927_v5  ;;  %v799_v63 = vadd.f32 %v791_v45, %v734_v43  ;;  %v3427_v26 = vrot.slane %v3346_v34, %v3383_v56 }
 0x112   :  { %v1114_v62 = vmul.f32 %v3425_v51, %v3403_v12  ;;  %v921_v48 = vmul.f32 %v3426_v9, %v2781_v31  ;;  %v1525_v7 = vmul.f32 %v1509_v39, %v2920_v18  ;;  %v1409_v10 = vadd.f32 %v1408_v50, %v1123_v49  ;;  %v1339_v18 = vpop.f32.mrf.mxu0 }
 0x113   :  { %v1470_v2 = vmul.f32 %v3427_v26, %v2878_v21  ;;  %v1658_v55 = vadd.f32 %v1650_v11, %v1595_v36  ;;  %v3428_v22 = vrot.slane %v3371_v44, %v3379_v1  ;;  %v1100_v0 = vrot.slane %v3404_v8, %v3383_v56 }
 0x114   :  { %v1057_v23 = vadd.f32 %v1049_v42, %v992_v58  ;;  %v1594_v61 = vadd.f32 %v1586_v15, %v1531_v33  ;;  %v864_v28 = vadd.f32 %v856_v35, %v799_v63  ;;  %v3429_v21 = vrot.slane %v3332_v27, %v3383_v56 }
 0x115   :  { %v1649_v31 = vmul.f32 %v3428_v22, %v2991_v54  ;;  %v1666_v13 = vadd.f32 %v1658_v55, %v1409_v10  ;;  %v3430_v39 = vrot.slane %v3390_v20, %v3383_v56  ;;  %v1635_v1 = vrot.slane %v3371_v44, %v3383_v56  ;;  %v1410_v44 = vpop.f32.mrf.mxu1 }
 0x116   :  { %v986_v34 = vmul.f32 %v3429_v21, %v2833_v46  ;;  %v1122_v53 = vadd.f32 %v1114_v62, %v1057_v23  ;;  %v929_v8 = vadd.f32 %v921_v48, %v864_v28  ;;  %v1533_v19 = vadd.f32 %v1525_v7, %v1470_v2 }
 0x117   :  { %v1051_v6 = vmul.f32 %v3430_v39, %v3389_v24  ;;  %v1588_v59 = vmul.f32 %v1572_v60, %v2961_v52  ;;  %1674 = vst [vmem:[%s3234_s6 + $0x30] sm:$0xff] %v1666_v13  ;;  %v1657_v27 = vadd.f32 %v1649_v31, %v1594_v61  ;;  %v1116_v17 = vmul.f32 %v1100_v0, %v3403_v12 }
 0x118   :  { %v1340_v46 = vadd.f32 %v1339_v18, %v1122_v53  ;;  %v994_v14 = vadd.f32 %v986_v34, %v929_v8  ;;  %v1651_v47 = vmul.f32 %v1635_v1, %v2991_v54 }
 0x119   :  { %v1596_v24 = vadd.f32 %v1588_v59, %v1533_v19 }
 0x11a   :  { %v1665_v32 = vadd.f32 %v1657_v27, %v1340_v46  ;;  %v1059_v20 = vadd.f32 %v1051_v6, %v994_v14 }
 0x11b   :  { %v1659_v36 = vadd.f32 %v1651_v47, %v1596_v24 }
 0x11c   :  { %1673 = vst [vmem:[%s3234_s6 + $0x28] sm:$0xff] %v1665_v32  ;;  %v1124_v52 = vadd.f32 %v1116_v17, %v1059_v20 }
 0x11e   :  { %v1411_v56 = vadd.f32 %v1410_v44, %v1124_v52 }
 0x120   :  { %v1667_v29 = vadd.f32 %v1659_v36, %v1411_v56 }
 0x122   :  { %1675 = vst [vmem:[%s3234_s6 + $0x38] sm:$0xff] %v1667_v29 }

</bundles_post_ra>
